<compile_context>
chip_gen: v7x
topology: tpu7x:2x2x1
jax: 0.10.0
libtpu: 0.0.40
codegen_flags: <defaults>
</compile_context>

<pallas_src>
import functools

import numpy as np
import jax
import jax.numpy as jnp
from jax.experimental import pallas as pl
from jax.experimental.pallas import tpu as pltpu


# ----------------------------------------------------------------------------
# Learner config (canonical MAML MNIST network) + parameter init
# ----------------------------------------------------------------------------
CONFIG = [
    ('conv2d', [8, 1, 3, 3, 1, 1]),     # (Cout, Cin, KH, KW, stride, pad)
    ('bn', [8]),
    ('relu', [True]),
    ('max_pool2d', [2, 2, 0]),          # (k, stride, pad)
    ('conv2d', [16, 8, 3, 3, 1, 1]),
    ('bn', [16]),
    ('relu', [True]),
    ('max_pool2d', [2, 2, 0]),
    ('flatten', []),
    ('fc', [5, 16 * 7 * 7]),            # (out, in)
]


def init_params(key, config):
    """kaiming_normal_-style weights, zero biases, ones/zeros bn affine,
    zeros/ones bn running stats (mirrors the torch module's init)."""
    params, bn_stats = [], []
    for name, param in config:
        if name == 'conv2d':
            cout, cin, kh, kw = param[:4]
            key, sub = jax.random.split(key)
            std = (2.0 / (cin * kh * kw)) ** 0.5
            params.append(jax.random.normal(sub, (cout, cin, kh, kw), jnp.float32) * std)
            params.append(jnp.zeros((cout,), jnp.float32))
        elif name == 'fc':
            out_d, in_d = param
            key, sub = jax.random.split(key)
            std = (2.0 / in_d) ** 0.5
            params.append(jax.random.normal(sub, (out_d, in_d), jnp.float32) * std)
            params.append(jnp.zeros((out_d,), jnp.float32))
        elif name == 'bn':
            c = param[0]
            params.append(jnp.ones((c,), jnp.float32))     # gamma
            params.append(jnp.zeros((c,), jnp.float32))    # beta
            bn_stats.append(jnp.zeros((c,), jnp.float32))  # running_mean
            bn_stats.append(jnp.ones((c,), jnp.float32))   # running_var
        elif name in ('relu', 'max_pool2d', 'flatten'):
            continue
        else:
            raise NotImplementedError(name)
    return params, bn_stats


# ----------------------------------------------------------------------------
# The single fused forward kernel
# ----------------------------------------------------------------------------
def _fused_forward_kernel(
        im2col1_ref, w1_ref, m1_ref, sel_ref, w2_ref, m2_ref, bnp_ref,
        wfc_ref, fcb_ref, out_ref,
        act1_ref, slab2_ref, col2_ref, act2_ref,
        *, dims, bn_training):
    N, C1, C2, NCLS = dims['N'], dims['C1'], dims['C2'], dims['NCLS']
    WP1, S1, Q1 = dims['WP1'], dims['S1'], dims['Q1']
    WP2, S2, L2, GD2 = dims['WP2'], dims['S2'], dims['L2'], dims['GD2']
    KFC, CNT1, CNT2 = dims['KFC'], dims['CNT1'], dims['CNT2']
    OUT_R, OUT_C = dims['OUT_R'], dims['OUT_C']
    f32 = jnp.float32

    def bn_relu(acc, mask, count, scale_c, shift_c):
        if bn_training:
            # batch stats over valid (interior) positions; conv bias was dropped
            # in the wrapper because BN mean-subtraction cancels it exactly.
            xm = acc * mask
            mean = jnp.sum(xm, axis=1, keepdims=True) * (1.0 / count)
            msq = jnp.sum(xm * xm, axis=1, keepdims=True) * (1.0 / count)
            var = msq - mean * mean
            s = scale_c * jax.lax.rsqrt(var + 1e-5)           # scale_c = gamma
            return jnp.maximum((acc - mean) * s + shift_c, 0.0)  # shift_c = beta
        # eval: scale_c / shift_c are the fully folded scale / shift
        return jnp.maximum(acc * scale_c + shift_c, 0.0)

    # ---- conv1: single (C1,9)x(9,L1) MXU matmul, BN+relu fused, stage in VMEM ----
    acc1 = jnp.dot(w1_ref[...], im2col1_ref[...], preferred_element_type=f32)
    act1_ref[...] = bn_relu(acc1, m1_ref[...], float(CNT1),
                            bnp_ref[0:C1, 0:1], bnp_ref[0:C1, 1:2])

    # ---- pool1 + stride-2 downsample + re-pad: per-sample max-of-4 shifted ----
    # ---- ref loads, then ONE selection matmul + ONE aligned 256-lane store ----
    slab2_ref[...] = jnp.zeros(slab2_ref.shape, f32)
    for b in range(N):
        base = b * S1
        w00 = act1_ref[:, base:base + Q1]
        w01 = act1_ref[:, base + 1:base + 1 + Q1]
        w10 = act1_ref[:, base + WP1:base + WP1 + Q1]
        w11 = act1_ref[:, base + WP1 + 1:base + WP1 + 1 + Q1]
        pooled = jnp.maximum(jnp.maximum(w00, w01), jnp.maximum(w10, w11))
        slab2_ref[:, GD2 + b * S2:GD2 + (b + 1) * S2] = jnp.dot(
            pooled, sel_ref[...], preferred_element_type=f32)

    # ---- conv2: in-kernel im2col (9 aligned block copies) + ONE matmul ----
    for di in range(3):
        for dj in range(3):
            t = di * 3 + dj
            off = GD2 + (di - 1) * WP2 + (dj - 1)
            col2_ref[t * C1:(t + 1) * C1, :] = slab2_ref[:, off:off + L2]
    acc2 = jnp.dot(w2_ref[...], col2_ref[...], preferred_element_type=f32)
    act2_ref[...] = bn_relu(acc2, m2_ref[...], float(CNT2),
                            bnp_ref[C1:C1 + C2, 0:1], bnp_ref[C1:C1 + C2, 1:2])

    # ---- pool2 + flatten + fc: pre-scattered weight, lane-dense output slab ----
    rid = jax.lax.broadcasted_iota(jnp.int32, (OUT_R, OUT_C), 0)
    cid = jax.lax.broadcasted_iota(jnp.int32, (OUT_R, OUT_C), 1)
    out_val = jnp.zeros((OUT_R, OUT_C), f32)
    for b in range(N):
        base = b * S2
        w00 = act2_ref[:, base:base + KFC]
        w01 = act2_ref[:, base + 1:base + 1 + KFC]
        w10 = act2_ref[:, base + WP2:base + WP2 + KFC]
        w11 = act2_ref[:, base + WP2 + 1:base + WP2 + 1 + KFC]
        window = jnp.maximum(jnp.maximum(w00, w01), jnp.maximum(w10, w11))
        for o in range(NCLS):
            prod = window * wfc_ref[o]                       # (C2, KFC)
            s = jnp.sum(jnp.sum(prod, axis=1, keepdims=True),
                        axis=0, keepdims=True)               # (1, 1)
            s = s + fcb_ref[0:1, o:o + 1]
            onehot = jnp.logical_and(rid == b, cid == o).astype(f32)
            out_val = out_val + onehot * s
    out_ref[...] = out_val                                   # one aligned store


# ----------------------------------------------------------------------------
# pallas_call plumbing (single whole-array blocks, grid=(1,))
# ----------------------------------------------------------------------------
def _zero_map(i, *, nd):
    return (0,) * nd


def _block(shape):
    return pl.BlockSpec(tuple(shape), functools.partial(_zero_map, nd=len(shape)))


def forward(x_nchw, params, bn_stats, config, bn_training=True):
    """Fused Pallas forward pass for the canonical MAML Learner config."""
    names = [name for name, _ in config]
    assert names == ['conv2d', 'bn', 'relu', 'max_pool2d',
                     'conv2d', 'bn', 'relu', 'max_pool2d', 'flatten', 'fc'], names
    c1, cin, kh, kw, st, pd = config[0][1]
    c2 = config[4][1][0]
    ncls, fin = config[9][1]
    assert (cin, kh, kw, st, pd) == (1, 3, 3, 1, 1)
    assert config[4][1][1:] == [c1, 3, 3, 1, 1]
    assert config[3][1] == [2, 2, 0] and config[7][1] == [2, 2, 0]
    assert len(params) == 10 and len(bn_stats) == 4

    n, cin_x, h, w = x_nchw.shape
    assert cin_x == 1 and h == w and h % 4 == 0
    assert c1 % 8 == 0 and c2 % 8 == 0
    assert n <= 8 and ncls <= 128

    # ---- derived flat-slab geometry ----
    wp1 = h + 2                        # padded width, layer 1
    s1 = wp1 * wp1                     # per-sample padded size, layer 1
    l1 = n * s1
    p1 = h // 2                        # pool1 output H/W
    wp2 = p1 + 2
    s2 = wp2 * wp2
    l2 = n * s2
    p2 = p1 // 2                       # pool2 output H/W
    gd2 = 128                          # left/right guard for slab2 -> aligned stores
    buf2 = gd2 + l2 + gd2
    kfc = (2 * (p2 - 1) + 1) * wp2 + (2 * (p2 - 1) + 1) + 1
    q1 = (-(-((h - 1) * wp1 + (h - 1) + 1) // 8)) * 8   # pool1 window len (mult of 8)
    assert fin == c2 * p2 * p2
    assert s2 % 128 == 0                               # aligned per-sample slab2 stores
    assert gd2 >= wp2 + 2
    assert (n - 1) * s1 + wp1 + 1 + q1 <= l1           # pool1 window loads in range
    assert (n - 1) * s2 + wp2 + 1 + kfc <= l2          # pool2 window loads in range
    cnt1 = n * h * h                   # valid positions for bn1 stats
    cnt2 = n * p1 * p1                 # valid positions for bn2 stats
    out_r, out_c = 8, 128              # lane-dense output slab

    f32 = jnp.float32
    (w1, b1, gam1, bet1, w2, b2, gam2, bet2, fcw, fcb) = params
    (rm1, rv1, rm2, rv2) = bn_stats

    # ---- layout plumbing (outside the kernel) ----
    # conv1 im2col: 9 shifted copies of the padded, flattened input (guarded).
    gd1 = wp1 + 2
    xpad = jnp.pad(x_nchw[:, 0, :, :].astype(f32), ((0, 0), (1, 1), (1, 1)))
    xg = jnp.pad(xpad.reshape(l1), (gd1, gd1))
    rows = []
    for di in range(3):
        for dj in range(3):
            off = gd1 + (di - 1) * wp1 + (dj - 1)
            rows.append(xg[off:off + l1])
    im2col1 = jnp.stack(rows, axis=0)                              # (9, l1)

    w1c = w1.reshape(c1, kh * kw).astype(f32)                      # (C1, 9)
    # conv2 weight matched to im2col row order (t = di*3+dj, then cin)
    w2mat = jnp.transpose(w2, (0, 2, 3, 1)).reshape(c2, 9 * c1).astype(f32)

    # flatten + fc folded weight: (ncls, c2, kfc), nonzero only at pool-source cols
    wfr = fcw.reshape(ncls, c2, p2, p2).astype(f32)
    kidx = ((2 * np.arange(p2)[:, None] + 1) * wp2
            + (2 * np.arange(p2)[None, :] + 1)).reshape(-1)
    wfc = jnp.zeros((ncls, c2, kfc), f32).at[:, :, kidx].set(
        wfr.reshape(ncls, c2, p2 * p2))
    fcb_row = jnp.zeros((1, out_c), f32).at[0, :ncls].set(fcb.astype(f32))

    # interior (valid conv-output) masks for BN batch statistics
    m1 = np.zeros((1, l1), np.float32)
    m2 = np.zeros((1, l2), np.float32)
    for b in range(n):
        for i in range(1, wp1 - 1):
            m1[0, b * s1 + i * wp1 + 1: b * s1 + i * wp1 + wp1 - 1] = 1.0
        for i in range(1, wp2 - 1):
            m2[0, b * s2 + i * wp2 + 1: b * s2 + i * wp2 + wp2 - 1] = 1.0

    # shared per-sample pool1->conv2-slab selection matrix (0/1).  Row q of the
    # pooled window maps to slab2 per-sample position p; rows/cols outside the
    # valid pool geometry are zero, so guard/pad lanes never leak through.
    sel = np.zeros((q1, s2), np.float32)
    for i in range(p1):
        for j in range(p1):
            sel[(2 * i + 1) * wp1 + (2 * j + 1), (i + 1) * wp2 + (j + 1)] = 1.0

    # packed per-channel BN params: training -> (gamma, beta);
    # eval -> fully folded (scale, shift) including conv bias and running stats.
    if bn_training:
        c1a, c1b, c2a, c2b = gam1, bet1, gam2, bet2
    else:
        sc1 = gam1 / jnp.sqrt(rv1 + 1e-5)
        sc2 = gam2 / jnp.sqrt(rv2 + 1e-5)
        c1a, c1b = sc1, (b1 - rm1) * sc1 + bet1
        c2a, c2b = sc2, (b2 - rm2) * sc2 + bet2
    bnp = jnp.concatenate(
        [jnp.stack([c1a, c1b], axis=1), jnp.stack([c2a, c2b], axis=1)],
        axis=0).astype(f32)                                        # (c1+c2, 2)

    dims = dict(N=n, C1=c1, C2=c2, NCLS=ncls, WP1=wp1, S1=s1, Q1=q1,
                WP2=wp2, S2=s2, L2=l2, GD2=gd2, KFC=kfc,
                CNT1=cnt1, CNT2=cnt2, OUT_R=out_r, OUT_C=out_c)

    operands = (im2col1, w1c, jnp.asarray(m1), jnp.asarray(sel), w2mat,
                jnp.asarray(m2), bnp, wfc, fcb_row)

    out = pl.pallas_call(
        functools.partial(_fused_forward_kernel, dims=dims,
                          bn_training=bool(bn_training)),
        out_shape=jax.ShapeDtypeStruct((out_r, out_c), f32),
        grid=(1,),
        in_specs=[_block(op.shape) for op in operands],
        out_specs=_block((out_r, out_c)),
        scratch_shapes=[
            pltpu.VMEM((c1, l1), f32),        # act1 (post bn+relu), staged
            pltpu.VMEM((c1, buf2), f32),      # conv2 padded input slab
            pltpu.VMEM((9 * c1, l2), f32),    # conv2 im2col
            pltpu.VMEM((c2, l2), f32),        # act2 (post bn+relu), staged
        ],
        compiler_params=pltpu.CompilerParams(
            dimension_semantics=("arbitrary",)),
    )(*operands)
    return out[:n, :ncls]


# ----------------------------------------------------------------------------
# Pure-JAX reference (for correctness check only)
# ----------------------------------------------------------------------------
def forward_reference(x, params, bn_stats, bn_training=True):
    w1, b1, g1, be1, w2, b2, g2, be2, fw, fb = params
    rm1, rv1, rm2, rv2 = bn_stats

    def conv(h, w, b):
        out = jax.lax.conv_general_dilated(
            h, w, (1, 1), ((1, 1), (1, 1)),
            dimension_numbers=('NCHW', 'OIHW', 'NCHW'),
            precision=jax.lax.Precision.HIGHEST)
        return out + b[None, :, None, None]

    def bn(h, g, be, rm, rv):
        if bn_training:
            mean = jnp.mean(h, axis=(0, 2, 3), keepdims=True)
            var = jnp.mean((h - mean) ** 2, axis=(0, 2, 3), keepdims=True)
        else:
            mean = rm[None, :, None, None]
            var = rv[None, :, None, None]
        return ((h - mean) * jax.lax.rsqrt(var + 1e-5) * g[None, :, None, None]
                + be[None, :, None, None])

    def pool(h):
        return jax.lax.reduce_window(h, -jnp.inf, jax.lax.max,
                                     (1, 1, 2, 2), (1, 1, 2, 2), 'VALID')

    h = pool(jnp.maximum(bn(conv(x, w1, b1), g1, be1, rm1, rv1), 0.0))
    h = pool(jnp.maximum(bn(conv(h, w2, b2), g2, be2, rm2, rv2), 0.0))
    h = h.reshape(h.shape[0], -1)
    return jnp.dot(h, fw.T, precision=jax.lax.Precision.HIGHEST) + fb


if __name__ == "__main__":
    key = jax.random.PRNGKey(0)
    params, bn_stats = init_params(key, CONFIG)
    x = jax.random.normal(jax.random.fold_in(key, 123), (2, 1, 28, 28), jnp.float32)

    # training-mode BN (batch statistics), matches torch default bn_training=True
    out = jax.block_until_ready(forward(x, params, bn_stats, CONFIG, bn_training=True))
    assert out.shape == (2, 5), out.shape
    assert bool(jnp.all(jnp.isfinite(out)))
    ref = forward_reference(x, params, bn_stats, bn_training=True)
    assert bool(jnp.allclose(out, ref, atol=1e-4, rtol=1e-4)), (out, ref)

    # eval-mode BN path (running statistics, folded scale/shift)
    out_e = jax.block_until_ready(forward(x, params, bn_stats, CONFIG, bn_training=False))
    ref_e = forward_reference(x, params, bn_stats, bn_training=False)
    assert bool(jnp.allclose(out_e, ref_e, atol=1e-4, rtol=1e-4)), (out_e, ref_e)

    print("KERNEL_OK")
</pallas_src>

<mosaic_0001>
module attributes {stable_mosaic.version = 11 : i64} {
  func.func @_fused_forward_kernel(%arg0: i32, %arg1: memref<9x1800xf32, #tpu.memory_space<vmem>>, %arg2: memref<8x9xf32, #tpu.memory_space<vmem>>, %arg3: memref<1x1800xf32, #tpu.memory_space<vmem>>, %arg4: memref<840x256xf32, #tpu.memory_space<vmem>>, %arg5: memref<16x72xf32, #tpu.memory_space<vmem>>, %arg6: memref<1x512xf32, #tpu.memory_space<vmem>>, %arg7: memref<24x2xf32, #tpu.memory_space<vmem>>, %arg8: memref<5x16x222xf32, #tpu.memory_space<vmem>>, %arg9: memref<1x128xf32, #tpu.memory_space<vmem>>, %arg10: memref<8x128xf32, #tpu.memory_space<vmem>>, %arg11: memref<8x1800xf32, #tpu.memory_space<vmem>>, %arg12: memref<8x768xf32, #tpu.memory_space<vmem>>, %arg13: memref<72x512xf32, #tpu.memory_space<vmem>>, %arg14: memref<16x512xf32, #tpu.memory_space<vmem>>) attributes {dimension_semantics = [#tpu.dimension_semantics<arbitrary>], iteration_bounds = array<i64: 1>, scalar_prefetch = 0 : i64, scratch_operands = 4 : i64, tpu.core_type = #tpu.core_type<tc>, window_params = [{pipeline_mode = #tpu.pipeline_mode<synchronous>, transform_indices = @transform_0, window_bounds = array<i64: 9, 1800>}, {pipeline_mode = #tpu.pipeline_mode<synchronous>, transform_indices = @transform_1, window_bounds = array<i64: 8, 9>}, {pipeline_mode = #tpu.pipeline_mode<synchronous>, transform_indices = @transform_2, window_bounds = array<i64: 1, 1800>}, {pipeline_mode = #tpu.pipeline_mode<synchronous>, transform_indices = @transform_3, window_bounds = array<i64: 840, 256>}, {pipeline_mode = #tpu.pipeline_mode<synchronous>, transform_indices = @transform_4, window_bounds = array<i64: 16, 72>}, {pipeline_mode = #tpu.pipeline_mode<synchronous>, transform_indices = @transform_5, window_bounds = array<i64: 1, 512>}, {pipeline_mode = #tpu.pipeline_mode<synchronous>, transform_indices = @transform_6, window_bounds = array<i64: 24, 2>}, {pipeline_mode = #tpu.pipeline_mode<synchronous>, transform_indices = @transform_7, window_bounds = array<i64: 5, 16, 222>}, {pipeline_mode = #tpu.pipeline_mode<synchronous>, transform_indices = @transform_8, window_bounds = array<i64: 1, 128>}, {pipeline_mode = #tpu.pipeline_mode<synchronous>, transform_indices = @transform_9, window_bounds = array<i64: 8, 128>}]} {
    %c0 = arith.constant 0 : index
    %c0_0 = arith.constant 0 : index
    %0 = vector.load %arg2[%c0, %c0_0] : memref<8x9xf32, #tpu.memory_space<vmem>>, vector<8x9xf32>
    %c0_1 = arith.constant 0 : index
    %c0_2 = arith.constant 0 : index
    %1 = vector.load %arg1[%c0_1, %c0_2] : memref<9x1800xf32, #tpu.memory_space<vmem>>, vector<9x1800xf32>
    %cst = arith.constant dense<0.000000e+00> : vector<8x1800xf32>
    %2 = tpu.matmul %0, %1, %cst {dimension_numbers = #tpu.dot_dimension_numbers<[1], [0], [0], [1], [0, 0, 1, 1], [], []>} : vector<8x9xf32>, vector<9x1800xf32>, vector<8x1800xf32> -> vector<8x1800xf32>
    %c0_3 = arith.constant 0 : index
    %c0_4 = arith.constant 0 : index
    %3 = vector.load %arg3[%c0_3, %c0_4] : memref<1x1800xf32, #tpu.memory_space<vmem>>, vector<1x1800xf32>
    %c0_5 = arith.constant 0 : index
    %c0_6 = arith.constant 0 : index
    %4 = vector.load %arg7[%c0_5, %c0_6] : memref<24x2xf32, #tpu.memory_space<vmem>>, vector<8x1xf32>
    %c0_7 = arith.constant 0 : index
    %c1 = arith.constant 1 : index
    %5 = vector.load %arg7[%c0_7, %c1] : memref<24x2xf32, #tpu.memory_space<vmem>>, vector<8x1xf32>
    %6 = vector.broadcast %3 : vector<1x1800xf32> to vector<8x1800xf32>
    %7 = arith.mulf %2, %6 : vector<8x1800xf32>
    %cst_8 = arith.constant dense<0.000000e+00> : vector<8xf32>
    %8 = vector.multi_reduction <add>, %7, %cst_8 [1] : vector<8x1800xf32> to vector<8xf32>
    %9 = vector.shape_cast %8 : vector<8xf32> to vector<8x1xf32>
    %cst_9 = arith.constant 6.37755089E-4 : f32
    %10 = vector.broadcast %cst_9 : f32 to vector<8x1xf32>
    %11 = arith.mulf %9, %10 : vector<8x1xf32>
    %12 = arith.mulf %7, %7 : vector<8x1800xf32>
    %cst_10 = arith.constant dense<0.000000e+00> : vector<8xf32>
    %13 = vector.multi_reduction <add>, %12, %cst_10 [1] : vector<8x1800xf32> to vector<8xf32>
    %14 = vector.shape_cast %13 : vector<8xf32> to vector<8x1xf32>
    %cst_11 = arith.constant 6.37755089E-4 : f32
    %15 = vector.broadcast %cst_11 : f32 to vector<8x1xf32>
    %16 = arith.mulf %14, %15 : vector<8x1xf32>
    %17 = arith.mulf %11, %11 : vector<8x1xf32>
    %18 = arith.subf %16, %17 : vector<8x1xf32>
    %cst_12 = arith.constant 9.99999974E-6 : f32
    %19 = vector.broadcast %cst_12 : f32 to vector<8x1xf32>
    %20 = arith.addf %18, %19 : vector<8x1xf32>
    %21 = math.rsqrt %20 : vector<8x1xf32>
    %22 = arith.mulf %4, %21 : vector<8x1xf32>
    %23 = vector.broadcast %11 : vector<8x1xf32> to vector<8x1800xf32>
    %24 = arith.subf %2, %23 : vector<8x1800xf32>
    %25 = vector.broadcast %22 : vector<8x1xf32> to vector<8x1800xf32>
    %26 = arith.mulf %24, %25 : vector<8x1800xf32>
    %27 = vector.broadcast %5 : vector<8x1xf32> to vector<8x1800xf32>
    %28 = arith.addf %26, %27 : vector<8x1800xf32>
    %cst_13 = arith.constant 0.000000e+00 : f32
    %29 = vector.broadcast %cst_13 : f32 to vector<8x1800xf32>
    %30 = arith.maximumf %28, %29 : vector<8x1800xf32>
    %c0_14 = arith.constant 0 : index
    %c0_15 = arith.constant 0 : index
    %31 = vector.load %arg11[%c0_14, %c0_15] : memref<8x1800xf32, #tpu.memory_space<vmem>>, vector<8x1800xf32>
    tpu.vector_store %arg11[%c0_14, %c0_15], %30 {strides = array<i32>} : memref<8x1800xf32, #tpu.memory_space<vmem>>, vector<8x1800xf32>,
    %cst_16 = arith.constant 0.000000e+00 : f32
    %32 = vector.broadcast %cst_16 : f32 to vector<8x768xf32>
    %c0_17 = arith.constant 0 : index
    %c0_18 = arith.constant 0 : index
    %33 = vector.load %arg12[%c0_17, %c0_18] : memref<8x768xf32, #tpu.memory_space<vmem>>, vector<8x768xf32>
    tpu.vector_store %arg12[%c0_17, %c0_18], %32 {strides = array<i32>} : memref<8x768xf32, #tpu.memory_space<vmem>>, vector<8x768xf32>,
    %c0_19 = arith.constant 0 : index
    %c0_20 = arith.constant 0 : index
    %34 = vector.load %arg11[%c0_19, %c0_20] : memref<8x1800xf32, #tpu.memory_space<vmem>>, vector<8x840xf32>
    %c0_21 = arith.constant 0 : index
    %c1_22 = arith.constant 1 : index
    %35 = vector.load %arg11[%c0_21, %c1_22] : memref<8x1800xf32, #tpu.memory_space<vmem>>, vector<8x840xf32>
    %c0_23 = arith.constant 0 : index
    %c30 = arith.constant 30 : index
    %36 = vector.load %arg11[%c0_23, %c30] : memref<8x1800xf32, #tpu.memory_space<vmem>>, vector<8x840xf32>
    %c0_24 = arith.constant 0 : index
    %c31 = arith.constant 31 : index
    %37 = vector.load %arg11[%c0_24, %c31] : memref<8x1800xf32, #tpu.memory_space<vmem>>, vector<8x840xf32>
    %38 = arith.maximumf %34, %35 : vector<8x840xf32>
    %39 = arith.maximumf %36, %37 : vector<8x840xf32>
    %40 = arith.maximumf %38, %39 : vector<8x840xf32>
    %c0_25 = arith.constant 0 : index
    %c0_26 = arith.constant 0 : index
    %41 = vector.load %arg4[%c0_25, %c0_26] : memref<840x256xf32, #tpu.memory_space<vmem>>, vector<840x256xf32>
    %cst_27 = arith.constant dense<0.000000e+00> : vector<8x256xf32>
    %42 = tpu.matmul %40, %41, %cst_27 {dimension_numbers = #tpu.dot_dimension_numbers<[1], [0], [0], [1], [0, 0, 1, 1], [], []>} : vector<8x840xf32>, vector<840x256xf32>, vector<8x256xf32> -> vector<8x256xf32>
    %c0_28 = arith.constant 0 : index
    %c128 = arith.constant 128 : index
    %43 = vector.load %arg12[%c0_28, %c128] : memref<8x768xf32, #tpu.memory_space<vmem>>, vector<8x256xf32>
    tpu.vector_store %arg12[%c0_28, %c128], %42 {strides = array<i32>} : memref<8x768xf32, #tpu.memory_space<vmem>>, vector<8x256xf32>,
    %c0_29 = arith.constant 0 : index
    %c900 = arith.constant 900 : index
    %44 = vector.load %arg11[%c0_29, %c900] : memref<8x1800xf32, #tpu.memory_space<vmem>>, vector<8x840xf32>
    %c0_30 = arith.constant 0 : index
    %c901 = arith.constant 901 : index
    %45 = vector.load %arg11[%c0_30, %c901] : memref<8x1800xf32, #tpu.memory_space<vmem>>, vector<8x840xf32>
    %c0_31 = arith.constant 0 : index
    %c930 = arith.constant 930 : index
    %46 = vector.load %arg11[%c0_31, %c930] : memref<8x1800xf32, #tpu.memory_space<vmem>>, vector<8x840xf32>
    %c0_32 = arith.constant 0 : index
    %c931 = arith.constant 931 : index
    %47 = vector.load %arg11[%c0_32, %c931] : memref<8x1800xf32, #tpu.memory_space<vmem>>, vector<8x840xf32>
    %48 = arith.maximumf %44, %45 : vector<8x840xf32>
    %49 = arith.maximumf %46, %47 : vector<8x840xf32>
    %50 = arith.maximumf %48, %49 : vector<8x840xf32>
    %c0_33 = arith.constant 0 : index
    %c0_34 = arith.constant 0 : index
    %51 = vector.load %arg4[%c0_33, %c0_34] : memref<840x256xf32, #tpu.memory_space<vmem>>, vector<840x256xf32>
    %cst_35 = arith.constant dense<0.000000e+00> : vector<8x256xf32>
    %52 = tpu.matmul %50, %51, %cst_35 {dimension_numbers = #tpu.dot_dimension_numbers<[1], [0], [0], [1], [0, 0, 1, 1], [], []>} : vector<8x840xf32>, vector<840x256xf32>, vector<8x256xf32> -> vector<8x256xf32>
    %c0_36 = arith.constant 0 : index
    %c384 = arith.constant 384 : index
    %53 = vector.load %arg12[%c0_36, %c384] : memref<8x768xf32, #tpu.memory_space<vmem>>, vector<8x256xf32>
    tpu.vector_store %arg12[%c0_36, %c384], %52 {strides = array<i32>} : memref<8x768xf32, #tpu.memory_space<vmem>>, vector<8x256xf32>,
    %c0_37 = arith.constant 0 : index
    %c111 = arith.constant 111 : index
    %54 = vector.load %arg12[%c0_37, %c111] : memref<8x768xf32, #tpu.memory_space<vmem>>, vector<8x512xf32>
    %c0_38 = arith.constant 0 : index
    %c0_39 = arith.constant 0 : index
    %55 = vector.load %arg13[%c0_38, %c0_39] : memref<72x512xf32, #tpu.memory_space<vmem>>, vector<8x512xf32>
    tpu.vector_store %arg13[%c0_38, %c0_39], %54 {strides = array<i32>} : memref<72x512xf32, #tpu.memory_space<vmem>>, vector<8x512xf32>,
    %c0_40 = arith.constant 0 : index
    %c112 = arith.constant 112 : index
    %56 = vector.load %arg12[%c0_40, %c112] : memref<8x768xf32, #tpu.memory_space<vmem>>, vector<8x512xf32>
    %c8 = arith.constant 8 : index
    %c0_41 = arith.constant 0 : index
    %57 = vector.load %arg13[%c8, %c0_41] : memref<72x512xf32, #tpu.memory_space<vmem>>, vector<8x512xf32>
    tpu.vector_store %arg13[%c8, %c0_41], %56 {strides = array<i32>} : memref<72x512xf32, #tpu.memory_space<vmem>>, vector<8x512xf32>,
    %c0_42 = arith.constant 0 : index
    %c113 = arith.constant 113 : index
    %58 = vector.load %arg12[%c0_42, %c113] : memref<8x768xf32, #tpu.memory_space<vmem>>, vector<8x512xf32>
    %c16 = arith.constant 16 : index
    %c0_43 = arith.constant 0 : index
    %59 = vector.load %arg13[%c16, %c0_43] : memref<72x512xf32, #tpu.memory_space<vmem>>, vector<8x512xf32>
    tpu.vector_store %arg13[%c16, %c0_43], %58 {strides = array<i32>} : memref<72x512xf32, #tpu.memory_space<vmem>>, vector<8x512xf32>,
    %c0_44 = arith.constant 0 : index
    %c127 = arith.constant 127 : index
    %60 = vector.load %arg12[%c0_44, %c127] : memref<8x768xf32, #tpu.memory_space<vmem>>, vector<8x512xf32>
    %c24 = arith.constant 24 : index
    %c0_45 = arith.constant 0 : index
    %61 = vector.load %arg13[%c24, %c0_45] : memref<72x512xf32, #tpu.memory_space<vmem>>, vector<8x512xf32>
    tpu.vector_store %arg13[%c24, %c0_45], %60 {strides = array<i32>} : memref<72x512xf32, #tpu.memory_space<vmem>>, vector<8x512xf32>,
    %c0_46 = arith.constant 0 : index
    %c128_47 = arith.constant 128 : index
    %62 = vector.load %arg12[%c0_46, %c128_47] : memref<8x768xf32, #tpu.memory_space<vmem>>, vector<8x512xf32>
    %c32 = arith.constant 32 : index
    %c0_48 = arith.constant 0 : index
    %63 = vector.load %arg13[%c32, %c0_48] : memref<72x512xf32, #tpu.memory_space<vmem>>, vector<8x512xf32>
    tpu.vector_store %arg13[%c32, %c0_48], %62 {strides = array<i32>} : memref<72x512xf32, #tpu.memory_space<vmem>>, vector<8x512xf32>,
    %c0_49 = arith.constant 0 : index
    %c129 = arith.constant 129 : index
    %64 = vector.load %arg12[%c0_49, %c129] : memref<8x768xf32, #tpu.memory_space<vmem>>, vector<8x512xf32>
    %c40 = arith.constant 40 : index
    %c0_50 = arith.constant 0 : index
    %65 = vector.load %arg13[%c40, %c0_50] : memref<72x512xf32, #tpu.memory_space<vmem>>, vector<8x512xf32>
    tpu.vector_store %arg13[%c40, %c0_50], %64 {strides = array<i32>} : memref<72x512xf32, #tpu.memory_space<vmem>>, vector<8x512xf32>,
    %c0_51 = arith.constant 0 : index
    %c143 = arith.constant 143 : index
    %66 = vector.load %arg12[%c0_51, %c143] : memref<8x768xf32, #tpu.memory_space<vmem>>, vector<8x512xf32>
    %c48 = arith.constant 48 : index
    %c0_52 = arith.constant 0 : index
    %67 = vector.load %arg13[%c48, %c0_52] : memref<72x512xf32, #tpu.memory_space<vmem>>, vector<8x512xf32>
    tpu.vector_store %arg13[%c48, %c0_52], %66 {strides = array<i32>} : memref<72x512xf32, #tpu.memory_space<vmem>>, vector<8x512xf32>,
    %c0_53 = arith.constant 0 : index
    %c144 = arith.constant 144 : index
    %68 = vector.load %arg12[%c0_53, %c144] : memref<8x768xf32, #tpu.memory_space<vmem>>, vector<8x512xf32>
    %c56 = arith.constant 56 : index
    %c0_54 = arith.constant 0 : index
    %69 = vector.load %arg13[%c56, %c0_54] : memref<72x512xf32, #tpu.memory_space<vmem>>, vector<8x512xf32>
    tpu.vector_store %arg13[%c56, %c0_54], %68 {strides = array<i32>} : memref<72x512xf32, #tpu.memory_space<vmem>>, vector<8x512xf32>,
    %c0_55 = arith.constant 0 : index
    %c145 = arith.constant 145 : index
    %70 = vector.load %arg12[%c0_55, %c145] : memref<8x768xf32, #tpu.memory_space<vmem>>, vector<8x512xf32>
    %c64 = arith.constant 64 : index
    %c0_56 = arith.constant 0 : index
    %71 = vector.load %arg13[%c64, %c0_56] : memref<72x512xf32, #tpu.memory_space<vmem>>, vector<8x512xf32>
    tpu.vector_store %arg13[%c64, %c0_56], %70 {strides = array<i32>} : memref<72x512xf32, #tpu.memory_space<vmem>>, vector<8x512xf32>,
    %c0_57 = arith.constant 0 : index
    %c0_58 = arith.constant 0 : index
    %72 = vector.load %arg5[%c0_57, %c0_58] : memref<16x72xf32, #tpu.memory_space<vmem>>, vector<16x72xf32>
    %c0_59 = arith.constant 0 : index
    %c0_60 = arith.constant 0 : index
    %73 = vector.load %arg13[%c0_59, %c0_60] : memref<72x512xf32, #tpu.memory_space<vmem>>, vector<72x512xf32>
    %cst_61 = arith.constant dense<0.000000e+00> : vector<16x512xf32>
    %74 = tpu.matmul %72, %73, %cst_61 {dimension_numbers = #tpu.dot_dimension_numbers<[1], [0], [0], [1], [0, 0, 1, 1], [], []>} : vector<16x72xf32>, vector<72x512xf32>, vector<16x512xf32> -> vector<16x512xf32>
    %c0_62 = arith.constant 0 : index
    %c0_63 = arith.constant 0 : index
    %75 = vector.load %arg6[%c0_62, %c0_63] : memref<1x512xf32, #tpu.memory_space<vmem>>, vector<1x512xf32>
    %c8_64 = arith.constant 8 : index
    %c0_65 = arith.constant 0 : index
    %76 = vector.load %arg7[%c8_64, %c0_65] : memref<24x2xf32, #tpu.memory_space<vmem>>, vector<16x1xf32>
    %c8_66 = arith.constant 8 : index
    %c1_67 = arith.constant 1 : index
    %77 = vector.load %arg7[%c8_66, %c1_67] : memref<24x2xf32, #tpu.memory_space<vmem>>, vector<16x1xf32>
    %78 = vector.broadcast %75 : vector<1x512xf32> to vector<16x512xf32>
    %79 = arith.mulf %74, %78 : vector<16x512xf32>
    %cst_68 = arith.constant dense<0.000000e+00> : vector<16xf32>
    %80 = vector.multi_reduction <add>, %79, %cst_68 [1] : vector<16x512xf32> to vector<16xf32>
    %81 = vector.shape_cast %80 : vector<16xf32> to vector<16x1xf32>
    %cst_69 = arith.constant 0.00255102036 : f32
    %82 = vector.broadcast %cst_69 : f32 to vector<16x1xf32>
    %83 = arith.mulf %81, %82 : vector<16x1xf32>
    %84 = arith.mulf %79, %79 : vector<16x512xf32>
    %cst_70 = arith.constant dense<0.000000e+00> : vector<16xf32>
    %85 = vector.multi_reduction <add>, %84, %cst_70 [1] : vector<16x512xf32> to vector<16xf32>
    %86 = vector.shape_cast %85 : vector<16xf32> to vector<16x1xf32>
    %cst_71 = arith.constant 0.00255102036 : f32
    %87 = vector.broadcast %cst_71 : f32 to vector<16x1xf32>
    %88 = arith.mulf %86, %87 : vector<16x1xf32>
    %89 = arith.mulf %83, %83 : vector<16x1xf32>
    %90 = arith.subf %88, %89 : vector<16x1xf32>
    %cst_72 = arith.constant 9.99999974E-6 : f32
    %91 = vector.broadcast %cst_72 : f32 to vector<16x1xf32>
    %92 = arith.addf %90, %91 : vector<16x1xf32>
    %93 = math.rsqrt %92 : vector<16x1xf32>
    %94 = arith.mulf %76, %93 : vector<16x1xf32>
    %95 = vector.broadcast %83 : vector<16x1xf32> to vector<16x512xf32>
    %96 = arith.subf %74, %95 : vector<16x512xf32>
    %97 = vector.broadcast %94 : vector<16x1xf32> to vector<16x512xf32>
    %98 = arith.mulf %96, %97 : vector<16x512xf32>
    %99 = vector.broadcast %77 : vector<16x1xf32> to vector<16x512xf32>
    %100 = arith.addf %98, %99 : vector<16x512xf32>
    %cst_73 = arith.constant 0.000000e+00 : f32
    %101 = vector.broadcast %cst_73 : f32 to vector<16x512xf32>
    %102 = arith.maximumf %100, %101 : vector<16x512xf32>
    %c0_74 = arith.constant 0 : index
    %c0_75 = arith.constant 0 : index
    %103 = vector.load %arg14[%c0_74, %c0_75] : memref<16x512xf32, #tpu.memory_space<vmem>>, vector<16x512xf32>
    tpu.vector_store %arg14[%c0_74, %c0_75], %102 {strides = array<i32>} : memref<16x512xf32, #tpu.memory_space<vmem>>, vector<16x512xf32>,
    %104 = tpu.iota {dimensions = array<i32: 0>} : vector<8x128xi32>
    %105 = tpu.iota {dimensions = array<i32: 1>} : vector<8x128xi32>
    %cst_76 = arith.constant 0.000000e+00 : f32
    %106 = vector.broadcast %cst_76 : f32 to vector<8x128xf32>
    %c0_77 = arith.constant 0 : index
    %c0_78 = arith.constant 0 : index
    %107 = vector.load %arg14[%c0_77, %c0_78] : memref<16x512xf32, #tpu.memory_space<vmem>>, vector<16x222xf32>
    %c0_79 = arith.constant 0 : index
    %c1_80 = arith.constant 1 : index
    %108 = vector.load %arg14[%c0_79, %c1_80] : memref<16x512xf32, #tpu.memory_space<vmem>>, vector<16x222xf32>
    %c0_81 = arith.constant 0 : index
    %c16_82 = arith.constant 16 : index
    %109 = vector.load %arg14[%c0_81, %c16_82] : memref<16x512xf32, #tpu.memory_space<vmem>>, vector<16x222xf32>
    %c0_83 = arith.constant 0 : index
    %c17 = arith.constant 17 : index
    %110 = vector.load %arg14[%c0_83, %c17] : memref<16x512xf32, #tpu.memory_space<vmem>>, vector<16x222xf32>
    %111 = arith.maximumf %107, %108 : vector<16x222xf32>
    %112 = arith.maximumf %109, %110 : vector<16x222xf32>
    %113 = arith.maximumf %111, %112 : vector<16x222xf32>
    %c0_84 = arith.constant 0 : index
    %c0_85 = arith.constant 0 : index
    %c0_86 = arith.constant 0 : index
    %114 = vector.load %arg8[%c0_84, %c0_85, %c0_86] : memref<5x16x222xf32, #tpu.memory_space<vmem>>, vector<1x16x222xf32>
    %115 = vector.shape_cast %114 : vector<1x16x222xf32> to vector<16x222xf32>
    %116 = arith.mulf %113, %115 : vector<16x222xf32>
    %cst_87 = arith.constant dense<0.000000e+00> : vector<16xf32>
    %117 = vector.multi_reduction <add>, %116, %cst_87 [1] : vector<16x222xf32> to vector<16xf32>
    %118 = vector.shape_cast %117 : vector<16xf32> to vector<16x1xf32>
    %cst_88 = arith.constant dense<0.000000e+00> : vector<1xf32>
    %119 = vector.multi_reduction <add>, %118, %cst_88 [0] : vector<16x1xf32> to vector<1xf32>
    %120 = vector.shape_cast %119 : vector<1xf32> to vector<1x1xf32>
    %c0_89 = arith.constant 0 : index
    %c0_90 = arith.constant 0 : index
    %121 = vector.load %arg9[%c0_89, %c0_90] : memref<1x128xf32, #tpu.memory_space<vmem>>, vector<1x1xf32>
    %122 = arith.addf %120, %121 : vector<1x1xf32>
    %c0_i32 = arith.constant 0 : i32
    %123 = vector.broadcast %c0_i32 : i32 to vector<8x128xi32>
    %124 = arith.cmpi eq, %104, %123 : vector<8x128xi32>
    %c0_i32_91 = arith.constant 0 : i32
    %125 = vector.broadcast %c0_i32_91 : i32 to vector<8x128xi32>
    %126 = arith.cmpi eq, %105, %125 : vector<8x128xi32>
    %127 = arith.andi %124, %126 : vector<8x128xi1>
    %128 = arith.extui %127 : vector<8x128xi1> to vector<8x128xi32>
    %129 = arith.sitofp %128 : vector<8x128xi32> to vector<8x128xf32>
    %130 = vector.broadcast %122 : vector<1x1xf32> to vector<8x128xf32>
    %131 = arith.mulf %129, %130 : vector<8x128xf32>
    %132 = arith.addf %106, %131 : vector<8x128xf32>
    %c1_92 = arith.constant 1 : index
    %c0_93 = arith.constant 0 : index
    %c0_94 = arith.constant 0 : index
    %133 = vector.load %arg8[%c1_92, %c0_93, %c0_94] : memref<5x16x222xf32, #tpu.memory_space<vmem>>, vector<1x16x222xf32>
    %134 = vector.shape_cast %133 : vector<1x16x222xf32> to vector<16x222xf32>
    %135 = arith.mulf %113, %134 : vector<16x222xf32>
    %cst_95 = arith.constant dense<0.000000e+00> : vector<16xf32>
    %136 = vector.multi_reduction <add>, %135, %cst_95 [1] : vector<16x222xf32> to vector<16xf32>
    %137 = vector.shape_cast %136 : vector<16xf32> to vector<16x1xf32>
    %cst_96 = arith.constant dense<0.000000e+00> : vector<1xf32>
    %138 = vector.multi_reduction <add>, %137, %cst_96 [0] : vector<16x1xf32> to vector<1xf32>
    %139 = vector.shape_cast %138 : vector<1xf32> to vector<1x1xf32>
    %c0_97 = arith.constant 0 : index
    %c1_98 = arith.constant 1 : index
    %140 = vector.load %arg9[%c0_97, %c1_98] : memref<1x128xf32, #tpu.memory_space<vmem>>, vector<1x1xf32>
    %141 = arith.addf %139, %140 : vector<1x1xf32>
    %c0_i32_99 = arith.constant 0 : i32
    %142 = vector.broadcast %c0_i32_99 : i32 to vector<8x128xi32>
    %143 = arith.cmpi eq, %104, %142 : vector<8x128xi32>
    %c1_i32 = arith.constant 1 : i32
    %144 = vector.broadcast %c1_i32 : i32 to vector<8x128xi32>
    %145 = arith.cmpi eq, %105, %144 : vector<8x128xi32>
    %146 = arith.andi %143, %145 : vector<8x128xi1>
    %147 = arith.extui %146 : vector<8x128xi1> to vector<8x128xi32>
    %148 = arith.sitofp %147 : vector<8x128xi32> to vector<8x128xf32>
    %149 = vector.broadcast %141 : vector<1x1xf32> to vector<8x128xf32>
    %150 = arith.mulf %148, %149 : vector<8x128xf32>
    %151 = arith.addf %132, %150 : vector<8x128xf32>
    %c2 = arith.constant 2 : index
    %c0_100 = arith.constant 0 : index
    %c0_101 = arith.constant 0 : index
    %152 = vector.load %arg8[%c2, %c0_100, %c0_101] : memref<5x16x222xf32, #tpu.memory_space<vmem>>, vector<1x16x222xf32>
    %153 = vector.shape_cast %152 : vector<1x16x222xf32> to vector<16x222xf32>
    %154 = arith.mulf %113, %153 : vector<16x222xf32>
    %cst_102 = arith.constant dense<0.000000e+00> : vector<16xf32>
    %155 = vector.multi_reduction <add>, %154, %cst_102 [1] : vector<16x222xf32> to vector<16xf32>
    %156 = vector.shape_cast %155 : vector<16xf32> to vector<16x1xf32>
    %cst_103 = arith.constant dense<0.000000e+00> : vector<1xf32>
    %157 = vector.multi_reduction <add>, %156, %cst_103 [0] : vector<16x1xf32> to vector<1xf32>
    %158 = vector.shape_cast %157 : vector<1xf32> to vector<1x1xf32>
    %c0_104 = arith.constant 0 : index
    %c2_105 = arith.constant 2 : index
    %159 = vector.load %arg9[%c0_104, %c2_105] : memref<1x128xf32, #tpu.memory_space<vmem>>, vector<1x1xf32>
    %160 = arith.addf %158, %159 : vector<1x1xf32>
    %c0_i32_106 = arith.constant 0 : i32
    %161 = vector.broadcast %c0_i32_106 : i32 to vector<8x128xi32>
    %162 = arith.cmpi eq, %104, %161 : vector<8x128xi32>
    %c2_i32 = arith.constant 2 : i32
    %163 = vector.broadcast %c2_i32 : i32 to vector<8x128xi32>
    %164 = arith.cmpi eq, %105, %163 : vector<8x128xi32>
    %165 = arith.andi %162, %164 : vector<8x128xi1>
    %166 = arith.extui %165 : vector<8x128xi1> to vector<8x128xi32>
    %167 = arith.sitofp %166 : vector<8x128xi32> to vector<8x128xf32>
    %168 = vector.broadcast %160 : vector<1x1xf32> to vector<8x128xf32>
    %169 = arith.mulf %167, %168 : vector<8x128xf32>
    %170 = arith.addf %151, %169 : vector<8x128xf32>
    %c3 = arith.constant 3 : index
    %c0_107 = arith.constant 0 : index
    %c0_108 = arith.constant 0 : index
    %171 = vector.load %arg8[%c3, %c0_107, %c0_108] : memref<5x16x222xf32, #tpu.memory_space<vmem>>, vector<1x16x222xf32>
    %172 = vector.shape_cast %171 : vector<1x16x222xf32> to vector<16x222xf32>
    %173 = arith.mulf %113, %172 : vector<16x222xf32>
    %cst_109 = arith.constant dense<0.000000e+00> : vector<16xf32>
    %174 = vector.multi_reduction <add>, %173, %cst_109 [1] : vector<16x222xf32> to vector<16xf32>
    %175 = vector.shape_cast %174 : vector<16xf32> to vector<16x1xf32>
    %cst_110 = arith.constant dense<0.000000e+00> : vector<1xf32>
    %176 = vector.multi_reduction <add>, %175, %cst_110 [0] : vector<16x1xf32> to vector<1xf32>
    %177 = vector.shape_cast %176 : vector<1xf32> to vector<1x1xf32>
    %c0_111 = arith.constant 0 : index
    %c3_112 = arith.constant 3 : index
    %178 = vector.load %arg9[%c0_111, %c3_112] : memref<1x128xf32, #tpu.memory_space<vmem>>, vector<1x1xf32>
    %179 = arith.addf %177, %178 : vector<1x1xf32>
    %c0_i32_113 = arith.constant 0 : i32
    %180 = vector.broadcast %c0_i32_113 : i32 to vector<8x128xi32>
    %181 = arith.cmpi eq, %104, %180 : vector<8x128xi32>
    %c3_i32 = arith.constant 3 : i32
    %182 = vector.broadcast %c3_i32 : i32 to vector<8x128xi32>
    %183 = arith.cmpi eq, %105, %182 : vector<8x128xi32>
    %184 = arith.andi %181, %183 : vector<8x128xi1>
    %185 = arith.extui %184 : vector<8x128xi1> to vector<8x128xi32>
    %186 = arith.sitofp %185 : vector<8x128xi32> to vector<8x128xf32>
    %187 = vector.broadcast %179 : vector<1x1xf32> to vector<8x128xf32>
    %188 = arith.mulf %186, %187 : vector<8x128xf32>
    %189 = arith.addf %170, %188 : vector<8x128xf32>
    %c4 = arith.constant 4 : index
    %c0_114 = arith.constant 0 : index
    %c0_115 = arith.constant 0 : index
    %190 = vector.load %arg8[%c4, %c0_114, %c0_115] : memref<5x16x222xf32, #tpu.memory_space<vmem>>, vector<1x16x222xf32>
    %191 = vector.shape_cast %190 : vector<1x16x222xf32> to vector<16x222xf32>
    %192 = arith.mulf %113, %191 : vector<16x222xf32>
    %cst_116 = arith.constant dense<0.000000e+00> : vector<16xf32>
    %193 = vector.multi_reduction <add>, %192, %cst_116 [1] : vector<16x222xf32> to vector<16xf32>
    %194 = vector.shape_cast %193 : vector<16xf32> to vector<16x1xf32>
    %cst_117 = arith.constant dense<0.000000e+00> : vector<1xf32>
    %195 = vector.multi_reduction <add>, %194, %cst_117 [0] : vector<16x1xf32> to vector<1xf32>
    %196 = vector.shape_cast %195 : vector<1xf32> to vector<1x1xf32>
    %c0_118 = arith.constant 0 : index
    %c4_119 = arith.constant 4 : index
    %197 = vector.load %arg9[%c0_118, %c4_119] : memref<1x128xf32, #tpu.memory_space<vmem>>, vector<1x1xf32>
    %198 = arith.addf %196, %197 : vector<1x1xf32>
    %c0_i32_120 = arith.constant 0 : i32
    %199 = vector.broadcast %c0_i32_120 : i32 to vector<8x128xi32>
    %200 = arith.cmpi eq, %104, %199 : vector<8x128xi32>
    %c4_i32 = arith.constant 4 : i32
    %201 = vector.broadcast %c4_i32 : i32 to vector<8x128xi32>
    %202 = arith.cmpi eq, %105, %201 : vector<8x128xi32>
    %203 = arith.andi %200, %202 : vector<8x128xi1>
    %204 = arith.extui %203 : vector<8x128xi1> to vector<8x128xi32>
    %205 = arith.sitofp %204 : vector<8x128xi32> to vector<8x128xf32>
    %206 = vector.broadcast %198 : vector<1x1xf32> to vector<8x128xf32>
    %207 = arith.mulf %205, %206 : vector<8x128xf32>
    %208 = arith.addf %189, %207 : vector<8x128xf32>
    %c0_121 = arith.constant 0 : index
    %c256 = arith.constant 256 : index
    %209 = vector.load %arg14[%c0_121, %c256] : memref<16x512xf32, #tpu.memory_space<vmem>>, vector<16x222xf32>
    %c0_122 = arith.constant 0 : index
    %c257 = arith.constant 257 : index
    %210 = vector.load %arg14[%c0_122, %c257] : memref<16x512xf32, #tpu.memory_space<vmem>>, vector<16x222xf32>
    %c0_123 = arith.constant 0 : index
    %c272 = arith.constant 272 : index
    %211 = vector.load %arg14[%c0_123, %c272] : memref<16x512xf32, #tpu.memory_space<vmem>>, vector<16x222xf32>
    %c0_124 = arith.constant 0 : index
    %c273 = arith.constant 273 : index
    %212 = vector.load %arg14[%c0_124, %c273] : memref<16x512xf32, #tpu.memory_space<vmem>>, vector<16x222xf32>
    %213 = arith.maximumf %209, %210 : vector<16x222xf32>
    %214 = arith.maximumf %211, %212 : vector<16x222xf32>
    %215 = arith.maximumf %213, %214 : vector<16x222xf32>
    %c0_125 = arith.constant 0 : index
    %c0_126 = arith.constant 0 : index
    %c0_127 = arith.constant 0 : index
    %216 = vector.load %arg8[%c0_125, %c0_126, %c0_127] : memref<5x16x222xf32, #tpu.memory_space<vmem>>, vector<1x16x222xf32>
    %217 = vector.shape_cast %216 : vector<1x16x222xf32> to vector<16x222xf32>
    %218 = arith.mulf %215, %217 : vector<16x222xf32>
    %cst_128 = arith.constant dense<0.000000e+00> : vector<16xf32>
    %219 = vector.multi_reduction <add>, %218, %cst_128 [1] : vector<16x222xf32> to vector<16xf32>
    %220 = vector.shape_cast %219 : vector<16xf32> to vector<16x1xf32>
    %cst_129 = arith.constant dense<0.000000e+00> : vector<1xf32>
    %221 = vector.multi_reduction <add>, %220, %cst_129 [0] : vector<16x1xf32> to vector<1xf32>
    %222 = vector.shape_cast %221 : vector<1xf32> to vector<1x1xf32>
    %c0_130 = arith.constant 0 : index
    %c0_131 = arith.constant 0 : index
    %223 = vector.load %arg9[%c0_130, %c0_131] : memref<1x128xf32, #tpu.memory_space<vmem>>, vector<1x1xf32>
    %224 = arith.addf %222, %223 : vector<1x1xf32>
    %c1_i32_132 = arith.constant 1 : i32
    %225 = vector.broadcast %c1_i32_132 : i32 to vector<8x128xi32>
    %226 = arith.cmpi eq, %104, %225 : vector<8x128xi32>
    %c0_i32_133 = arith.constant 0 : i32
    %227 = vector.broadcast %c0_i32_133 : i32 to vector<8x128xi32>
    %228 = arith.cmpi eq, %105, %227 : vector<8x128xi32>
    %229 = arith.andi %226, %228 : vector<8x128xi1>
    %230 = arith.extui %229 : vector<8x128xi1> to vector<8x128xi32>
    %231 = arith.sitofp %230 : vector<8x128xi32> to vector<8x128xf32>
    %232 = vector.broadcast %224 : vector<1x1xf32> to vector<8x128xf32>
    %233 = arith.mulf %231, %232 : vector<8x128xf32>
    %234 = arith.addf %208, %233 : vector<8x128xf32>
    %c1_134 = arith.constant 1 : index
    %c0_135 = arith.constant 0 : index
    %c0_136 = arith.constant 0 : index
    %235 = vector.load %arg8[%c1_134, %c0_135, %c0_136] : memref<5x16x222xf32, #tpu.memory_space<vmem>>, vector<1x16x222xf32>
    %236 = vector.shape_cast %235 : vector<1x16x222xf32> to vector<16x222xf32>
    %237 = arith.mulf %215, %236 : vector<16x222xf32>
    %cst_137 = arith.constant dense<0.000000e+00> : vector<16xf32>
    %238 = vector.multi_reduction <add>, %237, %cst_137 [1] : vector<16x222xf32> to vector<16xf32>
    %239 = vector.shape_cast %238 : vector<16xf32> to vector<16x1xf32>
    %cst_138 = arith.constant dense<0.000000e+00> : vector<1xf32>
    %240 = vector.multi_reduction <add>, %239, %cst_138 [0] : vector<16x1xf32> to vector<1xf32>
    %241 = vector.shape_cast %240 : vector<1xf32> to vector<1x1xf32>
    %c0_139 = arith.constant 0 : index
    %c1_140 = arith.constant 1 : index
    %242 = vector.load %arg9[%c0_139, %c1_140] : memref<1x128xf32, #tpu.memory_space<vmem>>, vector<1x1xf32>
    %243 = arith.addf %241, %242 : vector<1x1xf32>
    %c1_i32_141 = arith.constant 1 : i32
    %244 = vector.broadcast %c1_i32_141 : i32 to vector<8x128xi32>
    %245 = arith.cmpi eq, %104, %244 : vector<8x128xi32>
    %c1_i32_142 = arith.constant 1 : i32
    %246 = vector.broadcast %c1_i32_142 : i32 to vector<8x128xi32>
    %247 = arith.cmpi eq, %105, %246 : vector<8x128xi32>
    %248 = arith.andi %245, %247 : vector<8x128xi1>
    %249 = arith.extui %248 : vector<8x128xi1> to vector<8x128xi32>
    %250 = arith.sitofp %249 : vector<8x128xi32> to vector<8x128xf32>
    %251 = vector.broadcast %243 : vector<1x1xf32> to vector<8x128xf32>
    %252 = arith.mulf %250, %251 : vector<8x128xf32>
    %253 = arith.addf %234, %252 : vector<8x128xf32>
    %c2_143 = arith.constant 2 : index
    %c0_144 = arith.constant 0 : index
    %c0_145 = arith.constant 0 : index
    %254 = vector.load %arg8[%c2_143, %c0_144, %c0_145] : memref<5x16x222xf32, #tpu.memory_space<vmem>>, vector<1x16x222xf32>
    %255 = vector.shape_cast %254 : vector<1x16x222xf32> to vector<16x222xf32>
    %256 = arith.mulf %215, %255 : vector<16x222xf32>
    %cst_146 = arith.constant dense<0.000000e+00> : vector<16xf32>
    %257 = vector.multi_reduction <add>, %256, %cst_146 [1] : vector<16x222xf32> to vector<16xf32>
    %258 = vector.shape_cast %257 : vector<16xf32> to vector<16x1xf32>
    %cst_147 = arith.constant dense<0.000000e+00> : vector<1xf32>
    %259 = vector.multi_reduction <add>, %258, %cst_147 [0] : vector<16x1xf32> to vector<1xf32>
    %260 = vector.shape_cast %259 : vector<1xf32> to vector<1x1xf32>
    %c0_148 = arith.constant 0 : index
    %c2_149 = arith.constant 2 : index
    %261 = vector.load %arg9[%c0_148, %c2_149] : memref<1x128xf32, #tpu.memory_space<vmem>>, vector<1x1xf32>
    %262 = arith.addf %260, %261 : vector<1x1xf32>
    %c1_i32_150 = arith.constant 1 : i32
    %263 = vector.broadcast %c1_i32_150 : i32 to vector<8x128xi32>
    %264 = arith.cmpi eq, %104, %263 : vector<8x128xi32>
    %c2_i32_151 = arith.constant 2 : i32
    %265 = vector.broadcast %c2_i32_151 : i32 to vector<8x128xi32>
    %266 = arith.cmpi eq, %105, %265 : vector<8x128xi32>
    %267 = arith.andi %264, %266 : vector<8x128xi1>
    %268 = arith.extui %267 : vector<8x128xi1> to vector<8x128xi32>
    %269 = arith.sitofp %268 : vector<8x128xi32> to vector<8x128xf32>
    %270 = vector.broadcast %262 : vector<1x1xf32> to vector<8x128xf32>
    %271 = arith.mulf %269, %270 : vector<8x128xf32>
    %272 = arith.addf %253, %271 : vector<8x128xf32>
    %c3_152 = arith.constant 3 : index
    %c0_153 = arith.constant 0 : index
    %c0_154 = arith.constant 0 : index
    %273 = vector.load %arg8[%c3_152, %c0_153, %c0_154] : memref<5x16x222xf32, #tpu.memory_space<vmem>>, vector<1x16x222xf32>
    %274 = vector.shape_cast %273 : vector<1x16x222xf32> to vector<16x222xf32>
    %275 = arith.mulf %215, %274 : vector<16x222xf32>
    %cst_155 = arith.constant dense<0.000000e+00> : vector<16xf32>
    %276 = vector.multi_reduction <add>, %275, %cst_155 [1] : vector<16x222xf32> to vector<16xf32>
    %277 = vector.shape_cast %276 : vector<16xf32> to vector<16x1xf32>
    %cst_156 = arith.constant dense<0.000000e+00> : vector<1xf32>
    %278 = vector.multi_reduction <add>, %277, %cst_156 [0] : vector<16x1xf32> to vector<1xf32>
    %279 = vector.shape_cast %278 : vector<1xf32> to vector<1x1xf32>
    %c0_157 = arith.constant 0 : index
    %c3_158 = arith.constant 3 : index
    %280 = vector.load %arg9[%c0_157, %c3_158] : memref<1x128xf32, #tpu.memory_space<vmem>>, vector<1x1xf32>
    %281 = arith.addf %279, %280 : vector<1x1xf32>
    %c1_i32_159 = arith.constant 1 : i32
    %282 = vector.broadcast %c1_i32_159 : i32 to vector<8x128xi32>
    %283 = arith.cmpi eq, %104, %282 : vector<8x128xi32>
    %c3_i32_160 = arith.constant 3 : i32
    %284 = vector.broadcast %c3_i32_160 : i32 to vector<8x128xi32>
    %285 = arith.cmpi eq, %105, %284 : vector<8x128xi32>
    %286 = arith.andi %283, %285 : vector<8x128xi1>
    %287 = arith.extui %286 : vector<8x128xi1> to vector<8x128xi32>
    %288 = arith.sitofp %287 : vector<8x128xi32> to vector<8x128xf32>
    %289 = vector.broadcast %281 : vector<1x1xf32> to vector<8x128xf32>
    %290 = arith.mulf %288, %289 : vector<8x128xf32>
    %291 = arith.addf %272, %290 : vector<8x128xf32>
    %c4_161 = arith.constant 4 : index
    %c0_162 = arith.constant 0 : index
    %c0_163 = arith.constant 0 : index
    %292 = vector.load %arg8[%c4_161, %c0_162, %c0_163] : memref<5x16x222xf32, #tpu.memory_space<vmem>>, vector<1x16x222xf32>
    %293 = vector.shape_cast %292 : vector<1x16x222xf32> to vector<16x222xf32>
    %294 = arith.mulf %215, %293 : vector<16x222xf32>
    %cst_164 = arith.constant dense<0.000000e+00> : vector<16xf32>
    %295 = vector.multi_reduction <add>, %294, %cst_164 [1] : vector<16x222xf32> to vector<16xf32>
    %296 = vector.shape_cast %295 : vector<16xf32> to vector<16x1xf32>
    %cst_165 = arith.constant dense<0.000000e+00> : vector<1xf32>
    %297 = vector.multi_reduction <add>, %296, %cst_165 [0] : vector<16x1xf32> to vector<1xf32>
    %298 = vector.shape_cast %297 : vector<1xf32> to vector<1x1xf32>
    %c0_166 = arith.constant 0 : index
    %c4_167 = arith.constant 4 : index
    %299 = vector.load %arg9[%c0_166, %c4_167] : memref<1x128xf32, #tpu.memory_space<vmem>>, vector<1x1xf32>
    %300 = arith.addf %298, %299 : vector<1x1xf32>
    %c1_i32_168 = arith.constant 1 : i32
    %301 = vector.broadcast %c1_i32_168 : i32 to vector<8x128xi32>
    %302 = arith.cmpi eq, %104, %301 : vector<8x128xi32>
    %c4_i32_169 = arith.constant 4 : i32
    %303 = vector.broadcast %c4_i32_169 : i32 to vector<8x128xi32>
    %304 = arith.cmpi eq, %105, %303 : vector<8x128xi32>
    %305 = arith.andi %302, %304 : vector<8x128xi1>
    %306 = arith.extui %305 : vector<8x128xi1> to vector<8x128xi32>
    %307 = arith.sitofp %306 : vector<8x128xi32> to vector<8x128xf32>
    %308 = vector.broadcast %300 : vector<1x1xf32> to vector<8x128xf32>
    %309 = arith.mulf %307, %308 : vector<8x128xf32>
    %310 = arith.addf %291, %309 : vector<8x128xf32>
    %c0_170 = arith.constant 0 : index
    %c0_171 = arith.constant 0 : index
    %311 = vector.load %arg10[%c0_170, %c0_171] : memref<8x128xf32, #tpu.memory_space<vmem>>, vector<8x128xf32>
    tpu.vector_store %arg10[%c0_170, %c0_171], %310 {strides = array<i32>} : memref<8x128xf32, #tpu.memory_space<vmem>>, vector<8x128xf32>,
    return
  }
  func.func @transform_0(%arg0: i32) -> (i32, i32) {
    %c0_i32 = arith.constant 0 : i32
    %c0_i32_0 = arith.constant 0 : i32
    %c0_i32_1 = arith.constant 0 : i32
    return %c0_i32, %c0_i32_0 : i32, i32
  }
  func.func @transform_1(%arg0: i32) -> (i32, i32) {
    %c0_i32 = arith.constant 0 : i32
    %c0_i32_0 = arith.constant 0 : i32
    %c0_i32_1 = arith.constant 0 : i32
    return %c0_i32, %c0_i32_0 : i32, i32
  }
  func.func @transform_2(%arg0: i32) -> (i32, i32) {
    %c0_i32 = arith.constant 0 : i32
    %c0_i32_0 = arith.constant 0 : i32
    %c0_i32_1 = arith.constant 0 : i32
    return %c0_i32, %c0_i32_0 : i32, i32
  }
  func.func @transform_3(%arg0: i32) -> (i32, i32) {
    %c0_i32 = arith.constant 0 : i32
    %c0_i32_0 = arith.constant 0 : i32
    %c0_i32_1 = arith.constant 0 : i32
    return %c0_i32, %c0_i32_0 : i32, i32
  }
  func.func @transform_4(%arg0: i32) -> (i32, i32) {
    %c0_i32 = arith.constant 0 : i32
    %c0_i32_0 = arith.constant 0 : i32
    %c0_i32_1 = arith.constant 0 : i32
    return %c0_i32, %c0_i32_0 : i32, i32
  }
  func.func @transform_5(%arg0: i32) -> (i32, i32) {
    %c0_i32 = arith.constant 0 : i32
    %c0_i32_0 = arith.constant 0 : i32
    %c0_i32_1 = arith.constant 0 : i32
    return %c0_i32, %c0_i32_0 : i32, i32
  }
  func.func @transform_6(%arg0: i32) -> (i32, i32) {
    %c0_i32 = arith.constant 0 : i32
    %c0_i32_0 = arith.constant 0 : i32
    %c0_i32_1 = arith.constant 0 : i32
    return %c0_i32, %c0_i32_0 : i32, i32
  }
  func.func @transform_7(%arg0: i32) -> (i32, i32, i32) {
    %c0_i32 = arith.constant 0 : i32
    %c0_i32_0 = arith.constant 0 : i32
    %c0_i32_1 = arith.constant 0 : i32
    %c0_i32_2 = arith.constant 0 : i32
    return %c0_i32, %c0_i32_0, %c0_i32_1 : i32, i32, i32
  }
  func.func @transform_8(%arg0: i32) -> (i32, i32) {
    %c0_i32 = arith.constant 0 : i32
    %c0_i32_0 = arith.constant 0 : i32
    %c0_i32_1 = arith.constant 0 : i32
    return %c0_i32, %c0_i32_0 : i32, i32
  }
  func.func @transform_9(%arg0: i32) -> (i32, i32) {
    %c0_i32 = arith.constant 0 : i32
    %c0_i32_0 = arith.constant 0 : i32
    %c0_i32_1 = arith.constant 0 : i32
    return %c0_i32, %c0_i32_0 : i32, i32
  }
}

</mosaic_0001>

<bundles_post_ra>
// kernel: tpu_custom_call.1
= control target key start
LH: loop header
LB: loop body
LE: loop exit
PB: predicated region body
PF: predicated region fallthrough
CT: control target
= control target key end

     0   :  { %14 = vsyncpa [#allocation7], 0  ;;  %s5348_s0 = inlined_call_operand.hbm [shape: f32[9,1800], index: 0, kind: input, shape index: {}]   ;;  %s5349_s1 = inlined_call_operand.hbm [shape: f32[8,9], index: 1, kind: input, shape index: {}]   ;;  %s5350_s2 = inlined_call_operand.vmem [shape: f32[1,1800], index: 2, kind: input, shape index: {}]   ;;  %s5351_s3 = inlined_call_operand.hbm [shape: f32[840,256], index: 3, kind: input, shape index: {}]   ;;  %s5352_s4 = inlined_call_operand.vmem [shape: f32[16,72], index: 4, kind: input, shape index: {}]   ;;  %s5353_s5 = inlined_call_operand.vmem [shape: f32[1,512], index: 5, kind: input, shape index: {}]   ;;  %s5354_s6 = inlined_call_operand.vmem [shape: f32[24,2], index: 6, kind: input, shape index: {}]   ;;  %s5355_s7 = inlined_call_operand.hbm [shape: f32[5,16,222], index: 7, kind: input, shape index: {}]   ;;  %s5356_s8 = inlined_call_operand.vmem [shape: f32[1,128], index: 8, kind: input, shape index: {}]   ;;  %s5357_s9 = inlined_call_operand.hbm [shape: f32[8,128], index: 9, kind: output, shape index: {}]  }
   0x1   :  { %15 = vsyncpa [#allocation10], 0 }
   0x2   :  { %16 = vsyncpa [#allocation13], 0 }
   0x3   :  { %17 = vsyncpa [#allocation8], 0  ;;  %s4133_s30 = smov [#allocation9]   ;;  %s4134_s11 = smov [#allocation6]  }
   0x4   :  { %s36_s10 = sshll.u32 %s4133_s30, 4  ;;  %s23_s12 = sshll.u32 %s4134_s11, 4  ;;  %s37_s10 = int_to_ptr.vmem [resolvable:$true] %s36_s10  ;;  %s4210_s12 = int_to_ptr.vmem [resolvable:$true] %s23_s12 }
   0x5   :  { %s4015_s15 = scalar_lea.hbm %s5349_s1, 128 }
   0x6   :  { %p4016_p0 = scmp.ne.s32.totalorder %s5349_s1, %s4015_s15  ;;  %p4019_p1 = scmp.lt.u32.totalorder %s4015_s15, %s5349_s1 }
   0x8   :  { %p4021_p2 = pnand %p4019_p1, %p4016_p0 }
   0xa   :  { %4024 = shalt.err (!%p4021_p2)
}
   0xb   :  { %s4025_s20 = scalar_lea.vmem %s37_s10, 128  ;;  %p4030_p4 = scmp.lt.s32.totalorder %s37_s10, %s37_s10 }
   0xc   :  { %p4026_p3 = scmp.ne.s32.totalorder %s37_s10, %s4025_s20  ;;  %p4031_p5 = scmp.lt.s32.totalorder %s4025_s20, %s4025_s20 }
   0xe   :  { %p4032_p6 = por %p4031_p5, %p4030_p4 }
  0x10   :  { %p4033_p7 = pnand %p4032_p6, %p4026_p3 }
  0x12   :  { %4036 = shalt.err (!%p4033_p7)
}
  0x13   :  { %39 = dma.hbm_to_vmem [thread:$0]  %s5349_s1, 128, %s37_s10, [#allocation10]  }
  0x14   :  { %s4037_s25 = scalar_lea.hbm %s5348_s0, 3840 }
  0x15   :  { %p4038_p8 = scmp.ne.s32.totalorder %s5348_s0, %s4037_s25  ;;  %p4041_p9 = scmp.lt.u32.totalorder %s4037_s25, %s5348_s0 }
  0x17   :  { %p4043_p10 = pnand %p4041_p9, %p4038_p8 }
  0x19   :  { %4046 = shalt.err (!%p4043_p10)
}
  0x1a   :  { %s4047_s30 = scalar_lea.vmem %s4210_s12, 3840  ;;  %p4052_p12 = scmp.lt.s32.totalorder %s4210_s12, %s4210_s12 }
  0x1b   :  { %p4048_p11 = scmp.ne.s32.totalorder %s4210_s12, %s4047_s30  ;;  %p4053_p13 = scmp.lt.s32.totalorder %s4047_s30, %s4047_s30 }
  0x1d   :  { %p4054_p0 = por %p4053_p13, %p4052_p12 }
  0x1f   :  { %p4055_p1 = pnand %p4054_p0, %p4048_p11 }
  0x21   :  { %4058 = shalt.err (!%p4055_p1)
}
  0x22   :  { %s4135_s1 = smov 1920   ;;  %s4136_s10 = smov 120  }
  0x23   :  { %29 = dma.hbm_to_vmem [thread:$0]  %s5348_s0, 3840, %s4210_s12, [#allocation7], %s4135_s1, %s4135_s1, %s4136_s10  }
  0x24   :  { %s4137_s14 = smov [#allocation11]   ;;  %s4059_s18 = scalar_lea.hbm %s5351_s3, 26880 }
  0x25   :  { %s47_s15 = sshll.u32 %s4137_s14, 4  ;;  %p4060_p2 = scmp.ne.s32.totalorder %s5351_s3, %s4059_s18  ;;  %s48_s15 = int_to_ptr.vmem [resolvable:$true] %s47_s15 }
  0x26   :  { %p4063_p3 = scmp.lt.u32.totalorder %s4059_s18, %s5351_s3 }
  0x28   :  { %p4065_p4 = pnand %p4063_p3, %p4060_p2 }
  0x2a   :  { %4068 = shalt.err (!%p4065_p4)
}
  0x2b   :  { %s4069_s23 = scalar_lea.vmem %s48_s15, 26880  ;;  %p4074_p6 = scmp.lt.s32.totalorder %s48_s15, %s48_s15 }
  0x2c   :  { %p4070_p5 = scmp.ne.s32.totalorder %s48_s15, %s4069_s23  ;;  %p4075_p7 = scmp.lt.s32.totalorder %s4069_s23, %s4069_s23 }
  0x2e   :  { %p4076_p8 = por %p4075_p7, %p4074_p6 }
  0x30   :  { %p4077_p9 = pnand %p4076_p8, %p4070_p5 }
  0x32   :  { %4080 = shalt.err (!%p4077_p9)
}
  0x33   :  { %s4138_s0 = smov 256   ;;  %s4139_s12 = smov 16  }
  0x34   :  { %53 = dma.hbm_to_vmem [thread:$0]  %s5351_s3, 26880, %s48_s15, [#allocation10], %s4138_s0, %s4138_s0, %s4139_s12  }
  0x35   :  { %s4140_s26 = smov [#allocation12]   ;;  %s4081_s30 = scalar_lea.hbm %s5355_s7, 2560 }
  0x36   :  { %s65_s27 = sshll.u32 %s4140_s26, 4  ;;  %p4082_p10 = scmp.ne.s32.totalorder %s5355_s7, %s4081_s30  ;;  %s66_s27 = int_to_ptr.vmem [resolvable:$true] %s65_s27 }
  0x37   :  { %p4085_p11 = scmp.lt.u32.totalorder %s4081_s30, %s5355_s7 }
  0x39   :  { %p4087_p12 = pnand %p4085_p11, %p4082_p10 }
  0x3b   :  { %4090 = shalt.err (!%p4087_p12)
}
  0x3c   :  { %s4091_s14 = scalar_lea.vmem %s66_s27, 2560  ;;  %p4096_p0 = scmp.lt.s32.totalorder %s66_s27, %s66_s27 }
  0x3d   :  { %p4092_p13 = scmp.ne.s32.totalorder %s66_s27, %s4091_s14  ;;  %p4097_p1 = scmp.lt.s32.totalorder %s4091_s14, %s4091_s14 }
  0x3f   :  { %p4098_p2 = por %p4097_p1, %p4096_p0 }
  0x41   :  { %p4099_p3 = pnand %p4098_p2, %p4092_p13 }
  0x43   :  { %4102 = shalt.err (!%p4099_p3)
}
  0x44   :  { %71 = dma.hbm_to_vmem [thread:$0]  %s5355_s7, 2560, %s66_s27, [#allocation13], %s4138_s0, %s4138_s0, %s4139_s12  }
  0x45   :  { %4125 = dma.done.wait [#allocation7], 3840  }
  0x46   :  { %4126 = vsyncadd [#allocation7], 4294963456 }
  0x47   :  { %4127 = dma.done.wait [#allocation10], 27008  }
  0x48   :  { %4128 = vsyncadd [#allocation10], 4294940288 }
  0x49   :  { %4129 = dma.done.wait [#allocation13], 2560  }
  0x4a   :  { %4130 = vsyncadd [#allocation13], 4294964736  ;;  %v5362_v0 = vmov 0.0   ;;  %vm121_vm0 = vcmask 1040384   ;;  %vm4142_vm1 = vmmov 1   ;;  %v88_v2 = vld [vmem:[#allocation6 + $0x8] sm:$0xff]  ;;  %v5358_v49 = vlaneseq }
  0x4b   :  { %231 = vmatprep.mubr.f32.mxu0 %v5362_v0  ;;  %302 = vmatprep.mubr.f32.mxu1 %v5362_v0  ;;  %vm4269_vm2 = vmpackc.low %vm121_vm0, %vm4142_vm1  ;;  %v103_v3 = vld [vmem:[#allocation6 + $0x80] sm:$0x1]  ;;  %v102_v6 = vld [vmem:[#allocation6 + $0x78] sm:$0x1]  ;;  %vm117_vm3 = vcmask 72704   ;;  %v4143_v48 = vmov 0.0|0.0  }
  0x4c   :  { %v87_v4 = vld [vmem:[#allocation6] sm:$0xff]  ;;  %v3332_v5 = vpack.c.bf16 %v103_v3, %v88_v2  ;;  %v90_v7 = vld [vmem:[#allocation6 + $0x18] sm:$0xff]  ;;  %v105_v8 = vld [vmem:[#allocation6 + $0x90] sm:$0x1]  ;;  %vm4144_vm4 = vmmov 0   ;;  %v4328_v50 = vshrl.u32 %v5358_v49, 7 }
  0x4d   :  { %v3335_v9 = vpack.c.bf16 %v102_v6, %v87_v4  ;;  %v3338_v10 = vpack.c.bf16 %v105_v8, %v90_v7  ;;  %v89_v11 = vld [vmem:[#allocation6 + $0x10] sm:$0xff]  ;;  %v104_v12 = vld [vmem:[#allocation6 + $0x88] sm:$0x1]  ;;  %v107_v16 = vld [vmem:[#allocation6 + $0xa0] sm:$0x1]  ;;  %vm842_vm5 = vcmask 64512  }
  0x4e   :  { %v4273_v13 = vld [vmem:[#allocation9] sm:$0xff]  ;;  %3334 = vmatprep.subr.msk.bf16.mxu0 %vm4269_vm2, %v3332_v5  ;;  %v3341_v14 = vpack.c.bf16 %v104_v12, %v89_v11  ;;  %v92_v15 = vld [vmem:[#allocation6 + $0x28] sm:$0xff]  ;;  %v91_v17 = vld [vmem:[#allocation6 + $0x20] sm:$0xff]  ;;  %v4331_v51 = vsub.s32 0, %v4328_v50  ;;  %v4337_v53 = vsub.s32 1, %v4328_v50  ;;  %v4340_v54 = vsub.s32 2, %v4328_v50 }
  0x4f   :  { %3337 = vmatpush1.bf16.msk.msra.mxu0 %vm4269_vm2, %v3335_v9  ;;  %3340 = vmatprep.subr.msk.bf16.mxu1 %vm4269_vm2, %v3338_v10  ;;  %v3344_v18 = vpack.c.bf16 %v107_v16, %v92_v15  ;;  %v106_v19 = vld [vmem:[#allocation6 + $0x98] sm:$0x1]  ;;  %v109_v21 = vld [vmem:[#allocation6 + $0xb0] sm:$0x1]  ;;  %v108_v25 = vld [vmem:[#allocation6 + $0xa8] sm:$0x1] }
  0x50   :  { %v94_v20 = vld [vmem:[#allocation6 + $0x38] sm:$0xff]  ;;  %3343 = vmatpush1.bf16.msk.msra.mxu1 %vm4269_vm2, %v3341_v14  ;;  %v3347_v22 = vpack.c.bf16 %v106_v19, %v91_v17  ;;  %v93_v24 = vld [vmem:[#allocation6 + $0x30] sm:$0xff]  ;;  %v96_v26 = vld [vmem:[#allocation6 + $0x48] sm:$0xff]  ;;  %v4343_v55 = vsub.s32 3, %v4328_v50  ;;  %v757_v57 = vsub.s32 4, %v4328_v50  ;;  %v761_v61 = vsub.s32 5, %v4328_v50 }
  0x51   :  { %v3350_v23 = vpack.c.bf16 %v109_v21, %v94_v20  ;;  %3346 = vmatprep.subr.msk.bf16.mxu0 %vm4269_vm2, %v3344_v18  ;;  %v3353_v27 = vpack.c.bf16 %v108_v25, %v93_v24  ;;  %v111_v28 = vld [vmem:[#allocation6 + $0xc0] sm:$0x1]  ;;  %v110_v30 = vld [vmem:[#allocation6 + $0xb8] sm:$0x1]  ;;  %v113_v33 = vld [vmem:[#allocation6 + $0xd0] sm:$0x1] }
  0x52   :  { %v95_v29 = vld [vmem:[#allocation6 + $0x40] sm:$0xff]  ;;  %3285 = vmatmul.mubr.msk.f32.vlgmr.msra.gmra.mrb[0].mxu0 %vm117_vm3, %v4273_v13  ;;  %v3356_v31 = vpack.c.bf16 %v111_v28, %v96_v26  ;;  %v98_v32 = vld [vmem:[#allocation6 + $0x58] sm:$0xff]  ;;  %v97_v34 = vld [vmem:[#allocation6 + $0x50] sm:$0xff]  ;;  %v765_v63 = vsub.s32 6, %v4328_v50  ;;  %v769_v11 = vsub.s32 7, %v4328_v50  ;;  %s4147_s20 = smov 127  }
  0x53   :  { %3352 = vmatprep.subr.msk.bf16.mxu1 %vm4269_vm2, %v3350_v23  ;;  %3288 = vmatmul.mubr.msk.f32.vlgmr.msra.gmra.mrb[0].mxu1 %vm117_vm3, %v4273_v13  ;;  %v3359_v35 = vpack.c.bf16 %v110_v30, %v95_v29  ;;  %v3362_v36 = vpack.c.bf16 %v113_v33, %v98_v32  ;;  %v112_v37 = vld [vmem:[#allocation6 + $0xc8] sm:$0x1]  ;;  %v115_v39 = vld [vmem:[#allocation6 + $0xe0] sm:$0x1]  ;;  %v114_v42 = vld [vmem:[#allocation6 + $0xd8] sm:$0x1] }
  0x54   :  { %3349 = vmatpush1.bf16.msk.msra.mxu0 %vm4269_vm2, %v3347_v22  ;;  %v100_v38 = vld [vmem:[#allocation6 + $0x68] sm:$0xff]  ;;  %373 = vmatprep.mubr.f32.mxu0 %v5362_v0  ;;  %v3365_v40 = vpack.c.bf16 %v112_v37, %v97_v34  ;;  %v99_v41 = vld [vmem:[#allocation6 + $0x60] sm:$0xff]  ;;  %v101_v44 = vld [vmem:[#allocation6 + $0x70] sm:$0xff]  ;;  %vm1005_vm6 = vcmask 1039360   ;;  %s4148_s21 = smov 98   ;;  %vm1047_vm7 = vcmask 801792  }
  0x55   :  { %3355 = vmatpush1.bf16.msk.msra.mxu1 %vm4269_vm2, %v3353_v27  ;;  %444 = vmatprep.mubr.f32.mxu1 %v5362_v0  ;;  %v3368_v43 = vpack.c.bf16 %v115_v39, %v100_v38  ;;  %v116_v45 = vld [vmem:[#allocation6 + $0xe8] sm:$0x1]  ;;  %v3371_v46 = vpack.c.bf16 %v114_v42, %v99_v41  ;;  %v734_v52 = vld [vmem:[%s5350_s2] sm:$0xff]  ;;  %s4149_s22 = smov 124   ;;  %v1192_v49 = vld [vmem:[#allocation11 + $0x3e0] sm:$0xff]  ;;  %vm1888_vm8 = vcmask 1014784  }
  0x56   :  { %3358 = vmatprep.subr.msk.bf16.mxu0 %vm4269_vm2, %v3356_v31  ;;  %3364 = vmatprep.subr.msk.bf16.mxu1 %vm4269_vm2, %v3362_v36  ;;  %v3375_v47 = vpack.c.bf16 %v116_v45, %v101_v44  ;;  %v742_v56 = vrot.slane %v734_v52, %v4331_v51  ;;  %v746_v58 = vrot.slane %v734_v52, %v4337_v53  ;;  %v735_v17 = vld [vmem:[%s5350_s2 + $0x8] sm:$0x7f]  ;;  %s4150_s23 = smov 113   ;;  %vm1278_vm9 = vcmask 588800   ;;  %s4151_s0 = smov 17  }
  0x57   :  { %3291 = vmatmul.mubr.msk.f32.vlgmr.msra.gmra.mrb[2].mxu0 %vm117_vm3, %v4273_v13  ;;  %v750_v59 = vrot.slane %v734_v52, %v4340_v54  ;;  %v754_v60 = vrot.slane %v734_v52, %v4343_v55  ;;  %v758_v4 = vrot.slane %v734_v52, %v757_v57  ;;  %v762_v10 = vrot.slane %v734_v52, %v761_v61  ;;  %s4152_s24 = smov 1   ;;  %s4153_s25 = smov 15  }
  0x58   :  { %3294 = vmatmul.mubr.msk.f32.vlgmr.msra.gmra.mrb[2].mxu1 %vm117_vm3, %v4273_v13  ;;  %3361 = vmatpush1.bf16.msk.msra.mxu0 %vm4269_vm2, %v3359_v35  ;;  %v766_v16 = vrot.slane %v734_v52, %v765_v63  ;;  %v770_v26 = vrot.slane %v734_v52, %v769_v11  ;;  %v774_v27 = vrot.slane %v735_v17, %v4331_v51  ;;  %s4154_s26 = smov 112   ;;  %s4155_s27 = smov 111   ;;  %vm2209_vm10 = vcmask 138240  }
  0x59   :  { %515 = vmatprep.mubr.f32.mxu0 %v5362_v0  ;;  %3367 = vmatpush1.bf16.msk.msra.mxu1 %vm4269_vm2, %v3365_v40  ;;  %v778_v40 = vrot.slane %v735_v17, %v4337_v53  ;;  %v782_v41 = vrot.slane %v735_v17, %v4340_v54  ;;  %vm2242_vm11 = vcmask 130048   ;;  %vm2308_vm12 = vcmask 7168  }
  0x5a   :  { %586 = vmatprep.mubr.f32.mxu1 %v5362_v0  ;;  %3370 = vmatprep.subr.msk.bf16.mxu0 %vm4269_vm2, %v3368_v43  ;;  %vm2275_vm13 = vcmask 121856   ;;  %vm2414_vm14 = vcmask 916480   ;;  %vm2381_vm15 = vcmask 924672   ;;  %vm2447_vm0 = vcmask 908288  }
  0x5b   :  { %3297 = vmatmul.mubr.msk.f32.vlgmr.msra.gmra.mrb[4].mxu0 %vm117_vm3, %v4273_v13  ;;  %3374 = vmatprep.subr.bf16.mxu1 %v4143_v48  ;;  %vm2852_vm1 = vcmask 769024  }
  0x5c   :  { %3300 = vmatmul.mubr.msk.f32.vlgmr.msra.gmra.mrb[4].mxu1 %vm117_vm3, %v4273_v13  ;;  %3373 = vmatpush1.bf16.msk.msra.mxu0 %vm4269_vm2, %v3371_v46 }
  0x5d   :  { %657 = vmatprep.mubr.f32.mxu0 %v5362_v0  ;;  %3377 = vmatpush3.bf16.msk.msra.mxu1 %vm4269_vm2, %v3375_v47 }
  0x5e   :  { %3329 = vmatprep.mubr.msk.f32.mxu1 %vm4144_vm4, %v5362_v0 }
  0x5f   :  { %3303 = vmatmul.mubr.msk.f32.vlgmr.msra.gmra.mrb[6].mxu0 %vm117_vm3, %v4273_v13 }
  0x60   :  { %3330 = vmatmul.mubr.msk.f32.vlgmr.msra.gmra.mrb[6].mxu1 %vm117_vm3, %v4273_v13  ;;  %vm2870_vm3 = vcmp.eq.s32.totalorder %v4328_v50, 0 }
 0x125   :  { %v4351_v62 = vpop.f32.mrb[0].mxu0 }
 0x126   :  { %v814_v1 = vmul.f32 %v742_v56, %v4351_v62  ;;  %v4355_v2 = vpop.f32.mrb[1].mxu0  ;;  %v4357_v3 = vpop.f32.mrb[0].mxu1 }
 0x127   :  { %v815_v5 = vmul.f32 %v746_v58, %v4355_v2  ;;  %v816_v6 = vmul.f32 %v750_v59, %v4357_v3  ;;  %v4361_v7 = vpop.f32.mrb[1].mxu1 }
 0x128   :  { %v848_v8 = vmul.f32 %v814_v1, %v814_v1  ;;  %v817_v9 = vmul.f32 %v754_v60, %v4361_v7 }
 0x129   :  { %v829_v12 = vadd.f32 %v815_v5, %v814_v1  ;;  %v849_v13 = vmul.f32 %v815_v5, %v815_v5  ;;  %v850_v14 = vmul.f32 %v816_v6, %v816_v6  ;;  %v786_v1 = vrot.slane %v735_v17, %v4343_v55 }
 0x12a   :  { %v4367_v15 = vpop.f32.mrb[2].mxu0  ;;  %v851_v24 = vmul.f32 %v817_v9, %v817_v9 }
 0x12b   :  { %v818_v18 = vmul.f32 %v758_v4, %v4367_v15  ;;  %v4373_v19 = vpop.f32.mrb[3].mxu0  ;;  %v4375_v20 = vpop.f32.mrb[2].mxu1  ;;  %v863_v21 = vadd.f32 %v849_v13, %v848_v8  ;;  %v830_v22 = vadd.f32 %v829_v12, %v816_v6  ;;  %v790_v4 = vrot.slane %v735_v17, %v757_v57 }
 0x12c   :  { %v4377_v23 = vpop.f32.mrb[3].mxu1  ;;  %v819_v25 = vmul.f32 %v762_v10, %v4373_v19  ;;  %v820_v31 = vmul.f32 %v766_v16, %v4375_v20  ;;  %v798_v10 = vrot.slane %v735_v17, %v765_v63  ;;  %v794_v16 = vrot.slane %v735_v17, %v761_v61 }
 0x12d   :  { %v864_v28 = vadd.f32 %v863_v21, %v850_v14  ;;  %v831_v29 = vadd.f32 %v830_v22, %v817_v9  ;;  %v852_v30 = vmul.f32 %v818_v18, %v818_v18  ;;  %v821_v39 = vmul.f32 %v770_v26, %v4377_v23 }
 0x12e   :  { %v4382_v32 = vpop.f32.mrb[4].mxu0  ;;  %v853_v38 = vmul.f32 %v819_v25, %v819_v25  ;;  %v854_v44 = vmul.f32 %v820_v31, %v820_v31 }
 0x12f   :  { %v4384_v33 = vpop.f32.mrb[5].mxu0  ;;  %v4386_v34 = vpop.f32.mrb[4].mxu1  ;;  %v865_v35 = vadd.f32 %v864_v28, %v851_v24  ;;  %v832_v36 = vadd.f32 %v831_v29, %v818_v18  ;;  %v822_v45 = vmul.f32 %v774_v27, %v4382_v32  ;;  %v855_v59 = vmul.f32 %v821_v39, %v821_v39 }
 0x130   :  { %v4388_v37 = vpop.f32.mrb[5].mxu1  ;;  %v823_v60 = vmul.f32 %v778_v40, %v4384_v33  ;;  %v824_v9 = vmul.f32 %v782_v41, %v4386_v34 }
 0x131   :  { %v866_v42 = vadd.f32 %v865_v35, %v852_v30  ;;  %v833_v43 = vadd.f32 %v832_v36, %v819_v25  ;;  %v856_v8 = vmul.f32 %v822_v45, %v822_v45  ;;  %v825_v14 = vmul.f32 %v786_v1, %v4388_v37 }
 0x132   :  { %v4394_v46 = vpop.f32.mrb[6].mxu0  ;;  %v857_v13 = vmul.f32 %v823_v60, %v823_v60  ;;  %v858_v22 = vmul.f32 %v824_v9, %v824_v9 }
 0x133   :  { %v4396_v47 = vpop.f32.mrb[7].mxu0  ;;  %v730_v48 = vpop.f32.mrb[6].mxu1  ;;  %v867_v52 = vadd.f32 %v866_v42, %v853_v38  ;;  %v834_v56 = vadd.f32 %v833_v43, %v820_v31  ;;  %v826_v24 = vmul.f32 %v790_v4, %v4394_v46  ;;  %v859_v27 = vmul.f32 %v825_v14, %v825_v14 }
 0x134   :  { %v3331_v58 = vpop.f32.mrb[7].mxu1  ;;  %v828_v57 = vmul.f32 %v798_v10, %v730_v48  ;;  %v827_v30 = vmul.f32 %v794_v16, %v4396_v47 }
 0x135   :  { %v868_v5 = vadd.f32 %v867_v52, %v854_v44  ;;  %v835_v6 = vadd.f32 %v834_v56, %v821_v39  ;;  %v860_v29 = vmul.f32 %v826_v24, %v826_v24  ;;  %v5359_v44 = vmov 0  }
 0x136   :  { %v862_v31 = vmul.f32 %v828_v57, %v828_v57  ;;  %v843_v38 = vsel %vm842_vm5, %v828_v57, 0.0  ;;  %v861_v61 = vmul.f32 %v827_v30, %v827_v30  ;;  %3865 = vset.pattern.permute.xlu1 %v5359_v44  ;;  %3998 = vset.pattern.permute.xlu0 %v5359_v44 }
 0x137   :  { %v869_v11 = vadd.f32 %v868_v5, %v855_v59  ;;  %v836_v12 = vadd.f32 %v835_v6, %v822_v45 }
 0x138   :  { %v876_v40 = vsel %vm842_vm5, %v862_v31, 0.0 }
 0x139   :  { %v870_v18 = vadd.f32 %v869_v11, %v856_v8  ;;  %v837_v21 = vadd.f32 %v836_v12, %v823_v60 }
 0x13b   :  { %v871_v25 = vadd.f32 %v870_v18, %v857_v13  ;;  %v838_v26 = vadd.f32 %v837_v21, %v824_v9 }
 0x13d   :  { %v872_v28 = vadd.f32 %v871_v25, %v858_v22  ;;  %v839_v63 = vadd.f32 %v838_v26, %v825_v14 }
 0x13f   :  { %v873_v35 = vadd.f32 %v872_v28, %v859_v27  ;;  %v840_v36 = vadd.f32 %v839_v63, %v826_v24 }
 0x141   :  { %v841_v17 = vadd.f32 %v840_v36, %v827_v30  ;;  %v874_v39 = vadd.f32 %v873_v35, %v860_v29 }
 0x143   :  { %v844_v41 = vadd.f32 %v843_v38, %v841_v17  ;;  %v875_v42 = vadd.f32 %v874_v39, %v861_v61 }
 0x145   :  { %845 = vadd.xlane.f32.xlu0 %v844_v41  ;;  %v877_v43 = vadd.f32 %v876_v40, %v875_v42 }
 0x149   :  { %878 = vadd.xlane.f32.xlu0 %v877_v43 }
 0x1d2   :  { %v846_v45 = vpop.xlane.xlu0 %845 }
 0x1d3   :  { %v847_v48 = vmul.f32 0.0006377551, %v846_v45 }
 0x1d5   :  { %v881_v52 = vmul.f32 %v847_v48, %v847_v48  ;;  %v896_v56 = vsub.f32 %v4386_v34, %v847_v48  ;;  %v897_v58 = vsub.f32 %v4388_v37, %v847_v48  ;;  %v894_v60 = vsub.f32 %v4382_v32, %v847_v48 }
 0x1d6   :  { %v879_v59 = vpop.xlane.xlu0 %878  ;;  %v895_v1 = vsub.f32 %v4384_v33, %v847_v48  ;;  %v898_v4 = vsub.f32 %v4394_v46, %v847_v48  ;;  %v893_v5 = vsub.f32 %v4377_v23, %v847_v48  ;;  %v887_v8 = vsub.f32 %v4355_v2, %v847_v48  ;;  %v736_v2 = vld [vmem:[%s5354_s6] sm:$0xff] }
 0x1d7   :  { %v880_v6 = vmul.f32 0.0006377551, %v879_v59  ;;  %v888_v9 = vsub.f32 %v4357_v3, %v847_v48  ;;  %v886_v10 = vsub.f32 %v4351_v62, %v847_v48  ;;  %v889_v34 = vsub.f32 %v4361_v7, %v847_v48 }
 0x1d8   :  { %v899_v37 = vsub.f32 %v4396_v47, %v847_v48  ;;  %v890_v11 = vsub.f32 %v4367_v15, %v847_v48  ;;  %v891_v32 = vsub.f32 %v4373_v19, %v847_v48  ;;  %v892_v46 = vsub.f32 %v4375_v20, %v847_v48 }
 0x1d9   :  { %v882_v33 = vsub.f32 %v880_v6, %v881_v52  ;;  %v5360_v62 = vmov 1  }
 0x1db   :  { %v883_v12 = vadd.f32 1e-05, %v882_v33  ;;  %v1071_v33 = vld [vmem:[#allocation11 + $0x18] sm:$0xff] }
 0x1dd   :  { %4009 = vrsqrt.f32 %v883_v12 }
 0x1e7   :  { %v4010_v3 = vpop.eup %4009 }
 0x1e8   :  { %v885_v23 = vmul.f32 %v4010_v3, %v736_v2  ;;  %v1073_v3 = vld [vmem:[#allocation11 + $0x28] sm:$0xff] }
 0x1ea   :  { %903 = vperm.xlu1 %3865, %v885_v23   ;;  %v1075_v23 = vld [vmem:[#allocation11 + $0x38] sm:$0xff] }
 0x1ee   :  { %3866 = vset.pattern.permute.xlu1 %v5360_v62 }
 0x1ef   :  { %923 = vperm.xlu1 %3866, %v736_v2   ;;  %v1070_v2 = vld [vmem:[#allocation11 + $0x10] sm:$0xff] }
 0x1f3   :  { %3997 = vset.pattern.permute.xlu1 %v5359_v44  ;;  %v1194_v44 = vld [vmem:[#allocation11 + $0x3f0] sm:$0xff] }
 0x269   :  { %v904_v7 = vpop.permute.xlu1 %903 }
 0x26a   :  { %v916_v15 = vmul.f32 %v904_v7, %v896_v56  ;;  %v917_v19 = vmul.f32 %v904_v7, %v897_v58  ;;  %v914_v47 = vmul.f32 %v904_v7, %v894_v60  ;;  %v915_v20 = vmul.f32 %v904_v7, %v895_v1 }
 0x26b   :  { %v918_v13 = vmul.f32 %v904_v7, %v898_v4  ;;  %v913_v14 = vmul.f32 %v904_v7, %v893_v5  ;;  %v907_v16 = vmul.f32 %v904_v7, %v887_v8  ;;  %v908_v18 = vmul.f32 %v904_v7, %v888_v9 }
 0x26c   :  { %v906_v21 = vmul.f32 %v904_v7, %v886_v10  ;;  %v909_v22 = vmul.f32 %v904_v7, %v889_v34  ;;  %v919_v57 = vmul.f32 %v904_v7, %v899_v37  ;;  %v910_v25 = vmul.f32 %v904_v7, %v890_v11 }
 0x26d   :  { %v911_v26 = vmul.f32 %v904_v7, %v891_v32  ;;  %v912_v27 = vmul.f32 %v904_v7, %v892_v46  ;;  %v1069_v32 = vld [vmem:[#allocation11 + $0x8] sm:$0xff]  ;;  %v1068_v46 = vld [vmem:[#allocation11] sm:$0xff] }
 0x26e   :  { %v924_v24 = vpop.permute.xlu1 %923  ;;  %v3378_v12 = vpack.c.bf16 %v1071_v33, %v1069_v32  ;;  %v3380_v7 = vpack.c.bf16 %v1070_v2, %v1068_v46  ;;  %v1084_v32 = vld [vmem:[#allocation11 + $0x80] sm:$0xff]  ;;  %v1086_v33 = vld [vmem:[#allocation11 + $0x90] sm:$0xff]  ;;  %v1089_v46 = vld [vmem:[#allocation11 + $0xa8] sm:$0xff] }
 0x26f   :  { %v4427_v28 = vadd.f32 %v924_v24, %v916_v15  ;;  %v4429_v63 = vadd.f32 %v924_v24, %v917_v19  ;;  %v4431_v29 = vadd.f32 %v924_v24, %v914_v47  ;;  %v4433_v30 = vadd.f32 %v924_v24, %v915_v20  ;;  %v1072_v19 = vld [vmem:[#allocation11 + $0x20] sm:$0xff]  ;;  %v1074_v47 = vld [vmem:[#allocation11 + $0x30] sm:$0xff]  ;;  %v1077_v20 = vld [vmem:[#allocation11 + $0x48] sm:$0xff] }
 0x270   :  { %v4435_v31 = vadd.f32 %v924_v24, %v918_v13  ;;  %v4437_v35 = vadd.f32 %v924_v24, %v913_v14  ;;  %v4439_v36 = vadd.f32 %v924_v24, %v907_v16  ;;  %v4447_v42 = vadd.f32 %v924_v24, %v908_v18  ;;  %3379 = vmatprep.subr.bf16.mxu0 %v3378_v12  ;;  %v1079_v13 = vld [vmem:[#allocation11 + $0x58] sm:$0xff]  ;;  %v1076_v18 = vld [vmem:[#allocation11 + $0x40] sm:$0xff] }
 0x271   :  { %v951_v38 = vmax.f32 %v4427_v28, 0.0  ;;  %v952_v61 = vmax.f32 %v4429_v63, 0.0  ;;  %v949_v17 = vmax.f32 %v4431_v29, 0.0  ;;  %v950_v39 = vmax.f32 %v4433_v30, 0.0  ;;  %3587 = vmatprep.subr.bf16.mxu1 %v3378_v12  ;;  %3381 = vmatpush1.bf16.msra.mxu0 %v3380_v7  ;;  %v1091_v12 = vld [vmem:[#allocation11 + $0xb8] sm:$0xff] }
 0x272   :  { %v953_v40 = vmax.f32 %v4435_v31, 0.0  ;;  %v948_v41 = vmax.f32 %v4437_v35, 0.0  ;;  %v942_v45 = vmax.f32 %v4439_v36, 0.0  ;;  %v4454_v48 = vadd.f32 %v924_v24, %v906_v21  ;;  %3589 = vmatpush1.bf16.msra.mxu1 %v3380_v7  ;;  %v1078_v21 = vld [vmem:[#allocation11 + $0x50] sm:$0xff]  ;;  %v1129_v35 = vld [vmem:[#allocation11 + $0x1e8] sm:$0xff] }
 0x273   :  { %v3872_v43 = vpack.i.bf16 %v952_v61, %v951_v38  ;;  %v4456_v52 = vadd.f32 %v924_v24, %v909_v22  ;;  %v3867_v56 = vpack.i.bf16 %v950_v39, %v949_v17  ;;  %v943_v58 = vmax.f32 %v4447_v42, 0.0  ;;  %v1081_v22 = vld [vmem:[#allocation11 + $0x68] sm:$0xff]  ;;  %v1090_v7 = vld [vmem:[#allocation11 + $0xb0] sm:$0xff] }
 0x274   :  { %v4463_v59 = vadd.f32 %v924_v24, %v919_v57  ;;  %v4465_v60 = vadd.f32 %v924_v24, %v910_v25  ;;  %v941_v1 = vmax.f32 %v4454_v48, 0.0  ;;  %v4470_v5 = vadd.f32 %v924_v24, %v911_v26  ;;  %v1080_v26 = vld [vmem:[#allocation11 + $0x60] sm:$0xff]  ;;  %v1134_v31 = vld [vmem:[#allocation11 + $0x210] sm:$0xff] }
 0x275   :  { %3873 = vrot.lane.b32.xlu1 %v3872_v43, %s4147_s20  ;;  %v944_v4 = vmax.f32 %v4456_v52, 0.0  ;;  %v4472_v6 = vadd.f32 %v924_v24, %v912_v27  ;;  %3868 = vrot.lane.b32.xlu0 %v3867_v56, %s4147_s20  ;;  %v3877_v37 = vpack.i.bf16 %v943_v58, %v942_v45  ;;  %v3382_v15 = vpack.c.bf16 %v1075_v23, %v1073_v3  ;;  %v1083_v24 = vld [vmem:[#allocation11 + $0x78] sm:$0xff]  ;;  %v1082_v27 = vld [vmem:[#allocation11 + $0x70] sm:$0xff]  ;;  %v1085_v43 = vld [vmem:[#allocation11 + $0x88] sm:$0xff] }
 0x276   :  { %v954_v8 = vmax.f32 %v4463_v59, 0.0  ;;  %v945_v9 = vmax.f32 %v4465_v60, 0.0  ;;  %v5365_v10 = vmax.f32 %v4470_v5, 0.0  ;;  %v3384_v14 = vpack.c.bf16 %v1074_v47, %v1072_v19  ;;  %v1087_v56 = vld [vmem:[#allocation11 + $0x98] sm:$0xff]  ;;  %v1088_v23 = vld [vmem:[#allocation11 + $0xa0] sm:$0xff]  ;;  %v1142_v52 = vld [vmem:[#allocation11 + $0x250] sm:$0xff] }
 0x277   :  { %v947_v34 = vmax.f32 %v4472_v6, 0.0  ;;  %v3882_v11 = vpack.i.bf16 %v941_v1, %v944_v4  ;;  %3383 = vmatprep.subr.bf16.mxu0 %v3382_v15  ;;  %v3386_v16 = vpack.c.bf16 %v1079_v13, %v1077_v20  ;;  %3591 = vmatprep.subr.bf16.mxu1 %v3382_v15  ;;  %v3388_v57 = vpack.c.bf16 %v1078_v21, %v1076_v18  ;;  %v1093_v15 = vld [vmem:[#allocation11 + $0xc8] sm:$0xff]  ;;  %v1095_v19 = vld [vmem:[#allocation11 + $0xd8] sm:$0xff]  ;;  %v1092_v13 = vld [vmem:[#allocation11 + $0xc0] sm:$0xff] }
 0x278   :  { %3385 = vmatpush1.bf16.msra.mxu0 %v3384_v14  ;;  %3593 = vmatpush1.bf16.msra.mxu1 %v3384_v14  ;;  %v3390_v25 = vpack.c.bf16 %v1083_v24, %v1081_v22  ;;  %v3396_v2 = vpack.c.bf16 %v1086_v33, %v1084_v32  ;;  %v3398_v3 = vpack.c.bf16 %v1091_v12, %v1089_v46  ;;  %v1094_v14 = vld [vmem:[#allocation11 + $0xd0] sm:$0xff]  ;;  %v1099_v18 = vld [vmem:[#allocation11 + $0xf8] sm:$0xff]  ;;  %v1096_v24 = vld [vmem:[#allocation11 + $0xe0] sm:$0xff] }
 0x279   :  { %1582 = vrot.lane.b32.xlu1 %v948_v41, %s4147_s20  ;;  %1592 = vrot.lane.b32.xlu0 %v953_v40, %s4147_s20  ;;  %v3400_v47 = vpack.c.bf16 %v1090_v7, %v1088_v23  ;;  %v3402_v20 = vpack.c.bf16 %v1095_v19, %v1093_v15  ;;  %v3404_v21 = vpack.c.bf16 %v1094_v14, %v1092_v13  ;;  %v1107_v32 = vld [vmem:[#allocation11 + $0x138] sm:$0xff]  ;;  %v1104_v12 = vld [vmem:[#allocation11 + $0x120] sm:$0xff]  ;;  %v1145_v60 = vld [vmem:[#allocation11 + $0x268] sm:$0xff] }
 0x27a   :  { %3387 = vmatprep.subr.bf16.mxu0 %v3386_v16  ;;  %3595 = vmatprep.subr.bf16.mxu1 %v3386_v16  ;;  %v1097_v16 = vld [vmem:[#allocation11 + $0xe8] sm:$0xff]  ;;  %v1111_v23 = vld [vmem:[#allocation11 + $0x158] sm:$0xff]  ;;  %v1108_v19 = vld [vmem:[#allocation11 + $0x140] sm:$0xff]  ;;  %v3902_v36 = vpack.i.bf16 %v5365_v10, %v945_v9 }
 0x27b   :  { %v3406_v22 = vpack.c.bf16 %v1099_v18, %v1097_v16  ;;  %v1115_v13 = vld [vmem:[#allocation11 + $0x178] sm:$0xff]  ;;  %v1112_v18 = vld [vmem:[#allocation11 + $0x160] sm:$0xff] }
 0x27c   :  { %3389 = vmatpush1.bf16.msra.mxu0 %v3388_v57  ;;  %3597 = vmatpush1.bf16.msra.mxu1 %v3388_v57  ;;  %v1098_v57 = vld [vmem:[#allocation11 + $0xf0] sm:$0xff] }
 0x27d   :  { %3878 = vrot.lane.b32.xlu1 %v3877_v37, %s4147_s20  ;;  %v3392_v37 = vpack.c.bf16 %v1082_v27, %v1080_v26  ;;  %3391 = vmatprep.subr.bf16.mxu0 %v3390_v25  ;;  %v1103_v26 = vld [vmem:[#allocation11 + $0x118] sm:$0xff]  ;;  %v3408_v27 = vpack.c.bf16 %v1098_v57, %v1096_v24  ;;  %v1117_v24 = vld [vmem:[#allocation11 + $0x188] sm:$0xff] }
 0x27e   :  { %3599 = vmatprep.subr.bf16.mxu1 %v3390_v25  ;;  %v1101_v25 = vld [vmem:[#allocation11 + $0x108] sm:$0xff]  ;;  %v1119_v57 = vld [vmem:[#allocation11 + $0x198] sm:$0xff] }
 0x280   :  { %3393 = vmatpush1.bf16.msra.mxu0 %v3392_v37  ;;  %3601 = vmatpush1.bf16.msra.mxu1 %v3392_v37  ;;  %v1102_v37 = vld [vmem:[#allocation11 + $0x110] sm:$0xff] }
 0x281   :  { %3883 = vrot.lane.b32.xlu1 %v3882_v11, %s4147_s20  ;;  %v3394_v11 = vpack.c.bf16 %v1087_v56, %v1085_v43  ;;  %v3410_v43 = vpack.c.bf16 %v1103_v26, %v1101_v25  ;;  %v1100_v56 = vld [vmem:[#allocation11 + $0x100] sm:$0xff]  ;;  %v3426_v26 = vpack.c.bf16 %v1119_v57, %v1117_v24 }
 0x282   :  { %v3412_v33 = vpack.c.bf16 %v1102_v37, %v1100_v56  ;;  %v1116_v25 = vld [vmem:[#allocation11 + $0x180] sm:$0xff]  ;;  %v1121_v37 = vld [vmem:[#allocation11 + $0x1a8] sm:$0xff] }
 0x283   :  { %3395 = vmatprep.subr.bf16.mxu0 %v3394_v11  ;;  %3603 = vmatprep.subr.bf16.mxu1 %v3394_v11  ;;  %v1105_v11 = vld [vmem:[#allocation11 + $0x128] sm:$0xff] }
 0x284   :  { %3397 = vmatpush1.bf16.msra.mxu0 %v3396_v2  ;;  %3605 = vmatpush1.bf16.msra.mxu1 %v3396_v2  ;;  %v3414_v46 = vpack.c.bf16 %v1107_v32, %v1105_v11  ;;  %v1106_v2 = vld [vmem:[#allocation11 + $0x130] sm:$0xff]  ;;  %v1123_v11 = vld [vmem:[#allocation11 + $0x1b8] sm:$0xff]  ;;  %v1120_v32 = vld [vmem:[#allocation11 + $0x1a0] sm:$0xff] }
 0x285   :  { %3399 = vmatprep.subr.bf16.mxu0 %v3398_v3  ;;  %3607 = vmatprep.subr.bf16.mxu1 %v3398_v3  ;;  %v1109_v3 = vld [vmem:[#allocation11 + $0x148] sm:$0xff]  ;;  %v3416_v7 = vpack.c.bf16 %v1106_v2, %v1104_v12  ;;  %v3430_v12 = vpack.c.bf16 %v1123_v11, %v1121_v37  ;;  %v1122_v2 = vld [vmem:[#allocation11 + $0x1b0] sm:$0xff]  ;;  %v1128_v37 = vld [vmem:[#allocation11 + $0x1e0] sm:$0xff] }
 0x286   :  { %v3418_v15 = vpack.c.bf16 %v1111_v23, %v1109_v3 }
 0x288   :  { %3401 = vmatpush1.bf16.msra.mxu0 %v3400_v47  ;;  %3609 = vmatpush1.bf16.msra.mxu1 %v3400_v47  ;;  %v1110_v47 = vld [vmem:[#allocation11 + $0x150] sm:$0xff] }
 0x289   :  { %3403 = vmatprep.subr.bf16.mxu0 %v3402_v20  ;;  %3611 = vmatprep.subr.bf16.mxu1 %v3402_v20  ;;  %v1113_v20 = vld [vmem:[#allocation11 + $0x168] sm:$0xff]  ;;  %v3420_v14 = vpack.c.bf16 %v1110_v47, %v1108_v19 }
 0x28a   :  { %v3422_v16 = vpack.c.bf16 %v1115_v13, %v1113_v20 }
 0x28c   :  { %3405 = vmatpush1.bf16.msra.mxu0 %v3404_v21  ;;  %3613 = vmatpush1.bf16.msra.mxu1 %v3404_v21  ;;  %v1114_v21 = vld [vmem:[#allocation11 + $0x170] sm:$0xff] }
 0x28d   :  { %3407 = vmatprep.subr.bf16.mxu0 %v3406_v22  ;;  %3615 = vmatprep.subr.bf16.mxu1 %v3406_v22  ;;  %v3424_v22 = vpack.c.bf16 %v1114_v21, %v1112_v18  ;;  %v1125_v18 = vld [vmem:[#allocation11 + $0x1c8] sm:$0xff]  ;;  %v1127_v21 = vld [vmem:[#allocation11 + $0x1d8] sm:$0xff] }
 0x28e   :  { %v3434_v57 = vpack.c.bf16 %v1127_v21, %v1125_v18  ;;  %v1135_v18 = vld [vmem:[#allocation11 + $0x218] sm:$0xff] }
 0x290   :  { %3409 = vmatpush1.bf16.msra.mxu0 %v3408_v27  ;;  %3617 = vmatpush1.bf16.msra.mxu1 %v3408_v27  ;;  %v1118_v27 = vld [vmem:[#allocation11 + $0x190] sm:$0xff] }
 0x291   :  { %3411 = vmatprep.subr.bf16.mxu0 %v3410_v43  ;;  %3619 = vmatprep.subr.bf16.mxu1 %v3410_v43  ;;  %v3428_v43 = vpack.c.bf16 %v1118_v27, %v1116_v25  ;;  %v1126_v25 = vld [vmem:[#allocation11 + $0x1d0] sm:$0xff] }
 0x294   :  { %3413 = vmatpush1.bf16.msra.mxu0 %v3412_v33  ;;  %3621 = vmatpush1.bf16.msra.mxu1 %v3412_v33 }
 0x295   :  { %3415 = vmatprep.subr.bf16.mxu0 %v3414_v46  ;;  %3623 = vmatprep.subr.bf16.mxu1 %v3414_v46 }
 0x298   :  { %3417 = vmatpush1.bf16.msra.mxu0 %v3416_v7  ;;  %3625 = vmatpush1.bf16.msra.mxu1 %v3416_v7 }
 0x299   :  { %3419 = vmatprep.subr.bf16.mxu0 %v3418_v15  ;;  %3627 = vmatprep.subr.bf16.mxu1 %v3418_v15  ;;  %v3432_v15 = vpack.c.bf16 %v1122_v2, %v1120_v32 }
 0x29c   :  { %3421 = vmatpush1.bf16.msra.mxu0 %v3420_v14  ;;  %3629 = vmatpush1.bf16.msra.mxu1 %v3420_v14 }
 0x29d   :  { %3423 = vmatprep.subr.bf16.mxu0 %v3422_v16  ;;  %3631 = vmatprep.subr.bf16.mxu1 %v3422_v16 }
 0x2a0   :  { %3425 = vmatpush1.bf16.msra.mxu0 %v3424_v22  ;;  %3633 = vmatpush1.bf16.msra.mxu1 %v3424_v22  ;;  %v1124_v22 = vld [vmem:[#allocation11 + $0x1c0] sm:$0xff] }
 0x2a1   :  { %3427 = vmatprep.subr.bf16.mxu0 %v3426_v26  ;;  %3635 = vmatprep.subr.bf16.mxu1 %v3426_v26 }
 0x2a4   :  { %3429 = vmatpush1.bf16.msra.mxu0 %v3428_v43  ;;  %3637 = vmatpush1.bf16.msra.mxu1 %v3428_v43 }
 0x2a5   :  { %3431 = vmatprep.subr.bf16.mxu0 %v3430_v12  ;;  %3639 = vmatprep.subr.bf16.mxu1 %v3430_v12 }
 0x2a8   :  { %3433 = vmatpush1.bf16.msra.mxu0 %v3432_v15  ;;  %3641 = vmatpush1.bf16.msra.mxu1 %v3432_v15 }
 0x2a9   :  { %3435 = vmatprep.subr.bf16.mxu0 %v3434_v57  ;;  %3643 = vmatprep.subr.bf16.mxu1 %v3434_v57 }
 0x2e7   :  { %v4495_v56 = vpop.permute.xlu1 %3873  ;;  %v3869_v46 = vpop.permute.xlu0 %3868 }
 0x2e8   :  { %v3875_v33 = vunpack.i.l.bf16 %v4495_v56  ;;  %v3876_v3 = vunpack.i.h.bf16 %v4495_v56  ;;  %v3871_v23 = vunpack.i.h.bf16 %v3869_v46  ;;  %v3870_v7 = vunpack.i.l.bf16 %v3869_v46 }
 0x2ea   :  { %v1598_v19 = vsel %vm1005_vm6, %v3871_v23, %v3875_v33  ;;  %v1597_v47 = vsel %vm1005_vm6, %v3870_v7, %v3871_v23  ;;  %v1599_v24 = vsel %vm1005_vm6, %v3875_v33, %v3876_v3  ;;  %v1130_v33 = vld [vmem:[#allocation11 + $0x1f0] sm:$0xff] }
 0x2eb   :  { %v1583_v20 = vpop.permute.xlu1 %1582  ;;  %v4504_v14 = vmax.f32 %v949_v17, %v1597_v47  ;;  %v4508_v16 = vmax.f32 %v950_v39, %v1598_v19  ;;  %v3436_v17 = vpack.c.bf16 %v1126_v25, %v1124_v22  ;;  %v4522_v43 = vmax.f32 %v951_v38, %v1599_v24  ;;  %v1593_v57 = vpop.permute.xlu0 %1592 }
 0x2ec   :  { %v1596_v13 = vsel %vm1005_vm6, %v1583_v20, %v3870_v7  ;;  %v3440_v12 = vpack.c.bf16 %v1130_v33, %v1128_v37  ;;  %v1139_v33 = vld [vmem:[#allocation11 + $0x238] sm:$0xff] }
 0x2ed   :  { %v4515_v26 = vmax.f32 %v948_v41, %v1596_v13  ;;  %v3887_v29 = vpack.i.bf16 %v4508_v16, %v4504_v14  ;;  %3437 = vmatpush1.bf16.msra.mxu0 %v3436_v17  ;;  %v1131_v41 = vld [vmem:[#allocation11 + $0x1f8] sm:$0xff]  ;;  %3645 = vmatpush1.bf16.msra.mxu1 %v3436_v17  ;;  %v1133_v13 = vld [vmem:[#allocation11 + $0x208] sm:$0xff] }
 0x2ee   :  { %v3438_v32 = vpack.c.bf16 %v1131_v41, %v1129_v35  ;;  %v3442_v21 = vpack.c.bf16 %v1135_v18, %v1133_v13  ;;  %v1600_v35 = vsel %vm1005_vm6, %v3876_v3, %v1593_v57 }
 0x2ef   :  { %v3879_v30 = vpop.permute.xlu1 %3878  ;;  %3888 = vrot.lane.b32.xlu1 %v3887_v29, %s4148_s21  ;;  %v3892_v11 = vpack.i.bf16 %v4515_v26, %v4522_v43 }
 0x2f0   :  { %v3881_v39 = vunpack.i.h.bf16 %v3879_v30  ;;  %v3880_v27 = vunpack.i.l.bf16 %v3879_v30  ;;  %3439 = vmatprep.subr.bf16.mxu0 %v3438_v32  ;;  %3647 = vmatprep.subr.bf16.mxu1 %v3438_v32 }
 0x2f1   :  { %3441 = vmatpush1.bf16.msra.mxu0 %v3440_v12  ;;  %3649 = vmatpush1.bf16.msra.mxu1 %v3440_v12 }
 0x2f2   :  { %v1007_v38 = vsel %vm1005_vm6, %v3880_v27, %v3881_v39  ;;  %3443 = vmatprep.subr.bf16.mxu0 %v3442_v21  ;;  %3651 = vmatprep.subr.bf16.mxu1 %v3442_v21  ;;  %v1136_v21 = vld [vmem:[#allocation11 + $0x220] sm:$0xff] }
 0x2f3   :  { %v4526_v46 = vpop.permute.xlu1 %3883  ;;  %3893 = vrot.lane.b32.xlu1 %v3892_v11, %s4148_s21  ;;  %v1020_v15 = vmax.f32 %v942_v45, %v1007_v38 }
 0x2f4   :  { %v3886_v2 = vunpack.i.h.bf16 %v4526_v46  ;;  %v3885_v28 = vunpack.i.l.bf16 %v4526_v46 }
 0x2f6   :  { %v1008_v23 = vsel %vm1005_vm6, %v3881_v39, %v3885_v28  ;;  %v1006_v7 = vsel %vm1005_vm6, %v3886_v2, %v3880_v27 }
 0x2f7   :  { %v4540_v19 = vmax.f32 %v943_v58, %v1008_v23  ;;  %1594 = vrot.lane.b32.xlu1 %v954_v8, %s4147_s20  ;;  %v1019_v20 = vmax.f32 %v941_v1, %v1006_v7 }
 0x2f9   :  { %v3897_v47 = vpack.i.bf16 %v4540_v19, %v1020_v15 }
 0x2fb   :  { %3898 = vrot.lane.b32.xlu0 %v3897_v47, %s4148_s21  ;;  %1033 = vrot.lane.b32.xlu1 %v1019_v20, %s4148_s21 }
 0x2ff   :  { %3903 = vrot.lane.b32.xlu0 %v3902_v36, %s4147_s20  ;;  %v1138_v36 = vld [vmem:[#allocation11 + $0x230] sm:$0xff] }
 0x361   :  { %v3889_v42 = vpop.permute.xlu1 %3888 }
 0x362   :  { %v3891_v45 = vunpack.i.h.bf16 %v3889_v42  ;;  %v3890_v48 = vunpack.i.l.bf16 %v3889_v42  ;;  %v1141_v42 = vld [vmem:[#allocation11 + $0x248] sm:$0xff] }
 0x364   :  { %v1638_v24 = vsel %vm1047_vm7, %v3890_v48, %v3891_v45 }
 0x365   :  { %v4555_v58 = vpop.permute.xlu1 %3893  ;;  %v1651_v39 = vmax.f32 %v4504_v14, %v1638_v24  ;;  %v4580_v14 = vmax.f32 %v952_v61, %v1600_v35  ;;  %v4615_v24 = vpack.c.bf16 %v1138_v36, %v1136_v21  ;;  %v1151_v35 = vld [vmem:[#allocation11 + $0x298] sm:$0xff] }
 0x366   :  { %v3896_v1 = vunpack.i.h.bf16 %v4555_v58  ;;  %v3895_v22 = vunpack.i.l.bf16 %v4555_v58  ;;  %v1163_v21 = vld [vmem:[#allocation11 + $0x2f8] sm:$0xff] }
 0x368   :  { %v1637_v25 = vsel %vm1047_vm7, %v3896_v1, %v3890_v48  ;;  %v1639_v29 = vsel %vm1047_vm7, %v3891_v45, %v3895_v22  ;;  %v1143_v45 = vld [vmem:[#allocation11 + $0x258] sm:$0xff] }
 0x369   :  { %v1595_v17 = vpop.permute.xlu1 %1594  ;;  %v1650_v30 = vmax.f32 %v4515_v26, %v1637_v25  ;;  %v1652_v27 = vmax.f32 %v4508_v16, %v1639_v29  ;;  %v1132_v16 = vld [vmem:[#allocation11 + $0x200] sm:$0xff]  ;;  %v1137_v26 = vld [vmem:[#allocation11 + $0x228] sm:$0xff]  ;;  %v4621_v46 = vpack.c.bf16 %v1143_v45, %v1141_v42 }
 0x36a   :  { %v1601_v41 = vsel %vm1005_vm6, %v1593_v57, %v1595_v17  ;;  %v4593_v7 = vpack.c.bf16 %v1134_v31, %v1132_v16  ;;  %v4598_v18 = vpack.c.bf16 %v1139_v33, %v1137_v26  ;;  %v4627_v57 = vmax.f32 %v954_v8, %v1595_v17  ;;  %v1148_v17 = vld [vmem:[#allocation11 + $0x280] sm:$0xff]  ;;  %v1154_v26 = vld [vmem:[#allocation11 + $0x2b0] sm:$0xff]  ;;  %v1157_v33 = vld [vmem:[#allocation11 + $0x2c8] sm:$0xff] }
 0x36b   :  { %v4573_v37 = vmax.f32 %v953_v40, %v1601_v41  ;;  %1874 = vrot.lane.b32.xlu0 %v1650_v30, %s4149_s22  ;;  %v3907_v11 = vpack.i.bf16 %v1652_v27, %v1651_v39  ;;  %v1144_v30 = vld [vmem:[#allocation11 + $0x260] sm:$0xff]  ;;  %v1146_v39 = vld [vmem:[#allocation11 + $0x270] sm:$0xff]  ;;  %v1149_v27 = vld [vmem:[#allocation11 + $0x288] sm:$0xff] }
 0x36c   :  { %v4639_v59 = vpack.c.bf16 %v1146_v39, %v1144_v30  ;;  %v4642_v8 = vpack.c.bf16 %v1151_v35, %v1149_v27  ;;  %v1150_v41 = vld [vmem:[#allocation11 + $0x290] sm:$0xff]  ;;  %v1160_v45 = vld [vmem:[#allocation11 + $0x2e0] sm:$0xff]  ;;  %v1169_v30 = vld [vmem:[#allocation11 + $0x328] sm:$0xff] }
 0x36d   :  { %v4576_v32 = vpop.permute.xlu0 %3898  ;;  %3908 = vrot.lane.b32.xlu1 %v3907_v11, %s4149_s22  ;;  %v1034_v40 = vpop.permute.xlu1 %1033  ;;  %v3912_v2 = vpack.i.bf16 %v4573_v37, %v4580_v14  ;;  %v1153_v11 = vld [vmem:[#allocation11 + $0x2a8] sm:$0xff]  ;;  %v4645_v16 = vpack.c.bf16 %v1150_v41, %v1148_v17  ;;  %v1171_v39 = vld [vmem:[#allocation11 + $0x338] sm:$0xff]  ;;  %v1168_v17 = vld [vmem:[#allocation11 + $0x320] sm:$0xff] }
 0x36e   :  { %v5364_v56 = vunpack.i.h.bf16 %v4576_v32  ;;  %v3900_v3 = vunpack.i.l.bf16 %v4576_v32  ;;  %v4672_v35 = vpack.c.bf16 %v1171_v39, %v1169_v30  ;;  %v1170_v41 = vld [vmem:[#allocation11 + $0x330] sm:$0xff]  ;;  %v1180_v30 = vld [vmem:[#allocation11 + $0x380] sm:$0xff] }
 0x36f   :  { %v1182_v39 = vld [vmem:[#allocation11 + $0x390] sm:$0xff] }
 0x370   :  { %v1048_v12 = vsel %vm1047_vm7, %v1034_v40, %v3900_v3  ;;  %v1049_v63 = vsel %vm1047_vm7, %v3900_v3, %v5364_v56  ;;  %v1155_v3 = vld [vmem:[#allocation11 + $0x2b8] sm:$0xff]  ;;  %v1152_v40 = vld [vmem:[#allocation11 + $0x2a0] sm:$0xff] }
 0x371   :  { %v1061_v61 = vmax.f32 %v1019_v20, %v1048_v12  ;;  %v4591_v38 = vpop.permute.xlu0 %3903  ;;  %v1062_v23 = vmax.f32 %v1020_v15, %v1049_v63  ;;  %3913 = vrot.lane.b32.xlu1 %v3912_v2, %s4148_s21  ;;  %v4648_v31 = vpack.c.bf16 %v1155_v3, %v1153_v11  ;;  %v1159_v12 = vld [vmem:[#allocation11 + $0x2d8] sm:$0xff]  ;;  %v4651_v2 = vpack.c.bf16 %v1154_v26, %v1152_v40  ;;  %v1173_v11 = vld [vmem:[#allocation11 + $0x348] sm:$0xff] }
 0x372   :  { %v3906_v47 = vunpack.i.h.bf16 %v4591_v38  ;;  %v3905_v13 = vunpack.i.l.bf16 %v4591_v38  ;;  %v4654_v63 = vpack.c.bf16 %v1159_v12, %v1157_v33  ;;  %v1175_v3 = vld [vmem:[#allocation11 + $0x358] sm:$0xff]  ;;  %v4675_v40 = vpack.c.bf16 %v1170_v41, %v1168_v17  ;;  %v1172_v33 = vld [vmem:[#allocation11 + $0x340] sm:$0xff]  ;;  %v1174_v12 = vld [vmem:[#allocation11 + $0x350] sm:$0xff] }
 0x373   :  { %1346 = vmatprep.mubr.f32.mxu0 %v1062_v23  ;;  %v1158_v23 = vld [vmem:[#allocation11 + $0x2d0] sm:$0xff]  ;;  %v4678_v26 = vpack.c.bf16 %v1175_v3, %v1173_v11  ;;  %v1185_v17 = vld [vmem:[#allocation11 + $0x3a8] sm:$0xff]  ;;  %v1187_v41 = vld [vmem:[#allocation11 + $0x3b8] sm:$0xff]  ;;  %v4693_v11 = vpack.c.bf16 %v1182_v39, %v1180_v30  ;;  %v5369_v38 = vmax.f32 %v4470_v5, 0.0 }
 0x374   :  { %v1009_v20 = vsel %vm1005_vm6, %v3885_v28, %v3905_v13  ;;  %v1010_v15 = vsel %vm1005_vm6, %v3905_v13, %v3906_v47  ;;  %1347 = vmatmul.mubr.f32.vlgmr.msra.gmra.mrb[8].mxu0 %v1061_v61  ;;  %v1140_v28 = vld [vmem:[#allocation11 + $0x240] sm:$0xff]  ;;  %v1161_v13 = vld [vmem:[#allocation11 + $0x2e8] sm:$0xff]  ;;  %v4696_v3 = vpack.c.bf16 %v1187_v41, %v1185_v17  ;;  %v1195_v39 = vld [vmem:[#allocation11 + $0x3f8] sm:$0xff] }
 0x375   :  { %v4608_v48 = vmax.f32 %v944_v4, %v1009_v20  ;;  %v4612_v1 = vmax.f32 %v945_v9, %v1010_v15  ;;  %3445 = vmatpush1.bf16.msra.mxu0 %v4593_v7  ;;  %1003 = vrot.lane.b32.xlu1 %v947_v34, %s4147_s20  ;;  %v1147_v9 = vld [vmem:[#allocation11 + $0x278] sm:$0xff]  ;;  %v4631_v25 = vpack.c.bf16 %v1142_v52, %v1140_v28  ;;  %v1156_v61 = vld [vmem:[#allocation11 + $0x2c0] sm:$0xff]  ;;  %v1162_v20 = vld [vmem:[#allocation11 + $0x2f0] sm:$0xff] }
 0x376   :  { %3447 = vmatprep.subr.bf16.mxu0 %v4598_v18  ;;  %v4636_v29 = vpack.c.bf16 %v1147_v9, %v1145_v60  ;;  %v4657_v36 = vpack.c.bf16 %v1158_v23, %v1156_v61  ;;  %v4660_v42 = vpack.c.bf16 %v1163_v21, %v1161_v13  ;;  %v1165_v15 = vld [vmem:[#allocation11 + $0x308] sm:$0xff]  ;;  %v1167_v28 = vld [vmem:[#allocation11 + $0x318] sm:$0xff]  ;;  %v4663_v52 = vpack.c.bf16 %v1162_v20, %v1160_v45  ;;  %v1164_v60 = vld [vmem:[#allocation11 + $0x300] sm:$0xff] }
 0x377   :  { %v3917_v4 = vpack.i.bf16 %v4612_v1, %v4608_v48  ;;  %v1166_v9 = vld [vmem:[#allocation11 + $0x310] sm:$0xff]  ;;  %v1177_v61 = vld [vmem:[#allocation11 + $0x368] sm:$0xff]  ;;  %v1179_v23 = vld [vmem:[#allocation11 + $0x378] sm:$0xff]  ;;  %v4681_v13 = vpack.c.bf16 %v1174_v12, %v1172_v33 }
 0x378   :  { %v4669_v27 = vpack.c.bf16 %v1166_v9, %v1164_v60  ;;  %v4684_v21 = vpack.c.bf16 %v1179_v23, %v1177_v61  ;;  %v1176_v45 = vld [vmem:[#allocation11 + $0x360] sm:$0xff]  ;;  %v1178_v20 = vld [vmem:[#allocation11 + $0x370] sm:$0xff]  ;;  %v1189_v61 = vld [vmem:[#allocation11 + $0x3c8] sm:$0xff] }
 0x379   :  { %3918 = vrot.lane.b32.xlu0 %v3917_v4, %s4148_s21  ;;  %3449 = vmatpush1.bf16.msra.mxu0 %v4615_v24  ;;  %v4666_v4 = vpack.c.bf16 %v1167_v28, %v1165_v15  ;;  %v1181_v15 = vld [vmem:[#allocation11 + $0x388] sm:$0xff]  ;;  %v1183_v28 = vld [vmem:[#allocation11 + $0x398] sm:$0xff]  ;;  %v4687_v60 = vpack.c.bf16 %v1178_v20, %v1176_v45  ;;  %v1184_v33 = vld [vmem:[#allocation11 + $0x3a0] sm:$0xff] }
 0x37a   :  { %1635 = vrot.lane.b32.xlu1 %v4627_v57, %s4148_s21  ;;  %3451 = vmatprep.subr.bf16.mxu0 %v4621_v46  ;;  %v4690_v9 = vpack.c.bf16 %v1183_v28, %v1181_v15  ;;  %v1186_v12 = vld [vmem:[#allocation11 + $0x3b0] sm:$0xff]  ;;  %v1191_v23 = vld [vmem:[#allocation11 + $0x3d8] sm:$0xff]  ;;  %v1188_v15 = vld [vmem:[#allocation11 + $0x3c0] sm:$0xff] }
 0x37b   :  { %v4699_v45 = vpack.c.bf16 %v1186_v12, %v1184_v33  ;;  %v4702_v20 = vpack.c.bf16 %v1191_v23, %v1189_v61  ;;  %v1190_v28 = vld [vmem:[#allocation11 + $0x3d0] sm:$0xff]  ;;  %v1193_v30 = vld [vmem:[#allocation11 + $0x3e8] sm:$0xff]  ;;  %v1199_v12 = vld [vmem:[#allocation11 + $0x418] sm:$0xff]  ;;  %v4711_v61 = vpack.c.bf16 %v1194_v44, %v1192_v49 }
 0x37c   :  { %v4705_v17 = vpack.c.bf16 %v1190_v28, %v1188_v15  ;;  %v4708_v41 = vpack.c.bf16 %v1195_v39, %v1193_v30  ;;  %v1197_v33 = vld [vmem:[#allocation11 + $0x408] sm:$0xff] }
 0x37d   :  { %3453 = vmatpush1.bf16.msra.mxu0 %v4631_v25  ;;  %v4714_v23 = vpack.c.bf16 %v1199_v12, %v1197_v33 }
 0x37e   :  { %3455 = vmatprep.subr.bf16.mxu0 %v4636_v29 }
 0x381   :  { %3457 = vmatpush1.bf16.msra.mxu0 %v4639_v59 }
 0x382   :  { %3459 = vmatprep.subr.bf16.mxu0 %v4642_v8 }
 0x385   :  { %3461 = vmatpush1.bf16.msra.mxu0 %v4645_v16 }
 0x386   :  { %3463 = vmatprep.subr.bf16.mxu0 %v4648_v31 }
 0x389   :  { %3465 = vmatpush1.bf16.msra.mxu0 %v4651_v2 }
 0x38a   :  { %3467 = vmatprep.subr.bf16.mxu0 %v4654_v63 }
 0x38d   :  { %3469 = vmatpush1.bf16.msra.mxu0 %v4657_v36 }
 0x38e   :  { %3471 = vmatprep.subr.bf16.mxu0 %v4660_v42 }
 0x391   :  { %3473 = vmatpush1.bf16.msra.mxu0 %v4663_v52 }
 0x392   :  { %3475 = vmatprep.subr.bf16.mxu0 %v4666_v4 }
 0x395   :  { %3477 = vmatpush1.bf16.msra.mxu0 %v4669_v27 }
 0x396   :  { %3479 = vmatprep.subr.bf16.mxu0 %v4672_v35 }
 0x399   :  { %3481 = vmatpush1.bf16.msra.mxu0 %v4675_v40 }
 0x39a   :  { %3483 = vmatprep.subr.bf16.mxu0 %v4678_v26 }
 0x39d   :  { %3485 = vmatpush1.bf16.msra.mxu0 %v4681_v13 }
 0x39e   :  { %3487 = vmatprep.subr.bf16.mxu0 %v4684_v21 }
 0x3a1   :  { %3489 = vmatpush1.bf16.msra.mxu0 %v4687_v60 }
 0x3a2   :  { %3491 = vmatprep.subr.bf16.mxu0 %v4690_v9 }
 0x3a5   :  { %3493 = vmatpush1.bf16.msra.mxu0 %v4693_v11 }
 0x3a6   :  { %3495 = vmatprep.subr.bf16.mxu0 %v4696_v3 }
 0x3a9   :  { %3497 = vmatpush1.bf16.msra.mxu0 %v4699_v45 }
 0x3aa   :  { %3499 = vmatprep.subr.bf16.mxu0 %v4702_v20 }
 0x3ad   :  { %3501 = vmatpush1.bf16.msra.mxu0 %v4705_v17 }
 0x3ae   :  { %3503 = vmatprep.subr.bf16.mxu0 %v4708_v41 }
 0x3b1   :  { %3505 = vmatpush1.bf16.msra.mxu0 %v4711_v61 }
 0x3b2   :  { %3507 = vmatprep.subr.bf16.mxu0 %v4714_v23 }
 0x3dd   :  { %v1875_v39 = vpop.permute.xlu0 %1874 }
 0x3df   :  { %v4718_v15 = vpop.permute.xlu1 %3908 }
 0x3e0   :  { %v5366_v28 = vunpack.i.h.bf16 %v4718_v15  ;;  %v3910_v30 = vunpack.i.l.bf16 %v4718_v15 }
 0x3e2   :  { %v1890_v49 = vsel %vm1888_vm8, %v3910_v30, %v5366_v28  ;;  %v1889_v44 = vsel %vm1888_vm8, %v1875_v39, %v3910_v30 }
 0x3e3   :  { %v3914_v33 = vpop.permute.xlu1 %3913  ;;  %1967 = vmatprep.mubr.f32.mxu1 %v1890_v49 }
 0x3e4   :  { %v3916_v12 = vunpack.i.h.bf16 %v3914_v33  ;;  %v3915_v62 = vunpack.i.l.bf16 %v3914_v33  ;;  %1968 = vmatmul.mubr.f32.vlgmr.msra.gmra.mrb[8].mxu1 %v1889_v44  ;;  %v1200_v44 = vld [vmem:[#allocation11 + $0x420] sm:$0xff]  ;;  %v1202_v33 = vld [vmem:[#allocation11 + $0x430] sm:$0xff] }
 0x3e5   :  { %3653 = vmatpush1.bf16.msra.mxu1 %v4593_v7 }
 0x3e6   :  { %v1640_v0 = vsel %vm1047_vm7, %v3895_v22, %v3915_v62  ;;  %v1641_v56 = vsel %vm1047_vm7, %v3915_v62, %v3916_v12  ;;  %3655 = vmatprep.subr.bf16.mxu1 %v4598_v18  ;;  %v1196_v22 = vld [vmem:[#allocation11 + $0x400] sm:$0xff] }
 0x3e7   :  { %v1004_v10 = vpop.permute.xlu1 %1003  ;;  %v1653_v28 = vmax.f32 %v4522_v43, %v1640_v0  ;;  %v1654_v30 = vmax.f32 %v4580_v14, %v1641_v56  ;;  %v1198_v0 = vld [vmem:[#allocation11 + $0x410] sm:$0xff]  ;;  %v1201_v56 = vld [vmem:[#allocation11 + $0x428] sm:$0xff] }
 0x3e8   :  { %v4736_v39 = vmax.f32 %v947_v34, %v1004_v10  ;;  %v1011_v58 = vsel %vm1005_vm6, %v3906_v47, %v1004_v10  ;;  %v1203_v10 = vld [vmem:[#allocation11 + $0x438] sm:$0xff]  ;;  %v5370_v47 = vunpack.i.h.bf16 %v4576_v32 }
 0x3e9   :  { %v3922_v49 = vpack.i.bf16 %v1654_v30, %v1653_v28  ;;  %3657 = vmatpush1.bf16.msra.mxu1 %v4615_v24  ;;  %v4753_v7 = vmax.f32 %v5369_v38, %v1011_v58  ;;  %v4771_v32 = vpack.c.bf16 %v1203_v10, %v1201_v56  ;;  %v1205_v30 = vld [vmem:[#allocation11 + $0x448] sm:$0xff]  ;;  %v1212_v56 = vld [vmem:[#allocation11 + $0x480] sm:$0xff]  ;;  %v1214_v10 = vld [vmem:[#allocation11 + $0x490] sm:$0xff] }
 0x3ea   :  { %1045 = vrot.lane.b32.xlu1 %v4736_v39, %s4148_s21  ;;  %3659 = vmatprep.subr.bf16.mxu1 %v4621_v46  ;;  %v4761_v46 = vpack.c.bf16 %v1198_v0, %v1196_v22  ;;  %v1209_v58 = vld [vmem:[#allocation11 + $0x468] sm:$0xff]  ;;  %v1211_v22 = vld [vmem:[#allocation11 + $0x478] sm:$0xff]  ;;  %v1210_v0 = vld [vmem:[#allocation11 + $0x470] sm:$0xff] }
 0x3eb   :  { %v4744_v62 = vpop.permute.xlu0 %3918  ;;  %3923 = vrot.lane.b32.xlu0 %v3922_v49, %s4149_s22  ;;  %v1206_v49 = vld [vmem:[#allocation11 + $0x450] sm:$0xff]  ;;  %v1217_v38 = vld [vmem:[#allocation11 + $0x4a8] sm:$0xff] }
 0x3ec   :  { %v1636_v43 = vpop.permute.xlu1 %1635  ;;  %v3921_v6 = vunpack.i.h.bf16 %v4744_v62  ;;  %v3920_v34 = vunpack.i.l.bf16 %v4744_v62  ;;  %v1266_v62 = vld [vmem:[#allocation11 + $0x630] sm:$0xff] }
 0x3ed   :  { %v1656_v14 = vmax.f32 %v4627_v57, %v1636_v43  ;;  %3661 = vmatpush1.bf16.msra.mxu1 %v4631_v25  ;;  %v1642_v57 = vsel %vm1047_vm7, %v3916_v12, %v1636_v43  ;;  %v1207_v25 = vld [vmem:[#allocation11 + $0x458] sm:$0xff]  ;;  %v5371_v43 = vmov 0.0  }
 0x3ee   :  { %v1050_v18 = vsel %vm1047_vm7, %v5370_v47, %v3920_v34  ;;  %v1051_v24 = vsel %vm1047_vm7, %v3920_v34, %v3921_v6  ;;  %3663 = vmatprep.subr.bf16.mxu1 %v4636_v29  ;;  %v1655_v12 = vmax.f32 %v4573_v37, %v1642_v57  ;;  %v1204_v29 = vld [vmem:[#allocation11 + $0x440] sm:$0xff]  ;;  %v1213_v34 = vld [vmem:[#allocation11 + $0x488] sm:$0xff]  ;;  %v1219_v47 = vld [vmem:[#allocation11 + $0x4b8] sm:$0xff] }
 0x3ef   :  { %v1063_v28 = vmax.f32 %v4540_v19, %v1050_v18  ;;  %1886 = vrot.lane.b32.xlu1 %v1656_v14, %s4149_s22  ;;  %v1064_v5 = vmax.f32 %v4608_v48, %v1051_v24  ;;  %1043 = vrot.lane.b32.xlu0 %v4753_v7, %s4148_s21  ;;  %v4776_v19 = vpack.c.bf16 %v1202_v33, %v1200_v44  ;;  %v1215_v14 = vld [vmem:[#allocation11 + $0x498] sm:$0xff]  ;;  %v1218_v24 = vld [vmem:[#allocation11 + $0x4b0] sm:$0xff]  ;;  %v1221_v57 = vld [vmem:[#allocation11 + $0x4c8] sm:$0xff] }
 0x3f0   :  { %v4781_v48 = vpack.c.bf16 %v1207_v25, %v1205_v30  ;;  %v4785_v37 = vpack.c.bf16 %v1206_v49, %v1204_v29  ;;  %v4803_v18 = vpack.c.bf16 %v1214_v10, %v1212_v56  ;;  %v1222_v44 = vld [vmem:[#allocation11 + $0x4d0] sm:$0xff]  ;;  %v1225_v33 = vld [vmem:[#allocation11 + $0x4e8] sm:$0xff]  ;;  %v1227_v30 = vld [vmem:[#allocation11 + $0x4f8] sm:$0xff] }
 0x3f1   :  { %1417 = vmatprep.mubr.f32.mxu0 %v1064_v5  ;;  %3665 = vmatpush1.bf16.msra.mxu1 %v4639_v59  ;;  %v4789_v59 = vpack.c.bf16 %v1211_v22, %v1209_v58  ;;  %v1229_v29 = vld [vmem:[#allocation11 + $0x508] sm:$0xff]  ;;  %v1231_v49 = vld [vmem:[#allocation11 + $0x518] sm:$0xff]  ;;  %v1230_v22 = vld [vmem:[#allocation11 + $0x510] sm:$0xff] }
 0x3f2   :  { %1418 = vmatmul.mubr.f32.vlgmr.msra.gmra.mrb[8].mxu0 %v1063_v28  ;;  %3667 = vmatprep.subr.bf16.mxu1 %v4642_v8  ;;  %v1208_v8 = vld [vmem:[#allocation11 + $0x460] sm:$0xff]  ;;  %v1223_v28 = vld [vmem:[#allocation11 + $0x4d8] sm:$0xff]  ;;  %v1237_v56 = vld [vmem:[#allocation11 + $0x548] sm:$0xff] }
 0x3f3   :  { %3509 = vmatpush1.bf16.msra.mxu0 %v4761_v46  ;;  %1884 = vrot.lane.b32.xlu0 %v1655_v12, %s4149_s22  ;;  %v1226_v12 = vld [vmem:[#allocation11 + $0x4f0] sm:$0xff]  ;;  %v1239_v10 = vld [vmem:[#allocation11 + $0x558] sm:$0xff] }
 0x3f4   :  { %3511 = vmatprep.subr.bf16.mxu0 %v4771_v32  ;;  %2379 = vrot.lane.b32.xlu1 %v5371_v43, %s4150_s23 }
 0x3f5   :  { %3669 = vmatpush1.bf16.msra.mxu1 %v4645_v16  ;;  %v4795_v16 = vpack.c.bf16 %v1210_v0, %v1208_v8  ;;  %v1233_v8 = vld [vmem:[#allocation11 + $0x528] sm:$0xff]  ;;  %v1235_v0 = vld [vmem:[#allocation11 + $0x538] sm:$0xff] }
 0x3f6   :  { %3671 = vmatprep.subr.bf16.mxu1 %v4648_v31  ;;  %v4799_v31 = vpack.c.bf16 %v1215_v14, %v1213_v34  ;;  %v1234_v14 = vld [vmem:[#allocation11 + $0x530] sm:$0xff] }
 0x3f7   :  { %3513 = vmatpush1.bf16.msra.mxu0 %v4776_v19  ;;  %2347 = vrot.lane.b32.xlu0 %v5371_v43, %s4147_s20 }
 0x3f8   :  { %3515 = vmatprep.subr.bf16.mxu0 %v4781_v48 }
 0x3f9   :  { %3673 = vmatpush1.bf16.msra.mxu1 %v4651_v2  ;;  %v4807_v2 = vpack.c.bf16 %v1219_v47, %v1217_v38  ;;  %v1238_v47 = vld [vmem:[#allocation11 + $0x550] sm:$0xff] }
 0x3fa   :  { %3675 = vmatprep.subr.bf16.mxu1 %v4654_v63  ;;  %v1216_v63 = vld [vmem:[#allocation11 + $0x4a0] sm:$0xff] }
 0x3fb   :  { %3517 = vmatpush1.bf16.msra.mxu0 %v4785_v37  ;;  %v4811_v5 = vpack.c.bf16 %v1218_v24, %v1216_v63  ;;  %v1241_v63 = vld [vmem:[#allocation11 + $0x568] sm:$0xff]  ;;  %v1243_v24 = vld [vmem:[#allocation11 + $0x578] sm:$0xff] }
 0x3fc   :  { %3519 = vmatprep.subr.bf16.mxu0 %v4789_v59 }
 0x3fd   :  { %3677 = vmatpush1.bf16.msra.mxu1 %v4657_v36  ;;  %v4815_v36 = vpack.c.bf16 %v1223_v28, %v1221_v57  ;;  %v1242_v28 = vld [vmem:[#allocation11 + $0x570] sm:$0xff] }
 0x3fe   :  { %3679 = vmatprep.subr.bf16.mxu1 %v4660_v42  ;;  %v1220_v42 = vld [vmem:[#allocation11 + $0x4c0] sm:$0xff] }
 0x3ff   :  { %3521 = vmatpush1.bf16.msra.mxu0 %v4795_v16  ;;  %v4819_v25 = vpack.c.bf16 %v1222_v44, %v1220_v42  ;;  %v1245_v42 = vld [vmem:[#allocation11 + $0x588] sm:$0xff]  ;;  %v1247_v44 = vld [vmem:[#allocation11 + $0x598] sm:$0xff] }
 0x400   :  { %3523 = vmatprep.subr.bf16.mxu0 %v4799_v31 }
 0x401   :  { %3681 = vmatpush1.bf16.msra.mxu1 %v4663_v52  ;;  %v4823_v52 = vpack.c.bf16 %v1227_v30, %v1225_v33  ;;  %v1246_v30 = vld [vmem:[#allocation11 + $0x590] sm:$0xff] }
 0x402   :  { %3683 = vmatprep.subr.bf16.mxu1 %v4666_v4  ;;  %v1224_v4 = vld [vmem:[#allocation11 + $0x4e0] sm:$0xff] }
 0x403   :  { %3525 = vmatpush1.bf16.msra.mxu0 %v4803_v18  ;;  %v4827_v58 = vpack.c.bf16 %v1226_v12, %v1224_v4  ;;  %v1249_v4 = vld [vmem:[#allocation11 + $0x5a8] sm:$0xff]  ;;  %v1251_v12 = vld [vmem:[#allocation11 + $0x5b8] sm:$0xff] }
 0x404   :  { %3527 = vmatprep.subr.bf16.mxu0 %v4807_v2 }
 0x405   :  { %3685 = vmatpush1.bf16.msra.mxu1 %v4669_v27  ;;  %v4831_v27 = vpack.c.bf16 %v1231_v49, %v1229_v29  ;;  %v1250_v49 = vld [vmem:[#allocation11 + $0x5b0] sm:$0xff] }
 0x406   :  { %3687 = vmatprep.subr.bf16.mxu1 %v4672_v35  ;;  %v1228_v35 = vld [vmem:[#allocation11 + $0x500] sm:$0xff] }
 0x407   :  { %3529 = vmatpush1.bf16.msra.mxu0 %v4811_v5  ;;  %v4835_v34 = vpack.c.bf16 %v1230_v22, %v1228_v35  ;;  %v1253_v35 = vld [vmem:[#allocation11 + $0x5c8] sm:$0xff]  ;;  %v1255_v22 = vld [vmem:[#allocation11 + $0x5d8] sm:$0xff] }
 0x408   :  { %3531 = vmatprep.subr.bf16.mxu0 %v4815_v36 }
 0x409   :  { %3689 = vmatpush1.bf16.msra.mxu1 %v4675_v40  ;;  %v4839_v40 = vpack.c.bf16 %v1235_v0, %v1233_v8  ;;  %v1254_v0 = vld [vmem:[#allocation11 + $0x5d0] sm:$0xff] }
 0x40a   :  { %3691 = vmatprep.subr.bf16.mxu1 %v4678_v26  ;;  %v1232_v26 = vld [vmem:[#allocation11 + $0x520] sm:$0xff] }
 0x40b   :  { %3533 = vmatpush1.bf16.msra.mxu0 %v4819_v25  ;;  %v4843_v38 = vpack.c.bf16 %v1234_v14, %v1232_v26  ;;  %v1257_v26 = vld [vmem:[#allocation11 + $0x5e8] sm:$0xff]  ;;  %v1259_v14 = vld [vmem:[#allocation11 + $0x5f8] sm:$0xff] }
 0x40c   :  { %3535 = vmatprep.subr.bf16.mxu0 %v4823_v52 }
 0x40d   :  { %3693 = vmatpush1.bf16.msra.mxu1 %v4681_v13  ;;  %v4847_v13 = vpack.c.bf16 %v1239_v10, %v1237_v56  ;;  %v1256_v10 = vld [vmem:[#allocation11 + $0x5e0] sm:$0xff] }
 0x40e   :  { %3695 = vmatprep.subr.bf16.mxu1 %v4684_v21  ;;  %v1236_v21 = vld [vmem:[#allocation11 + $0x540] sm:$0xff] }
 0x40f   :  { %3537 = vmatpush1.bf16.msra.mxu0 %v4827_v58  ;;  %v4851_v57 = vpack.c.bf16 %v1238_v47, %v1236_v21  ;;  %v1258_v21 = vld [vmem:[#allocation11 + $0x5f0] sm:$0xff]  ;;  %v1261_v47 = vld [vmem:[#allocation11 + $0x608] sm:$0xff] }
 0x410   :  { %3539 = vmatprep.subr.bf16.mxu0 %v4831_v27 }
 0x411   :  { %3697 = vmatpush1.bf16.msra.mxu1 %v4687_v60  ;;  %v4855_v60 = vpack.c.bf16 %v1243_v24, %v1241_v63  ;;  %v4888_v63 = vpack.c.bf16 %v1258_v21, %v1256_v10  ;;  %v1264_v21 = vld [vmem:[#allocation11 + $0x620] sm:$0xff] }
 0x412   :  { %3699 = vmatprep.subr.bf16.mxu1 %v4690_v9  ;;  %v1240_v9 = vld [vmem:[#allocation11 + $0x560] sm:$0xff] }
 0x413   :  { %3541 = vmatpush1.bf16.msra.mxu0 %v4835_v34  ;;  %v4859_v33 = vpack.c.bf16 %v1242_v28, %v1240_v9 }
 0x414   :  { %3543 = vmatprep.subr.bf16.mxu0 %v4839_v40 }
 0x415   :  { %3701 = vmatpush1.bf16.msra.mxu1 %v4693_v11  ;;  %v4863_v11 = vpack.c.bf16 %v1247_v44, %v1245_v42 }
 0x416   :  { %3703 = vmatprep.subr.bf16.mxu1 %v4696_v3  ;;  %v1244_v3 = vld [vmem:[#allocation11 + $0x580] sm:$0xff] }
 0x417   :  { %3545 = vmatpush1.bf16.msra.mxu0 %v4843_v38  ;;  %v4867_v29 = vpack.c.bf16 %v1246_v30, %v1244_v3  ;;  %v5372_v30 = vunpack.i.h.bf16 %v4718_v15 }
 0x418   :  { %3547 = vmatprep.subr.bf16.mxu0 %v4847_v13 }
 0x419   :  { %3705 = vmatpush1.bf16.msra.mxu1 %v4699_v45  ;;  %v4871_v45 = vpack.c.bf16 %v1251_v12, %v1249_v4  ;;  %v1260_v12 = vld [vmem:[#allocation11 + $0x600] sm:$0xff] }
 0x41a   :  { %3707 = vmatprep.subr.bf16.mxu1 %v4702_v20  ;;  %v1248_v20 = vld [vmem:[#allocation11 + $0x5a0] sm:$0xff] }
 0x41b   :  { %3549 = vmatpush1.bf16.msra.mxu0 %v4851_v57  ;;  %v4875_v8 = vpack.c.bf16 %v1250_v49, %v1248_v20  ;;  %v1262_v20 = vld [vmem:[#allocation11 + $0x610] sm:$0xff] }
 0x41c   :  { %3551 = vmatprep.subr.bf16.mxu0 %v4855_v60 }
 0x41d   :  { %3709 = vmatpush1.bf16.msra.mxu1 %v4705_v17  ;;  %v4879_v17 = vpack.c.bf16 %v1255_v22, %v1253_v35  ;;  %v1265_v35 = vld [vmem:[#allocation11 + $0x628] sm:$0xff]  ;;  %v1267_v22 = vld [vmem:[#allocation11 + $0x638] sm:$0xff] }
 0x41e   :  { %3711 = vmatprep.subr.bf16.mxu1 %v4708_v41  ;;  %v1252_v41 = vld [vmem:[#allocation11 + $0x5c0] sm:$0xff]  ;;  %v4920_v10 = vpack.c.bf16 %v1267_v22, %v1265_v35 }
 0x41f   :  { %3553 = vmatpush1.bf16.msra.mxu0 %v4859_v33  ;;  %v4882_v56 = vpack.c.bf16 %v1254_v0, %v1252_v41 }
 0x420   :  { %3555 = vmatprep.subr.bf16.mxu0 %v4863_v11 }
 0x421   :  { %3713 = vmatpush1.bf16.msra.mxu1 %v4711_v61  ;;  %v4885_v61 = vpack.c.bf16 %v1259_v14, %v1257_v26  ;;  %v4917_v14 = vpack.c.bf16 %v1262_v20, %v1260_v12  ;;  %v1272_v20 = vld [vmem:[#allocation11 + $0x660] sm:$0xff] }
 0x422   :  { %3715 = vmatprep.subr.bf16.mxu1 %v4714_v23  ;;  %v1263_v23 = vld [vmem:[#allocation11 + $0x618] sm:$0xff] }
 0x423   :  { %3557 = vmatpush1.bf16.msra.mxu0 %v4867_v29  ;;  %v4891_v24 = vpack.c.bf16 %v1263_v23, %v1261_v47  ;;  %v1269_v23 = vld [vmem:[#allocation11 + $0x648] sm:$0xff] }
 0x424   :  { %3559 = vmatprep.subr.bf16.mxu0 %v4871_v45 }
 0x427   :  { %3561 = vmatpush1.bf16.msra.mxu0 %v4875_v8 }
 0x428   :  { %3563 = vmatprep.subr.bf16.mxu0 %v4879_v17 }
 0x42b   :  { %3565 = vmatpush1.bf16.msra.mxu0 %v4882_v56 }
 0x42c   :  { %3567 = vmatprep.subr.bf16.mxu0 %v4885_v61 }
 0x42f   :  { %3569 = vmatpush1.bf16.msra.mxu0 %v4888_v63 }
 0x430   :  { %3571 = vmatprep.subr.bf16.mxu0 %v4891_v24 }
 0x45c   :  { %v4901_v44 = vpop.permute.xlu1 %1045 }
 0x45d   :  { %v4897_v9 = vpop.permute.xlu0 %3923 }
 0x45e   :  { %v3926_v28 = vunpack.i.h.bf16 %v4897_v9  ;;  %v3925_v42 = vunpack.i.l.bf16 %v4897_v9 }
 0x460   :  { %v1892_v3 = vsel %vm1888_vm8, %v3925_v42, %v3926_v28  ;;  %v1891_v4 = vsel %vm1888_vm8, %v5372_v30, %v3925_v42  ;;  %v1271_v42 = vld [vmem:[#allocation11 + $0x658] sm:$0xff]  ;;  %v1273_v30 = vld [vmem:[#allocation11 + $0x668] sm:$0xff] }
 0x461   :  { %v1044_v49 = vpop.permute.xlu0 %1043  ;;  %2038 = vmatprep.mubr.f32.mxu1 %v1892_v3  ;;  %v4922_v47 = vpop.permute.xlu1 %1886  ;;  %v1270_v3 = vld [vmem:[#allocation11 + $0x650] sm:$0xff] }
 0x462   :  { %v1052_v41 = vsel %vm1047_vm7, %v3921_v6, %v1044_v49  ;;  %v1053_v0 = vsel %vm1047_vm7, %v1044_v49, %v4901_v44  ;;  %2039 = vmatmul.mubr.f32.vlgmr.msra.gmra.mrb[8].mxu1 %v1891_v4  ;;  %v1275_v4 = vld [vmem:[#allocation11 + $0x678] sm:$0xff]  ;;  %v1274_v49 = vld [vmem:[#allocation11 + $0x670] sm:$0xff] }
 0x463   :  { %v1065_v26 = vmax.f32 %v4612_v1, %v1052_v41  ;;  %v1066_v15 = vmax.f32 %v4753_v7, %v1053_v0  ;;  %3717 = vmatpush1.bf16.msra.mxu1 %v4761_v46  ;;  %v3576_v7 = vpack.c.bf16 %v1266_v62, %v1264_v21  ;;  %v3578_v46 = vpack.c.bf16 %v1271_v42, %v1269_v23 }
 0x464   :  { %3719 = vmatprep.subr.bf16.mxu1 %v4771_v32  ;;  %v1268_v32 = vld [vmem:[#allocation11 + $0x640] sm:$0xff]  ;;  %v3584_v35 = vpack.c.bf16 %v1274_v49, %v1272_v20 }
 0x465   :  { %v4924_v6 = vpop.permute.xlu0 %1884  ;;  %1488 = vmatprep.mubr.f32.mxu0 %v1066_v15  ;;  %v3580_v12 = vpack.c.bf16 %v1270_v3, %v1268_v32 }
 0x466   :  { %1489 = vmatmul.mubr.f32.vlgmr.msra.gmra.mrb[8].mxu0 %v1065_v26  ;;  %v1894_v1 = vsel %vm1888_vm8, %v4924_v6, %v4922_v47 }
 0x467   :  { %3573 = vmatpush1.bf16.msra.mxu0 %v4917_v14  ;;  %3721 = vmatpush1.bf16.msra.mxu1 %v4776_v19  ;;  %v3582_v19 = vpack.c.bf16 %v1275_v4, %v1273_v30 }
 0x468   :  { %2109 = vmatprep.mubr.f32.mxu1 %v1894_v1  ;;  %3575 = vmatprep.subr.bf16.mxu0 %v4920_v10 }
 0x469   :  { %3723 = vmatprep.subr.bf16.mxu1 %v4781_v48  ;;  %1559 = vmatprep.mubr.f32.mxu0 %v5371_v43  ;;  %v1277_v48 = vld [vmem:[#allocation11 + $0x688] sm:$0xff] }
 0x46b   :  { %3577 = vmatpush1.bf16.msra.mxu0 %v3576_v7  ;;  %3725 = vmatpush1.bf16.msra.mxu1 %v4785_v37  ;;  %v1276_v37 = vld [vmem:[#allocation11 + $0x680] sm:$0xff] }
 0x46c   :  { %3579 = vmatprep.subr.bf16.mxu0 %v3578_v46  ;;  %3727 = vmatprep.subr.bf16.mxu1 %v4789_v59  ;;  %v1067_v59 = vmax.f32 %v4736_v39, %v4901_v44  ;;  %v1893_v39 = vsel %vm1888_vm8, %v3926_v28, %v4924_v6 }
 0x46f   :  { %3581 = vmatpush1.bf16.msra.mxu0 %v3580_v12  ;;  %3729 = vmatpush1.bf16.msra.mxu1 %v4795_v16 }
 0x470   :  { %3583 = vmatprep.subr.bf16.mxu0 %v3582_v19  ;;  %3731 = vmatprep.subr.bf16.mxu1 %v4799_v31 }
 0x473   :  { %3585 = vmatpush1.bf16.msra.mxu0 %v3584_v35  ;;  %3733 = vmatpush1.bf16.msra.mxu1 %v4803_v18 }
 0x474   :  { %1511 = vmatprep.subr.mxu0 %v1277_v48  ;;  %3735 = vmatprep.subr.bf16.mxu1 %v4807_v2 }
 0x477   :  { %1512 = vmatpush1.msra.mxu0 %v1276_v37  ;;  %3737 = vmatpush1.bf16.msra.mxu1 %v4811_v5 }
 0x478   :  { %3306 = vmatmul.mubr.msk.f32.vlgmr.msra.gmra.mrb[8].mxu0 %vm1278_vm9, %v1067_v59  ;;  %3739 = vmatprep.subr.bf16.mxu1 %v4815_v36 }
 0x479   :  { %2568 = vmatprep.mubr.f32.mxu0 %v5371_v43 }
 0x47b   :  { %3741 = vmatpush1.bf16.msra.mxu1 %v4819_v25 }
 0x47c   :  { %3743 = vmatprep.subr.bf16.mxu1 %v4823_v52 }
 0x47f   :  { %3745 = vmatpush1.bf16.msra.mxu1 %v4827_v58  ;;  %v5012_v58 = vpop.permute.xlu1 %2379 }
 0x480   :  { %3747 = vmatprep.subr.bf16.mxu1 %v4831_v27  ;;  %v5014_v27 = vpop.permute.xlu0 %2347 }
 0x483   :  { %3749 = vmatpush1.bf16.msra.mxu1 %v4835_v34 }
 0x484   :  { %3751 = vmatprep.subr.bf16.mxu1 %v4839_v40 }
 0x487   :  { %3753 = vmatpush1.bf16.msra.mxu1 %v4843_v38 }
 0x488   :  { %3755 = vmatprep.subr.bf16.mxu1 %v4847_v13 }
 0x48b   :  { %3757 = vmatpush1.bf16.msra.mxu1 %v4851_v57 }
 0x48c   :  { %3759 = vmatprep.subr.bf16.mxu1 %v4855_v60 }
 0x48f   :  { %3761 = vmatpush1.bf16.msra.mxu1 %v4859_v33 }
 0x490   :  { %3763 = vmatprep.subr.bf16.mxu1 %v4863_v11 }
 0x493   :  { %3765 = vmatpush1.bf16.msra.mxu1 %v4867_v29 }
 0x494   :  { %3767 = vmatprep.subr.bf16.mxu1 %v4871_v45 }
 0x497   :  { %3769 = vmatpush1.bf16.msra.mxu1 %v4875_v8 }
 0x498   :  { %3771 = vmatprep.subr.bf16.mxu1 %v4879_v17 }
 0x49b   :  { %3773 = vmatpush1.bf16.msra.mxu1 %v4882_v56 }
 0x49c   :  { %3775 = vmatprep.subr.bf16.mxu1 %v4885_v61 }
 0x49f   :  { %3777 = vmatpush1.bf16.msra.mxu1 %v4888_v63 }
 0x4a0   :  { %3779 = vmatprep.subr.bf16.mxu1 %v4891_v24 }
 0x4a2   :  { %2110 = vmatmul.mubr.f32.vlgmr.msra.gmra.mrb[8].mxu1 %v1893_v39 }
 0x4a3   :  { %3781 = vmatpush1.bf16.msra.mxu1 %v4917_v14  ;;  %2180 = vmatprep.mubr.f32.mxu1 %v5371_v43 }
 0x4a4   :  { %3783 = vmatprep.subr.bf16.mxu1 %v4920_v10 }
 0x4a7   :  { %3785 = vmatpush1.bf16.msra.mxu1 %v3576_v7 }
 0x4a8   :  { %3787 = vmatprep.subr.bf16.mxu1 %v3578_v46 }
 0x4ab   :  { %3789 = vmatpush1.bf16.msra.mxu1 %v3580_v12 }
 0x4ac   :  { %3791 = vmatprep.subr.bf16.mxu1 %v3582_v19 }
 0x4af   :  { %3793 = vmatpush1.bf16.msra.mxu1 %v3584_v35 }
 0x4b0   :  { %2132 = vmatprep.subr.mxu1 %v1277_v48 }
 0x4b3   :  { %2133 = vmatpush1.msra.mxu1 %v1276_v37 }
 0x4b4   :  { %3307 = vmatmul.mubr.msk.f32.vlgmr.msra.gmra.mrb[8].mxu1 %vm1278_vm9, %v4922_v47 }
 0x4b5   :  { %2645 = vmatprep.mubr.f32.mxu1 %v5371_v43 }
 0x54b   :  { %v4976_v16 = vpop.f32.mrb[8].mxu0 }
 0x54c   :  { %v4978_v31 = vpop.f32.mrb[9].mxu0 }
 0x54d   :  { %v3932_v18 = vpack.i.bf16 %v4978_v31, %v4976_v16 }
 0x54f   :  { %3933 = vrot.lane.b32.xlu1 %v3932_v18, %s4139_s12  ;;  %3928 = vrot.lane.b32.xlu0 %v3932_v18, %s4151_s0 }
 0x553   :  { %3943 = vrot.lane.b32.xlu1 %v3932_v18, %s4152_s24  ;;  %3938 = vrot.lane.b32.xlu0 %v3932_v18, %s4153_s25 }
 0x587   :  { %v4983_v2 = vpop.f32.mrb[8].mxu1 }
 0x588   :  { %v4985_v5 = vpop.f32.mrb[9].mxu1  ;;  %v3952_v36 = vpack.i.bf16 %v4983_v2, %v5371_v43  ;;  %v3972_v25 = vpack.i.bf16 %v4983_v2, %v4978_v31 }
 0x589   :  { %v3982_v52 = vpack.i.bf16 %v4985_v5, %v4976_v16 }
 0x58a   :  { %3953 = vrot.lane.b32.xlu1 %v3952_v36, %s4139_s12  ;;  %3948 = vrot.lane.b32.xlu0 %v3952_v36, %s4151_s0 }
 0x58e   :  { %3963 = vrot.lane.b32.xlu1 %v3952_v36, %s4152_s24  ;;  %3958 = vrot.lane.b32.xlu0 %v3952_v36, %s4153_s25 }
 0x592   :  { %3973 = vrot.lane.b32.xlu1 %v3972_v25, %s4150_s23  ;;  %3968 = vrot.lane.b32.xlu0 %v3972_v25, %s4147_s20 }
 0x596   :  { %2240 = vrot.lane.b32.xlu1 %v4985_v5, %s4139_s12  ;;  %3978 = vrot.lane.b32.xlu0 %v3972_v25, %s4154_s26 }
 0x59a   :  { %2439 = vrot.lane.b32.xlu1 %v4978_v31, %s4155_s27  ;;  %2207 = vrot.lane.b32.xlu0 %v4985_v5, %s4151_s0 }
 0x59e   :  { %2306 = vrot.lane.b32.xlu1 %v4985_v5, %s4152_s24  ;;  %2273 = vrot.lane.b32.xlu0 %v4985_v5, %s4153_s25 }
 0x5a2   :  { %3983 = vrot.lane.b32.xlu1 %v3982_v52, %s4147_s20  ;;  %2412 = vrot.lane.b32.xlu0 %v5371_v43, %s4154_s26 }
 0x5a6   :  { %3988 = vrot.lane.b32.xlu1 %v3982_v52, %s4150_s23  ;;  %3993 = vrot.lane.b32.xlu0 %v3982_v52, %s4154_s26 }
 0x5aa   :  { %2437 = vrot.lane.b32.xlu1 %v4976_v16, %s4155_s27  ;;  %2441 = vrot.lane.b32.xlu0 %v4983_v2, %s4155_s27 }
 0x5ae   :  { %2445 = vrot.lane.b32.xlu1 %v5371_v43, %s4155_s27  ;;  %2443 = vrot.lane.b32.xlu0 %v4985_v5, %s4155_s27 }
 0x5c1   :  { %v3934_v34 = vpop.permute.xlu1 %3933  ;;  %v3929_v40 = vpop.permute.xlu0 %3928 }
 0x5c2   :  { %v3936_v38 = vunpack.i.h.bf16 %v3934_v34  ;;  %v3935_v13 = vunpack.i.l.bf16 %v3934_v34  ;;  %v3931_v57 = vunpack.i.h.bf16 %v3929_v40  ;;  %v3930_v60 = vunpack.i.l.bf16 %v3929_v40 }
 0x5c4   :  { %v2211_v33 = vsel %vm2209_vm10, %v3930_v60, %v3931_v57  ;;  %v2244_v11 = vsel %vm2242_vm11, %v3935_v13, %v3936_v38 }
 0x5c5   :  { %v3794_v29 = vpack.c.bf16 %v2244_v11, %v2211_v33  ;;  %v3944_v45 = vpop.permute.xlu1 %3943  ;;  %v3939_v8 = vpop.permute.xlu0 %3938 }
 0x5c6   :  { %v3946_v17 = vunpack.i.h.bf16 %v3944_v45  ;;  %v3945_v56 = vunpack.i.l.bf16 %v3944_v45  ;;  %v3941_v61 = vunpack.i.h.bf16 %v3939_v8  ;;  %v3940_v63 = vunpack.i.l.bf16 %v3939_v8 }
 0x5c7   :  { %3795 = vmatprep.subr.bf16.mxu0 %v3794_v29 }
 0x5c8   :  { %v2277_v0 = vsel %vm2275_vm13, %v3940_v63, %v3941_v61  ;;  %v2310_v26 = vsel %vm2308_vm12, %v3945_v56, %v3946_v17 }
 0x5c9   :  { %v3798_v7 = vpack.c.bf16 %v2310_v26, %v2277_v0 }
 0x5fc   :  { %v3954_v24 = vpop.permute.xlu1 %3953  ;;  %v3949_v9 = vpop.permute.xlu0 %3948 }
 0x5fd   :  { %v3956_v28 = vunpack.i.h.bf16 %v3954_v24  ;;  %v3955_v44 = vunpack.i.l.bf16 %v3954_v24  ;;  %v3951_v22 = vunpack.i.h.bf16 %v3949_v9  ;;  %v3950_v41 = vunpack.i.l.bf16 %v3949_v9 }
 0x5ff   :  { %v2243_v15 = vsel %vm2242_vm11, %v3955_v44, %v3935_v13  ;;  %v2245_v14 = vsel %vm2242_vm11, %v3936_v38, %v3956_v28  ;;  %v2210_v10 = vsel %vm2209_vm10, %v3950_v41, %v3930_v60  ;;  %v2212_v21 = vsel %vm2209_vm10, %v3931_v57, %v3951_v22 }
 0x600   :  { %v3796_v62 = vpack.c.bf16 %v2243_v15, %v2210_v10  ;;  %v3812_v47 = vpack.c.bf16 %v2245_v14, %v2212_v21  ;;  %v3964_v6 = vpop.permute.xlu1 %3963  ;;  %v3959_v23 = vpop.permute.xlu0 %3958 }
 0x601   :  { %v3965_v42 = vunpack.i.l.bf16 %v3964_v6  ;;  %v3960_v1 = vunpack.i.l.bf16 %v3959_v23  ;;  %v3966_v37 = vunpack.i.h.bf16 %v3964_v6  ;;  %v3961_v59 = vunpack.i.h.bf16 %v3959_v23 }
 0x602   :  { %3797 = vmatpush1.bf16.msra.mxu0 %v3796_v62 }
 0x603   :  { %v2309_v46 = vsel %vm2308_vm12, %v3965_v42, %v3945_v56  ;;  %v2276_v32 = vsel %vm2275_vm13, %v3960_v1, %v3940_v63  ;;  %3799 = vmatprep.subr.bf16.mxu0 %v3798_v7  ;;  %v2311_v34 = vsel %vm2308_vm12, %v3946_v17, %v3966_v37  ;;  %v2278_v40 = vsel %vm2275_vm13, %v3941_v61, %v3961_v59 }
 0x604   :  { %v3800_v3 = vpack.c.bf16 %v2309_v46, %v2276_v32  ;;  %v3974_v30 = vpop.permute.xlu1 %3973  ;;  %v3969_v4 = vpop.permute.xlu0 %3968  ;;  %v3816_v29 = vpack.c.bf16 %v2311_v34, %v2278_v40 }
 0x605   :  { %v3971_v12 = vunpack.i.h.bf16 %v3969_v4  ;;  %v3970_v19 = vunpack.i.l.bf16 %v3969_v4  ;;  %v3976_v45 = vunpack.i.h.bf16 %v3974_v30  ;;  %v3975_v8 = vunpack.i.l.bf16 %v3974_v30 }
 0x606   :  { %3801 = vmatpush1.bf16.msra.mxu0 %v3800_v3 }
 0x607   :  { %v2350_v20 = vsel %vm1005_vm6, %v3970_v19, %v3971_v12 }
 0x608   :  { %v2241_v49 = vpop.permute.xlu1 %2240  ;;  %v3979_v35 = vpop.permute.xlu0 %3978  ;;  %v3802_v48 = vpack.c.bf16 %v2350_v20, %v4978_v31 }
 0x609   :  { %v2246_v36 = vsel %vm2242_vm11, %v3956_v28, %v2241_v49  ;;  %v3981_v57 = vunpack.i.h.bf16 %v3979_v35  ;;  %v3980_v31 = vunpack.i.l.bf16 %v3979_v35  ;;  %v2461_v35 = vld [vmem:[%s5352_s4 + $0x8] sm:$0xff] }
 0x60a   :  { %3803 = vmatprep.subr.bf16.mxu0 %v3802_v48  ;;  %v2658_v48 = vld [vmem:[%s5353_s5] sm:$0xf] }
 0x60b   :  { %v2416_v24 = vsel %vm2414_vm14, %v3980_v31, %v3981_v57 }
 0x60c   :  { %v5028_v39 = vpop.permute.xlu1 %2439  ;;  %v2208_v18 = vpop.permute.xlu0 %2207 }
 0x60d   :  { %v2213_v25 = vsel %vm2209_vm10, %v3951_v22, %v2208_v18  ;;  %v2383_v22 = vsel %vm2381_vm15, %v3975_v8, %v3976_v45 }
 0x60e   :  { %v3810_v52 = vpack.c.bf16 %v2246_v36, %v2213_v25  ;;  %v3806_v10 = vpack.c.bf16 %v2416_v24, %v2383_v22 }
 0x610   :  { %v2307_v38 = vpop.permute.xlu1 %2306  ;;  %v2274_v13 = vpop.permute.xlu0 %2273  ;;  %3811 = vmatprep.subr.bf16.mxu1 %v3810_v52  ;;  %v2677_v52 = vrot.slane %v2658_v48, %v4343_v55 }
 0x611   :  { %v2312_v60 = vsel %vm2308_vm12, %v3966_v37, %v2307_v38  ;;  %v2279_v33 = vsel %vm2275_vm13, %v3961_v59, %v2274_v13  ;;  %3813 = vmatpush1.bf16.msra.mxu1 %v3812_v47  ;;  %v2665_v37 = vrot.slane %v2658_v48, %v4331_v51  ;;  %v2669_v59 = vrot.slane %v2658_v48, %v4337_v53 }
 0x612   :  { %v3814_v11 = vpack.c.bf16 %v2312_v60, %v2279_v33  ;;  %vm3114_vm12 = vcmp.eq.s32.totalorder %v4328_v50, 1 }
 0x614   :  { %v3984_v56 = vpop.permute.xlu1 %3983  ;;  %v2413_v63 = vpop.permute.xlu0 %2412  ;;  %3815 = vmatprep.subr.bf16.mxu1 %v3814_v11 }
 0x615   :  { %v3986_v17 = vunpack.i.h.bf16 %v3984_v56  ;;  %v3985_v61 = vunpack.i.l.bf16 %v3984_v56  ;;  %3817 = vmatpush1.bf16.msra.mxu1 %v3816_v29 }
 0x617   :  { %v2349_v9 = vsel %vm1005_vm6, %v3985_v61, %v3970_v19  ;;  %v2351_v28 = vsel %vm1005_vm6, %v3971_v12, %v3986_v17  ;;  %v2352_v44 = vsel %vm1005_vm6, %v3986_v17, %v5014_v27  ;;  %v2460_v19 = vld [vmem:[%s5352_s4] sm:$0xff] }
 0x618   :  { %v3804_v41 = vpack.c.bf16 %v2349_v9, %v4976_v16  ;;  %v3820_v0 = vpack.c.bf16 %v2351_v28, %v4983_v2  ;;  %v3989_v26 = vpop.permute.xlu1 %3988  ;;  %v3994_v15 = vpop.permute.xlu0 %3993  ;;  %v3818_v14 = vpack.c.bf16 %v2352_v44, %v4985_v5 }
 0x619   :  { %v3991_v21 = vunpack.i.h.bf16 %v3989_v26  ;;  %v3990_v62 = vunpack.i.l.bf16 %v3989_v26  ;;  %v3996_v47 = vunpack.i.h.bf16 %v3994_v15  ;;  %v3995_v6 = vunpack.i.l.bf16 %v3994_v15 }
 0x61a   :  { %3805 = vmatpush1.bf16.msra.mxu0 %v3804_v41  ;;  %3819 = vmatprep.subr.bf16.mxu1 %v3818_v14 }
 0x61b   :  { %v2382_v27 = vsel %vm2381_vm15, %v3990_v62, %v3975_v8  ;;  %v2384_v23 = vsel %vm2381_vm15, %v3976_v45, %v3991_v21  ;;  %v2415_v16 = vsel %vm2414_vm14, %v3995_v6, %v3980_v31  ;;  %v2417_v2 = vsel %vm2414_vm14, %v3981_v57, %v3996_v47  ;;  %3807 = vmatprep.subr.bf16.mxu0 %v3806_v10 }
 0x61c   :  { %v3808_v42 = vpack.c.bf16 %v2415_v16, %v2382_v27  ;;  %v3824_v1 = vpack.c.bf16 %v2417_v2, %v2384_v23  ;;  %3821 = vmatpush1.bf16.msra.mxu1 %v3820_v0  ;;  %v2438_v5 = vpop.permute.xlu1 %2437  ;;  %v2442_v7 = vpop.permute.xlu0 %2441  ;;  %v2385_v46 = vsel %vm2381_vm15, %v3991_v21, %v5012_v58  ;;  %v2418_v32 = vsel %vm2414_vm14, %v3996_v47, %v2413_v63 }
 0x61d   :  { %v3822_v3 = vpack.c.bf16 %v2418_v32, %v2385_v46  ;;  %v2449_v30 = vsel %vm2447_vm0, %v5028_v39, %v2442_v7  ;;  %v2448_v20 = vsel %vm2447_vm0, %v2438_v5, %v5028_v39  ;;  %v2673_v39 = vrot.slane %v2658_v48, %v4340_v54 }
 0x61e   :  { %3809 = vmatpush1.bf16.msra.mxu0 %v3808_v42 }
 0x61f   :  { %3823 = vmatprep.subr.bf16.mxu1 %v3822_v3  ;;  %2520 = vmatprep.subr.mxu0 %v2449_v30 }
 0x620   :  { %3825 = vmatpush1.bf16.msra.mxu1 %v3824_v1  ;;  %v2446_v4 = vpop.permute.xlu1 %2445  ;;  %v2444_v12 = vpop.permute.xlu0 %2443 }
 0x621   :  { %v2450_v58 = vsel %vm2447_vm0, %v2442_v7, %v2444_v12  ;;  %v2451_v49 = vsel %vm2447_vm0, %v2444_v12, %v2446_v4 }
 0x622   :  { %2521 = vmatpush1.msra.mxu0 %v2448_v20  ;;  %2597 = vmatprep.subr.mxu1 %v2451_v49 }
 0x623   :  { %3308 = vmatmul.mubr.msk.f32.vlgmr.msra.gmra.mrb[10].mxu0 %vm1278_vm9, %v2460_v19 }
 0x624   :  { %2598 = vmatpush1.msra.mxu1 %v2450_v58  ;;  %2574 = vmatprep.mubr.f32.mxu0 %v5371_v43 }
 0x625   :  { %3310 = vmatmul.mubr.msk.f32.vlgmr.msra.gmra.mrb[10].mxu1 %vm1278_vm9, %v2460_v19 }
 0x626   :  { %2651 = vmatprep.mubr.f32.mxu1 %v5371_v43 }
 0x627   :  { %3309 = vmatmul.mubr.msk.f32.gmra.mrb[12].mxu0 %vm1278_vm9, %v2461_v35 }
 0x629   :  { %3311 = vmatmul.mubr.msk.f32.gmra.mrb[12].mxu1 %vm1278_vm9, %v2461_v35 }
 0x6f6   :  { %v5076_v18 = vpop.f32.mrb[10].mxu0 }
 0x6f7   :  { %v2682_v36 = vmul.f32 %v2665_v37, %v5076_v18  ;;  %v5079_v25 = vpop.f32.mrb[11].mxu0 }
 0x6f8   :  { %v2683_v34 = vmul.f32 %v2669_v59, %v5079_v25  ;;  %v5083_v40 = vpop.f32.mrb[10].mxu1 }
 0x6f9   :  { %v2702_v38 = vmul.f32 %v2682_v36, %v2682_v36  ;;  %v2684_v13 = vmul.f32 %v2673_v39, %v5083_v40  ;;  %v5086_v57 = vpop.f32.mrb[11].mxu1 }
 0x6fa   :  { %v2690_v53 = vadd.f32 %v2683_v34, %v2682_v36  ;;  %v2703_v31 = vmul.f32 %v2683_v34, %v2683_v34  ;;  %v5088_v54 = vpop.f32.mrb[12].mxu0  ;;  %v2685_v33 = vmul.f32 %v2677_v52, %v5086_v57  ;;  %v2660_v36 = vld [vmem:[%s5354_s6 + $0x10] sm:$0xff]  ;;  %v5373_v34 = vmov 1  }
 0x6fb   :  { %v2704_v60 = vmul.f32 %v2684_v13, %v2684_v13  ;;  %v2686_v11 = vmul.f32 %v2665_v37, %v5088_v54  ;;  %v5092_v29 = vpop.f32.mrb[13].mxu0 }
 0x6fc   :  { %v2687_v55 = vmul.f32 %v2669_v59, %v5092_v29  ;;  %v5095_v45 = vpop.f32.mrb[12].mxu1  ;;  %v2691_v8 = vadd.f32 %v2690_v53, %v2684_v13  ;;  %v2710_v56 = vadd.f32 %v2703_v31, %v2702_v38  ;;  %v2705_v41 = vmul.f32 %v2685_v33, %v2685_v33  ;;  %v2659_v59 = vld [vmem:[%s5354_s6 + $0x8] sm:$0xff] }
 0x6fd   :  { %v2706_v63 = vmul.f32 %v2686_v11, %v2686_v11  ;;  %v2688_v17 = vmul.f32 %v2673_v39, %v5095_v45  ;;  %v5098_v61 = vpop.f32.mrb[13].mxu1 }
 0x6fe   :  { %v2695_v24 = vadd.f32 %v2687_v55, %v2686_v11  ;;  %v2707_v9 = vmul.f32 %v2687_v55, %v2687_v55  ;;  %v2689_v28 = vmul.f32 %v2677_v52, %v5098_v61  ;;  %v2692_v44 = vadd.f32 %v2691_v8, %v2685_v33 }
 0x6ff   :  { %v2708_v22 = vmul.f32 %v2688_v17, %v2688_v17  ;;  %v2711_v0 = vadd.f32 %v2710_v56, %v2704_v60 }
 0x700   :  { %v2715_v26 = vadd.f32 %v2707_v9, %v2706_v63  ;;  %v2709_v15 = vmul.f32 %v2689_v28, %v2689_v28  ;;  %2693 = vadd.xlane.f32.xlu0 %v2692_v44  ;;  %v2696_v14 = vadd.f32 %v2695_v24, %v2688_v17 }
 0x701   :  { %v2712_v10 = vadd.f32 %v2711_v0, %v2705_v41 }
 0x702   :  { %v2697_v21 = vadd.f32 %v2696_v14, %v2689_v28  ;;  %v2716_v62 = vadd.f32 %v2715_v26, %v2708_v22 }
 0x704   :  { %2713 = vadd.xlane.f32.xlu0 %v2712_v10  ;;  %2698 = vadd.xlane.f32.xlu1 %v2697_v21  ;;  %v2717_v47 = vadd.f32 %v2716_v62, %v2709_v15 }
 0x708   :  { %2718 = vadd.xlane.f32.xlu0 %v2717_v47 }
 0x78d   :  { %v2694_v6 = vpop.xlane.xlu0 %2693 }
 0x78e   :  { %v2700_v27 = vmul.f32 0.0025510204, %v2694_v6 }
 0x790   :  { %v2732_v23 = vsub.f32 %v5076_v18, %v2700_v27  ;;  %v2733_v16 = vsub.f32 %v5079_v25, %v2700_v27  ;;  %v2734_v2 = vsub.f32 %v5083_v40, %v2700_v27  ;;  %v2735_v5 = vsub.f32 %v5086_v57, %v2700_v27 }
 0x791   :  { %v2714_v42 = vpop.xlane.xlu0 %2713  ;;  %v2699_v1 = vpop.xlane.xlu1 %2698  ;;  %v2722_v7 = vmul.f32 %v2700_v27, %v2700_v27 }
 0x792   :  { %v2720_v46 = vmul.f32 0.0025510204, %v2714_v42  ;;  %v5105_v32 = vmul.f32 0.0025510204, %v2699_v1 }
 0x794   :  { %v2724_v3 = vsub.f32 %v2720_v46, %v2722_v7  ;;  %v2723_v30 = vmul.f32 %v5105_v32, %v5105_v32  ;;  %v2736_v4 = vsub.f32 %v5088_v54, %v5105_v32  ;;  %v2737_v12 = vsub.f32 %v5092_v29, %v5105_v32 }
 0x795   :  { %v2719_v19 = vpop.xlane.xlu0 %2718  ;;  %v2738_v20 = vsub.f32 %v5095_v45, %v5105_v32  ;;  %v2739_v58 = vsub.f32 %v5098_v61, %v5105_v32 }
 0x796   :  { %v2726_v49 = vadd.f32 1e-05, %v2724_v3  ;;  %v2721_v35 = vmul.f32 0.0025510204, %v2719_v19 }
 0x798   :  { %4011 = vrsqrt.f32 %v2726_v49  ;;  %v2725_v48 = vsub.f32 %v2721_v35, %v2723_v30  ;;  %v5161_v49 = vld [vmem:[#allocation12] sm:$0xff] }
 0x79a   :  { %v2727_v37 = vadd.f32 1e-05, %v2725_v48 }
 0x79c   :  { %4013 = vrsqrt.f32 %v2727_v37  ;;  %v5167_v37 = vld [vmem:[#allocation12 + $0x20] sm:$0xff] }
 0x7a2   :  { %v4012_v39 = vpop.eup %4011 }
 0x7a3   :  { %v2730_v18 = vmul.f32 %v4012_v39, %v2659_v59 }
 0x7a5   :  { %2742 = vperm.xlu1 %3997, %v2730_v18  }
 0x7a6   :  { %v4014_v25 = vpop.eup %4013 }
 0x7a7   :  { %v2731_v52 = vmul.f32 %v4014_v25, %v2660_v36 }
 0x7a9   :  { %3999 = vset.pattern.permute.xlu1 %v5373_v34  ;;  %2747 = vperm.xlu0 %3998, %v2731_v52  }
 0x7aa   :  { %2760 = vperm.xlu1 %3999, %v2659_v59  }
 0x7ae   :  { %2765 = vperm.xlu1 %3999, %v2660_v36   ;;  %v2968_v36 = vld [vmem:[#allocation12 + $0x68] sm:$0xff] }
 0x824   :  { %v2743_v40 = vpop.permute.xlu1 %2742 }
 0x825   :  { %v2750_v38 = vmul.f32 %v2743_v40, %v2732_v23  ;;  %v2751_v57 = vmul.f32 %v2743_v40, %v2733_v16  ;;  %v2752_v60 = vmul.f32 %v2743_v40, %v2734_v2  ;;  %v2753_v29 = vmul.f32 %v2743_v40, %v2735_v5 }
 0x828   :  { %v2748_v55 = vpop.permute.xlu0 %2747 }
 0x829   :  { %v2761_v13 = vpop.permute.xlu1 %2760  ;;  %v2754_v63 = vmul.f32 %v2748_v55, %v2736_v4  ;;  %v2755_v24 = vmul.f32 %v2748_v55, %v2737_v12  ;;  %v2756_v44 = vmul.f32 %v2748_v55, %v2738_v20  ;;  %v2757_v27 = vmul.f32 %v2748_v55, %v2739_v58  ;;  %v5154_v4 = vld [vmem:[#allocation12 + $0x8] sm:$0xff]  ;;  %v5184_v55 = vld [vmem:[#allocation12 + $0x58] sm:$0xff] }
 0x82a   :  { %v2768_v53 = vadd.f32 %v2761_v13, %v2750_v38  ;;  %v2769_v54 = vadd.f32 %v2761_v13, %v2751_v57  ;;  %v2770_v11 = vadd.f32 %v2761_v13, %v2752_v60  ;;  %v2771_v8 = vadd.f32 %v2761_v13, %v2753_v29  ;;  %v5158_v20 = vld [vmem:[#allocation12 + $0x28] sm:$0xff]  ;;  %v2967_v38 = vld [vmem:[#allocation12 + $0x60] sm:$0xff] }
 0x82c   :  { %v2776_v31 = vmax.f32 %v2768_v53, 0.0  ;;  %v2777_v33 = vmax.f32 %v2769_v54, 0.0  ;;  %v2778_v45 = vmax.f32 %v2770_v11, 0.0  ;;  %v2779_v17 = vmax.f32 %v2771_v8, 0.0  ;;  %v5187_v8 = vld [vmem:[#allocation12 + $0x30] sm:$0xff] }
 0x82d   :  { %v2766_v56 = vpop.permute.xlu1 %2765 }
 0x82e   :  { %2804 = vrot.lane.b32.xlu1 %v2776_v31, %s4147_s20  ;;  %v2772_v61 = vadd.f32 %v2766_v56, %v2754_v63  ;;  %v2773_v28 = vadd.f32 %v2766_v56, %v2755_v24  ;;  %v5129_v41 = vadd.f32 %v2766_v56, %v2756_v44  ;;  %v5141_v5 = vadd.f32 %v2766_v56, %v2757_v27 }
 0x830   :  { %v2780_v9 = vmax.f32 %v2772_v61, 0.0  ;;  %v2781_v22 = vmax.f32 %v2773_v28, 0.0  ;;  %v2782_v0 = vmax.f32 %v5129_v41, 0.0  ;;  %v2783_v46 = vmax.f32 %v5141_v5, 0.0  ;;  %v5191_v61 = vld [vmem:[#allocation12 + $0x50] sm:$0xff]  ;;  %v5213_v41 = vld [vmem:[#allocation12 + $0x98] sm:$0xff] }
 0x832   :  { %2806 = vrot.lane.b32.xlu1 %v2777_v33, %s4147_s20 }
 0x836   :  { %3054 = vrot.lane.b32.xlu1 %v2778_v45, %s4147_s20 }
 0x83a   :  { %3056 = vrot.lane.b32.xlu1 %v2779_v17, %s4147_s20 }
 0x83e   :  { %2808 = vrot.lane.b32.xlu1 %v2780_v9, %s4147_s20 }
 0x842   :  { %2810 = vrot.lane.b32.xlu1 %v2781_v22, %s4147_s20 }
 0x846   :  { %3058 = vrot.lane.b32.xlu1 %v2782_v0, %s4147_s20 }
 0x8a0   :  { %v2805_v26 = vpop.permute.xlu1 %2804 }
 0x8a4   :  { %v2807_v15 = vpop.permute.xlu1 %2806 }
 0x8a5   :  { %v2812_v14 = vsel %vm1005_vm6, %v2805_v26, %v2807_v15  ;;  %v2819_v10 = vmax.f32 %v2777_v33, %v2807_v15  ;;  %v5180_v33 = vld [vmem:[#allocation12 + $0x38] sm:$0xff] }
 0x8a6   :  { %v2818_v21 = vmax.f32 %v2776_v31, %v2812_v14 }
 0x8a7   :  { %2828 = vrot.lane.b32.xlu0 %v2819_v10, %s4154_s26 }
 0x8a8   :  { %2826 = vrot.lane.b32.xlu1 %v2818_v21, %s4154_s26  ;;  %v3055_v62 = vpop.permute.xlu1 %3054 }
 0x8ac   :  { %v3057_v47 = vpop.permute.xlu1 %3056 }
 0x8ad   :  { %v3062_v42 = vsel %vm1005_vm6, %v3055_v62, %v3057_v47  ;;  %v3069_v32 = vmax.f32 %v2779_v17, %v3057_v47  ;;  %v5206_v47 = vld [vmem:[#allocation12 + $0x70] sm:$0xff] }
 0x8ae   :  { %v5145_v7 = vmax.f32 %v2778_v45, %v3062_v42 }
 0x8b0   :  { %v2809_v6 = vpop.permute.xlu1 %2808 }
 0x8b4   :  { %v2811_v23 = vpop.permute.xlu1 %2810 }
 0x8b5   :  { %v2813_v16 = vsel %vm1005_vm6, %v2809_v6, %v2811_v23  ;;  %v2821_v2 = vmax.f32 %v2781_v22, %v2811_v23  ;;  %v5197_v22 = vld [vmem:[#allocation12 + $0x78] sm:$0xff] }
 0x8b6   :  { %v2820_v1 = vmax.f32 %v2780_v9, %v2813_v16 }
 0x8b7   :  { %2832 = vrot.lane.b32.xlu0 %v2821_v2, %s4154_s26 }
 0x8b8   :  { %2830 = vrot.lane.b32.xlu1 %v2820_v1, %s4154_s26  ;;  %v3059_v3 = vpop.permute.xlu1 %3058 }
 0x8bb   :  { %3076 = vrot.lane.b32.xlu0 %v5145_v7, %s4154_s26 }
 0x8bc   :  { %3060 = vrot.lane.b32.xlu1 %v2783_v46, %s4147_s20 }
 0x8bf   :  { %3078 = vrot.lane.b32.xlu0 %v3069_v32, %s4154_s26 }
 0x919   :  { %v2829_v30 = vpop.permute.xlu0 %2828 }
 0x91a   :  { %v5156_v12 = vmax.f32 %v2819_v10, %v2829_v30  ;;  %v2827_v19 = vpop.permute.xlu1 %2826 }
 0x91b   :  { %v2834_v58 = vsel %vm2414_vm14, %v2827_v19, %v2829_v30  ;;  %v5222_v30 = vld [vmem:[#allocation12 + $0x90] sm:$0xff] }
 0x91c   :  { %v5163_v35 = vmax.f32 %v2818_v21, %v2834_v58  ;;  %v2849_v48 = vmul.f32 %v5154_v4, %v5156_v12  ;;  %v2892_v59 = vmul.f32 %v5158_v20, %v5156_v12  ;;  %v2972_v13 = vmul.f32 %v2968_v36, %v5156_v12 }
 0x91e   :  { %v2848_v39 = vmul.f32 %v5161_v49, %v5163_v35  ;;  %v2853_v18 = vsel %vm2852_vm1, %v2849_v48, 0.0  ;;  %v2891_v52 = vmul.f32 %v5167_v37, %v5163_v35  ;;  %v2895_v40 = vsel %vm2852_vm1, %v2892_v59, 0.0 }
 0x91f   :  { %v2971_v53 = vmul.f32 %v2967_v38, %v5163_v35  ;;  %v2975_v31 = vsel %vm2852_vm1, %v2972_v13, 0.0 }
 0x920   :  { %v2854_v25 = vadd.f32 %v2853_v18, %v2848_v39  ;;  %v2896_v57 = vadd.f32 %v2895_v40, %v2891_v52  ;;  %v2928_v39 = vld [vmem:[#allocation12 + $0x48] sm:$0xff]  ;;  %v2927_v18 = vld [vmem:[#allocation12 + $0x40] sm:$0xff] }
 0x921   :  { %v2976_v54 = vadd.f32 %v2975_v31, %v2971_v53  ;;  %v2931_v52 = vmul.f32 %v2927_v18, %v5163_v35 }
 0x922   :  { %2855 = vadd.xlane.f32.xlu1 %v2854_v25  ;;  %v3008_v25 = vld [vmem:[#allocation12 + $0x88] sm:$0xff] }
 0x923   :  { %v3012_v13 = vmul.f32 %v3008_v25, %v5156_v12 }
 0x925   :  { %v3015_v31 = vsel %vm2852_vm1, %v3012_v13, 0.0 }
 0x926   :  { %2897 = vadd.xlane.f32.xlu1 %v2896_v57 }
 0x929   :  { %v2833_v60 = vpop.permute.xlu0 %2832 }
 0x92a   :  { %v5182_v11 = vmax.f32 %v2821_v2, %v2833_v60  ;;  %2977 = vadd.xlane.f32.xlu1 %v2976_v54  ;;  %v2831_v29 = vpop.permute.xlu1 %2830 }
 0x92b   :  { %v2835_v45 = vsel %vm2414_vm14, %v2831_v29, %v2833_v60  ;;  %v2847_v60 = vld [vmem:[#allocation12 + $0x18] sm:$0xff] }
 0x92c   :  { %v2842_v56 = vmax.f32 %v2820_v1, %v2835_v45  ;;  %v2894_v63 = vmul.f32 %v5180_v33, %v5182_v11  ;;  %v2934_v24 = vmul.f32 %v5184_v55, %v5182_v11  ;;  %v2974_v6 = vmul.f32 %v5197_v22, %v5182_v11 }
 0x92d   :  { %v3077_v17 = vpop.permute.xlu0 %3076 }
 0x92e   :  { %v3061_v9 = vpop.permute.xlu1 %3060  ;;  %v2893_v28 = vmul.f32 %v5187_v8, %v2842_v56  ;;  %v2899_v44 = vsel %vm2852_vm1, %v2894_v63, 0.0  ;;  %v2933_v10 = vmul.f32 %v5191_v61, %v2842_v56  ;;  %v2939_v62 = vsel %vm2852_vm1, %v2934_v24, 0.0 }
 0x92f   :  { %v3063_v26 = vsel %vm1005_vm6, %v3059_v3, %v3061_v9  ;;  %v5218_v16 = vmax.f32 %v2783_v46, %v3061_v9  ;;  %v2973_v42 = vmul.f32 %v5206_v47, %v2842_v56  ;;  %v2979_v3 = vsel %vm2852_vm1, %v2974_v6, 0.0 }
 0x930   :  { %v5202_v15 = vmax.f32 %v2782_v0, %v3063_v26  ;;  %v2900_v14 = vadd.f32 %v2899_v44, %v2893_v28  ;;  %v2940_v2 = vadd.f32 %v2939_v62, %v2933_v10  ;;  %v3013_v58 = vmul.f32 %v5222_v30, %v2842_v56 }
 0x931   :  { %v3079_v21 = vpop.permute.xlu0 %3078  ;;  %v2980_v46 = vadd.f32 %v2979_v3, %v2973_v42  ;;  %v2851_v24 = vmul.f32 %v2847_v60, %v5182_v11 }
 0x932   :  { %v3084_v27 = vsel %vm2414_vm14, %v3077_v17, %v3079_v21  ;;  %v3091_v23 = vmax.f32 %v3069_v32, %v3079_v21  ;;  %2901 = vadd.xlane.f32.xlu1 %v2900_v14  ;;  %3080 = vrot.lane.b32.xlu0 %v5202_v15, %s4154_s26  ;;  %v3014_v32 = vmul.f32 %v5213_v41, %v5182_v11  ;;  %v2846_v17 = vld [vmem:[#allocation12 + $0x10] sm:$0xff] }
 0x933   :  { %v3090_v0 = vmax.f32 %v5145_v7, %v3084_v27  ;;  %v2857_v28 = vsel %vm2852_vm1, %v2851_v24, 0.0 }
 0x934   :  { %v3198_v1 = vmul.f32 %v3091_v23, %v2968_v36  ;;  %v3019_v48 = vsel %vm2852_vm1, %v3014_v32, 0.0  ;;  %v2932_v36 = vmul.f32 %v2928_v39, %v5156_v12  ;;  %v3095_v54 = vmul.f32 %v3091_v23, %v5154_v4 }
 0x935   :  { %v3197_v19 = vmul.f32 %v3090_v0, %v2967_v38  ;;  %v3020_v59 = vadd.f32 %v3019_v48, %v3013_v58  ;;  %v3007_v38 = vld [vmem:[#allocation12 + $0x80] sm:$0xff]  ;;  %v3094_v45 = vmul.f32 %v3090_v0, %v5161_v49  ;;  %v2850_v12 = vmul.f32 %v2846_v17, %v2842_v56 }
 0x936   :  { %2941 = vadd.xlane.f32.xlu1 %v2940_v2  ;;  %3082 = vrot.lane.b32.xlu0 %v5218_v16, %s4154_s26  ;;  %v3201_v5 = vsel %vm2852_vm1, %v3198_v1, 0.0  ;;  %v2935_v40 = vsel %vm2852_vm1, %v2932_v36, 0.0  ;;  %v3011_v53 = vmul.f32 %v3007_v38, %v5163_v35  ;;  %v3098_v63 = vsel %vm2852_vm1, %v3095_v54, 0.0 }
 0x937   :  { %v3202_v7 = vadd.f32 %v3201_v5, %v3197_v19  ;;  %v2936_v57 = vadd.f32 %v2935_v40, %v2931_v52  ;;  %v3099_v9 = vadd.f32 %v3098_v63, %v3094_v45  ;;  %v3130_v35 = vmul.f32 %v3091_v23, %v5158_v20 }
 0x938   :  { %v3016_v29 = vadd.f32 %v3015_v31, %v3011_v53  ;;  %v2858_v44 = vadd.f32 %v2857_v28, %v2850_v12  ;;  %v3129_v4 = vmul.f32 %v3090_v0, %v5167_v37  ;;  %v3164_v14 = vmul.f32 %v3091_v23, %v2928_v39 }
 0x939   :  { %v3133_v26 = vsel %vm2852_vm1, %v3130_v35, 0.0  ;;  %v3163_v10 = vmul.f32 %v3090_v0, %v2927_v18  ;;  %v3232_v62 = vmul.f32 %v3091_v23, %v3008_v25  ;;  %v3231_v56 = vmul.f32 %v3090_v0, %v3007_v38 }
 0x93a   :  { %2981 = vadd.xlane.f32.xlu1 %v2980_v46  ;;  %v3134_v49 = vadd.f32 %v3133_v26, %v3129_v4  ;;  %v3167_v21 = vsel %vm2852_vm1, %v3164_v14, 0.0 }
 0x93b   :  { %v3168_v11 = vadd.f32 %v3167_v21, %v3163_v10  ;;  %v3235_v6 = vsel %vm2852_vm1, %v3232_v62, 0.0 }
 0x93c   :  { %v3236_v20 = vadd.f32 %v3235_v6, %v3231_v56 }
 0x93e   :  { %3021 = vadd.xlane.f32.xlu1 %v3020_v59 }
 0x955   :  { %2937 = vadd.xlane.f32.xlu0 %v2936_v57 }
 0x959   :  { %3017 = vadd.xlane.f32.xlu0 %v3016_v29  ;;  %v4156_v29 = vmov 4  }
 0x95d   :  { %3100 = vadd.xlane.f32.xlu0 %v3099_v9 }
 0x961   :  { %2859 = vadd.xlane.f32.xlu0 %v2858_v44 }
 0x965   :  { %3135 = vadd.xlane.f32.xlu0 %v3134_v49 }
 0x969   :  { %3169 = vadd.xlane.f32.xlu0 %v3168_v11 }
 0x96d   :  { %3203 = vadd.xlane.f32.xlu0 %v3202_v7 }
 0x971   :  { %3237 = vadd.xlane.f32.xlu0 %v3236_v20 }
 0x9a4   :  { %v3081_v27 = vpop.permute.xlu0 %3080 }
 0x9a8   :  { %v3083_v37 = vpop.permute.xlu0 %3082 }
 0x9a9   :  { %v3085_v2 = vsel %vm2414_vm14, %v3081_v27, %v3083_v37  ;;  %v3093_v42 = vmax.f32 %v5218_v16, %v3083_v37 }
 0x9aa   :  { %v3092_v1 = vmax.f32 %v5202_v15, %v3085_v2 }
 0x9ab   :  { %v3132_v3 = vmul.f32 %v3093_v42, %v5180_v33  ;;  %v3097_v32 = vmul.f32 %v3093_v42, %v2847_v60  ;;  %v3166_v23 = vmul.f32 %v3093_v42, %v5184_v55  ;;  %v3200_v15 = vmul.f32 %v3093_v42, %v5197_v22 }
 0x9ac   :  { %v3131_v0 = vmul.f32 %v3092_v1, %v5187_v8  ;;  %v3096_v19 = vmul.f32 %v3092_v1, %v2846_v17  ;;  %v3165_v48 = vmul.f32 %v3092_v1, %v5191_v61  ;;  %v3199_v55 = vmul.f32 %v3092_v1, %v5206_v47 }
 0x9ad   :  { %v3137_v5 = vsel %vm2852_vm1, %v3132_v3, 0.0  ;;  %v3102_v7 = vsel %vm2852_vm1, %v3097_v32, 0.0  ;;  %v3171_v16 = vsel %vm2852_vm1, %v3166_v23, 0.0  ;;  %v3205_v8 = vsel %vm2852_vm1, %v3200_v15, 0.0 }
 0x9ae   :  { %v3138_v46 = vadd.f32 %v3137_v5, %v3131_v0  ;;  %v3103_v58 = vadd.f32 %v3102_v7, %v3096_v19  ;;  %v3172_v33 = vadd.f32 %v3171_v16, %v3165_v48  ;;  %v3234_v39 = vmul.f32 %v3093_v42, %v5213_v41  ;;  %v5266_v41 = vld [vmem:[%s5356_s8] sm:$0x1]  ;;  %s4159_s8 = smov [#allocation14]  }
 0x9af   :  { %v2856_v59 = vpop.xlane.xlu1 %2855  ;;  %v3206_v36 = vadd.f32 %v3205_v8, %v3199_v55  ;;  %v3233_v25 = vmul.f32 %v3092_v1, %v5222_v30  ;;  %s3272_s3 = sshll.u32 %s4159_s8, 4  ;;  %s3273_s3 = int_to_ptr.vmem [resolvable:$true] %s3272_s3 }
 0x9b0   :  { %3139 = vadd.xlane.f32.xlu0 %v3138_v46  ;;  %3104 = vadd.xlane.f32.xlu1 %v3103_v58  ;;  %v3239_v61 = vsel %vm2852_vm1, %v3234_v39, 0.0  ;;  %v4157_v39 = vmov 2   ;;  %s4103_s15 = scalar_lea.vmem %s3273_s3, 128  ;;  %p4108_p5 = scmp.lt.s32.totalorder %s3273_s3, %s3273_s3 }
 0x9b1   :  { %v3240_v52 = vadd.f32 %v3239_v61, %v3233_v25  ;;  %v4158_v25 = vmov 3   ;;  %v5374_v61 = vmov 0   ;;  %p4104_p4 = scmp.ne.s32.totalorder %s3273_s3, %s4103_s15  ;;  %p4109_p6 = scmp.lt.s32.totalorder %s4103_s15, %s4103_s15 }
 0x9b3   :  { %v2898_v18 = vpop.xlane.xlu1 %2897  ;;  %p4110_p7 = por %p4109_p6, %p4108_p5 }
 0x9b4   :  { %3173 = vadd.xlane.f32.xlu0 %v3172_v33 }
 0x9b5   :  { %p4111_p8 = pnand %p4110_p7, %p4104_p4 }
 0x9b7   :  { %v2978_v40 = vpop.xlane.xlu1 %2977 }
 0x9b8   :  { %3207 = vadd.xlane.f32.xlu0 %v3206_v36 }
 0x9bc   :  { %3241 = vadd.xlane.f32.xlu0 %v3240_v52 }
 0x9bf   :  { %v2902_v22 = vpop.xlane.xlu1 %2901 }
 0x9c0   :  { %v2903_v38 = vadd.f32 %v2902_v22, %v2898_v18 }
 0x9c2   :  { %v2904_v13 = vrot.slane %v2903_v38, 4 }
 0x9c3   :  { %v2942_v45 = vpop.xlane.xlu1 %2941 }
 0x9c4   :  { %v2905_v57 = vadd.f32 %v2904_v13, %v2903_v38 }
 0x9c6   :  { %v2906_v47 = vrot.slane %v2905_v57, 2 }
 0x9c7   :  { %v2982_v63 = vpop.xlane.xlu1 %2981 }
 0x9c8   :  { %v2907_v53 = vadd.f32 %v2906_v47, %v2905_v57  ;;  %v2983_v44 = vadd.f32 %v2982_v63, %v2978_v40 }
 0x9ca   :  { %v2908_v31 = vrot.slane %v2907_v53, 1  ;;  %v2984_v10 = vrot.slane %v2983_v44, 4 }
 0x9cb   :  { %v3022_v9 = vpop.xlane.xlu1 %3021 }
 0x9cc   :  { %v2909_v54 = vadd.f32 %v2908_v31, %v2907_v53  ;;  %v2985_v20 = vadd.f32 %v2984_v10, %v2983_v44 }
 0x9ce   :  { %v2910_v30 = vadd.f32 %v2909_v54, %v5266_v41  ;;  %v2986_v3 = vrot.slane %v2985_v20, 2 }
 0x9d0   :  { %v2919_v60 = vrot.slane %v2910_v30, %v4331_v51  ;;  %v2987_v7 = vadd.f32 %v2986_v3, %v2985_v20 }
 0x9d2   :  { %2921 = vperm.xlu1 %3999, %v2919_v60  }
 0x9d6   :  { %4002 = vset.pattern.permute.xlu1 %v4156_v29 }
 0x9e2   :  { %v2938_v17 = vpop.xlane.xlu0 %2937 }
 0x9e3   :  { %v2943_v24 = vadd.f32 %v2942_v45, %v2938_v17 }
 0x9e5   :  { %v2944_v35 = vrot.slane %v2943_v24, 4 }
 0x9e6   :  { %v3018_v12 = vpop.xlane.xlu0 %3017 }
 0x9e7   :  { %v3023_v28 = vadd.f32 %v3022_v9, %v3018_v12  ;;  %v2945_v49 = vadd.f32 %v2944_v35, %v2943_v24 }
 0x9e9   :  { %v3024_v4 = vrot.slane %v3023_v28, 4  ;;  %v2946_v6 = vrot.slane %v2945_v49, 2 }
 0x9ea   :  { %v3101_v26 = vpop.xlane.xlu0 %3100 }
 0x9eb   :  { %v3025_v14 = vadd.f32 %v3024_v4, %v3023_v28  ;;  %v2947_v1 = vadd.f32 %v2946_v6, %v2945_v49 }
 0x9ed   :  { %v3026_v21 = vrot.slane %v3025_v14, 2  ;;  %v2948_v5 = vrot.slane %v2947_v1, 1 }
 0x9ee   :  { %v2860_v11 = vpop.xlane.xlu0 %2859 }
 0x9ef   :  { %v3027_v62 = vadd.f32 %v3026_v21, %v3025_v14  ;;  %v2861_v56 = vadd.f32 %v2860_v11, %v2856_v59  ;;  %v2949_v48 = vadd.f32 %v2948_v5, %v2947_v1  ;;  %v2988_v59 = vrot.slane %v2987_v7, 1 }
 0x9f1   :  { %v3028_v27 = vrot.slane %v3027_v62, 1  ;;  %v2862_v37 = vrot.slane %v2861_v56, 4  ;;  %v2950_v33 = vadd.f32 %v2949_v48, %v5266_v41  ;;  %v2989_v55 = vadd.f32 %v2988_v59, %v2987_v7 }
 0x9f3   :  { %v3029_v2 = vadd.f32 %v3028_v27, %v3027_v62  ;;  %v2863_v42 = vadd.f32 %v2862_v37, %v2861_v56  ;;  %v2959_v8 = vrot.slane %v2950_v33, %v4331_v51  ;;  %v2990_v18 = vadd.f32 %v2989_v55, %v5266_v41 }
 0x9f5   :  { %v3030_v32 = vadd.f32 %v3029_v2, %v5266_v41  ;;  %v2864_v23 = vrot.slane %v2863_v42, 2  ;;  %v2999_v36 = vrot.slane %v2990_v18, %v4331_v51  ;;  %v5375_v18 = vlaneseq }
 0x9f7   :  { %v2865_v0 = vadd.f32 %v2864_v23, %v2863_v42  ;;  %v3039_v19 = vrot.slane %v3030_v32, %v4331_v51 }
 0x9f9   :  { %v2866_v46 = vrot.slane %v2865_v0, 1  ;;  %3041 = vperm.xlu1 %4002, %v3039_v19  }
 0x9fb   :  { %v2867_v58 = vadd.f32 %v2866_v46, %v2865_v0 }
 0x9fd   :  { %v2869_v16 = vadd.f32 %v5266_v41, %v2867_v58  ;;  %4004 = vset.pattern.permute.xlu1 %v5373_v34  ;;  %v3136_v34 = vpop.xlane.xlu0 %3135 }
 0x9ff   :  { %v2879_v15 = vrot.slane %v2869_v16, %v4331_v51 }
 0xa01   :  { %2881 = vperm.xlu0 %3998, %v2879_v15   ;;  %v3170_v52 = vpop.xlane.xlu0 %3169 }
 0xa05   :  { %4000 = vset.pattern.permute.xlu0 %v4157_v39  ;;  %v3204_v40 = vpop.xlane.xlu0 %3203 }
 0xa06   :  { %2961 = vperm.xlu0 %4000, %v2959_v8  }
 0xa09   :  { %v3238_v22 = vpop.xlane.xlu0 %3237 }
 0xa0a   :  { %4001 = vset.pattern.permute.xlu0 %v4158_v25 }
 0xa0b   :  { %3001 = vperm.xlu0 %4001, %v2999_v36   ;;  %v2795_v36 = vand.u32 127, %v5375_v18 }
 0xa0d   :  { %vm2871_vm2 = vcmp.eq.s32.totalorder %v2795_v36, 0  ;;  %vm2911_vm4 = vcmp.eq.s32.totalorder %v2795_v36, 1  ;;  %vm2951_vm5 = vcmp.eq.s32.totalorder %v2795_v36, 2  ;;  %vm2991_vm8 = vcmp.eq.s32.totalorder %v2795_v36, 3 }
 0xa0e   :  { %vm2872_vm6 = vmand %vm2870_vm3, %vm2871_vm2  ;;  %vm3031_vm11 = vcmp.eq.s32.totalorder %v2795_v36, 4 }
 0xa0f   :  { %4003 = vset.pattern.permute.xlu0 %v5374_v61  ;;  %vm2912_vm7 = vmand %vm2870_vm3, %vm2911_vm4 }
 0xa10   :  { %vm2952_vm9 = vmand %vm2870_vm3, %vm2951_vm5 }
 0xa11   :  { %vm2992_vm10 = vmand %vm2870_vm3, %vm2991_vm8 }
 0xa12   :  { %vm3032_vm13 = vmand %vm2870_vm3, %vm3031_vm11 }
 0xa13   :  { %vm3115_vm14 = vmand %vm3114_vm12, %vm2871_vm2 }
 0xa14   :  { %vm3149_vm15 = vmand %vm3114_vm12, %vm2911_vm4 }
 0xa15   :  { %vm3183_vm0 = vmand %vm3114_vm12, %vm2951_vm5 }
 0xa16   :  { %vm3217_vm1 = vmand %vm3114_vm12, %vm2991_vm8 }
 0xa17   :  { %vm3251_vm2 = vmand %vm3114_vm12, %vm3031_vm11 }
 0xa3d   :  { %v3140_v38 = vpop.xlane.xlu0 %3139  ;;  %v3105_v13 = vpop.xlane.xlu1 %3104 }
 0xa3e   :  { %v3141_v57 = vadd.f32 %v3140_v38, %v3136_v34  ;;  %v3106_v47 = vadd.f32 %v3105_v13, %v3101_v26 }
 0xa40   :  { %v3142_v53 = vrot.slane %v3141_v57, 4  ;;  %v3107_v31 = vrot.slane %v3106_v47, 4 }
 0xa41   :  { %v3174_v54 = vpop.xlane.xlu0 %3173 }
 0xa42   :  { %v3143_v30 = vadd.f32 %v3142_v53, %v3141_v57  ;;  %v3108_v60 = vadd.f32 %v3107_v31, %v3106_v47  ;;  %v3175_v45 = vadd.f32 %v3174_v54, %v3170_v52  ;;  %v3315_v52 = vsel %vm2992_vm10, 1.0, %v5371_v43 }
 0xa43   :  { %v3316_v31 = vsel %vm3032_vm13, 1.0, %v5371_v43  ;;  %v3317_v54 = vsel %vm3115_vm14, 1.0, %v5371_v43 }
 0xa44   :  { %v3144_v63 = vrot.slane %v3143_v30, 2  ;;  %v3109_v17 = vrot.slane %v3108_v60, 2  ;;  %v3176_v24 = vrot.slane %v3175_v45, 4 }
 0xa45   :  { %v3208_v9 = vpop.xlane.xlu0 %3207 }
 0xa46   :  { %v3145_v12 = vadd.f32 %v3144_v63, %v3143_v30  ;;  %v3110_v28 = vadd.f32 %v3109_v17, %v3108_v60  ;;  %v3177_v35 = vadd.f32 %v3176_v24, %v3175_v45  ;;  %v3209_v44 = vadd.f32 %v3208_v9, %v3204_v40 }
 0xa47   :  { %v3318_v9 = vsel %vm3149_vm15, 1.0, %v5371_v43 }
 0xa48   :  { %v3146_v4 = vrot.slane %v3145_v12, 1  ;;  %v3111_v14 = vrot.slane %v3110_v28, 1  ;;  %v3178_v49 = vrot.slane %v3177_v35, 2  ;;  %v3210_v10 = vrot.slane %v3209_v44, 4 }
 0xa49   :  { %v3242_v21 = vpop.xlane.xlu0 %3241 }
 0xa4a   :  { %v3147_v26 = vadd.f32 %v3146_v4, %v3145_v12  ;;  %v3112_v11 = vadd.f32 %v3111_v14, %v3110_v28  ;;  %v3179_v62 = vadd.f32 %v3178_v49, %v3177_v35  ;;  %v3211_v56 = vadd.f32 %v3210_v10, %v3209_v44 }
 0xa4b   :  { %v3243_v6 = vadd.f32 %v3242_v21, %v3238_v22  ;;  %v3319_v35 = vsel %vm3183_vm0, 1.0, %v5371_v43  ;;  %v3320_v4 = vsel %vm3217_vm1, 1.0, %v5371_v43 }
 0xa4c   :  { %v3148_v20 = vadd.f32 %v3147_v26, %v5266_v41  ;;  %v3113_v27 = vadd.f32 %v3112_v11, %v5266_v41  ;;  %v3180_v37 = vrot.slane %v3179_v62, 1  ;;  %v3212_v2 = vrot.slane %v3211_v56, 2 }
 0xa4d   :  { %v3244_v42 = vrot.slane %v3243_v6, 4  ;;  %v3321_v26 = vsel %vm3251_vm2, 1.0, %v5371_v43 }
 0xa4e   :  { %v3181_v1 = vadd.f32 %v3180_v37, %v3179_v62  ;;  %v3213_v3 = vadd.f32 %v3212_v2, %v3211_v56  ;;  %v3156_v32 = vrot.slane %v3148_v20, %v4331_v51  ;;  %v3122_v23 = vrot.slane %v3113_v27, %v4331_v51 }
 0xa4f   :  { %v3245_v0 = vadd.f32 %v3244_v42, %v3243_v6 }
 0xa50   :  { %v3182_v19 = vadd.f32 %v3181_v1, %v5266_v41  ;;  %v3214_v5 = vrot.slane %v3213_v3, 1  ;;  %3158 = vperm.xlu1 %4004, %v3156_v32   ;;  %3124 = vperm.xlu0 %4003, %v3122_v23  }
 0xa51   :  { %v3246_v7 = vrot.slane %v3245_v0, 2 }
 0xa52   :  { %v3215_v46 = vadd.f32 %v3214_v5, %v3213_v3  ;;  %v3190_v58 = vrot.slane %v3182_v19, %v4331_v51 }
 0xa53   :  { %v3247_v48 = vadd.f32 %v3246_v7, %v3245_v0 }
 0xa54   :  { %v3216_v59 = vadd.f32 %v3215_v46, %v5266_v41  ;;  %4005 = vset.pattern.permute.xlu1 %v4157_v39  ;;  %4008 = vset.pattern.permute.xlu0 %v4156_v29  ;;  %v2922_v39 = vpop.permute.xlu1 %2921 }
 0xa55   :  { %v3248_v16 = vrot.slane %v3247_v48, 1  ;;  %3192 = vperm.xlu1 %4005, %v3190_v58  }
 0xa56   :  { %v3224_v33 = vrot.slane %v3216_v59, %v4331_v51 }
 0xa57   :  { %v3249_v15 = vadd.f32 %v3248_v16, %v3247_v48 }
 0xa59   :  { %v3250_v55 = vadd.f32 %v3249_v15, %v5266_v41  ;;  %4006 = vset.pattern.permute.xlu1 %v4158_v25  ;;  %v3312_v41 = vsel %vm2872_vm6, 1.0, %v5371_v43  ;;  %v3314_v25 = vsel %vm2952_vm9, 1.0, %v5371_v43 }
 0xa5a   :  { %3226 = vperm.xlu1 %4006, %v3224_v33  }
 0xa5b   :  { %v3258_v8 = vrot.slane %v3250_v55, %v4331_v51 }
 0xa5e   :  { %4007 = vset.pattern.permute.xlu1 %v4156_v29  ;;  %v3313_v29 = vsel %vm2912_vm7, 1.0, %v5371_v43 }
 0xa5f   :  { %3260 = vperm.xlu1 %4007, %v3258_v8   ;;  %v2924_v22 = vmul.f32 %v3313_v29, %v2922_v39 }
 0xa78   :  { %v3042_v13 = vpop.permute.xlu1 %3041 }
 0xa79   :  { %v3044_v63 = vmul.f32 %v3316_v31, %v3042_v13 }
 0xa80   :  { %v2882_v61 = vpop.permute.xlu0 %2881 }
 0xa81   :  { %v2884_v34 = vmul.f32 %v3312_v41, %v2882_v61 }
 0xa83   :  { %v2925_v57 = vadd.f32 %v2924_v22, %v2884_v34 }
 0xa85   :  { %v2962_v51 = vpop.permute.xlu0 %2961 }
 0xa86   :  { %v2964_v38 = vmul.f32 %v3314_v25, %v2962_v51 }
 0xa88   :  { %v2965_v53 = vadd.f32 %v2964_v38, %v2925_v57 }
 0xa8a   :  { %v3002_v40 = vpop.permute.xlu0 %3001 }
 0xa8b   :  { %v3004_v47 = vmul.f32 %v3315_v52, %v3002_v40 }
 0xa8d   :  { %v3005_v30 = vadd.f32 %v3004_v47, %v2965_v53 }
 0xa8f   :  { %v3045_v24 = vadd.f32 %v3044_v63, %v3005_v30 }
 0xacf   :  { %v3125_v60 = vpop.permute.xlu0 %3124  ;;  %v3159_v45 = vpop.permute.xlu1 %3158 }
 0xad0   :  { %v3127_v17 = vmul.f32 %v3317_v54, %v3125_v60  ;;  %v3161_v44 = vmul.f32 %v3318_v9, %v3159_v45 }
 0xad2   :  { %v3128_v28 = vadd.f32 %v3127_v17, %v3045_v24 }
 0xad4   :  { %v3193_v12 = vpop.permute.xlu1 %3192  ;;  %v3162_v14 = vadd.f32 %v3161_v44, %v3128_v28 }
 0xad5   :  { %v3195_v49 = vmul.f32 %v3319_v35, %v3193_v12 }
 0xad7   :  { %v3196_v11 = vadd.f32 %v3195_v49, %v3162_v14 }
 0xad9   :  { %v3227_v10 = vpop.permute.xlu1 %3226 }
 0xada   :  { %v3229_v21 = vmul.f32 %v3320_v4, %v3227_v10 }
 0xadc   :  { %v3230_v56 = vadd.f32 %v3229_v21, %v3196_v11 }
 0xade   :  { %v3261_v62 = vpop.permute.xlu1 %3260 }
 0xadf   :  { %v3263_v6 = vmul.f32 %v3321_v26, %v3261_v62 }
 0xae1   :  { %v3264_v20 = vadd.f32 %v3263_v6, %v3230_v56 }
 0xae3   :  { %3265 = vst [vmem:[#allocation14] sm:$0xff] %v3264_v20 }
 0xae4   :  { %4114 = shalt.err (!%p4111_p8)
}
 0xae5   :  { %s4115_s17 = scalar_lea.hbm %s5357_s9, 128 }
 0xae6   :  { %p4116_p9 = scmp.ne.s32.totalorder %s5357_s9, %s4115_s17  ;;  %p4119_p10 = scmp.lt.u32.totalorder %s4115_s17, %s5357_s9 }
 0xae8   :  { %p4121_p11 = pnand %p4119_p10, %p4116_p9 }
 0xaea   :  { %4124 = shalt.err (!%p4121_p11)
}
 0xaeb   :  { %3275 = dma.vmem_to_hbm [thread:$0]  %s3273_s3, 128, %s5357_s9, [#allocation8]  }
 0xaec   :  { %4131 = dma.done.wait [#allocation8], 128  }
 0xaed   :  { %4132 = vsyncadd [#allocation8], 4294967168 }
 0xaee   :  { %3279 = vsyncpa [#allocation7], 1 }
 0xaef   :  { %3280 = vsyncpa [#allocation10], 1 }
 0xaf0   :  { %3281 = vsyncpa [#allocation13], 1 }
 0xaf1   :  { %3282 = vsyncpa [#allocation8], 1 }

</bundles_post_ra>
